<compile_context>
chip_gen: v6e
topology: v6e:2x2x1
jax: 0.10.0
libtpu: 0.0.40
codegen_flags: <defaults>
</compile_context>

<pallas_src>
import functools

import jax
import jax.numpy as jnp
from jax.experimental import pallas as pl
from jax.experimental.pallas import tpu as pltpu

CONV_DTYPE = jnp.bfloat16          # narrow dot inputs; f32 accumulation + f32 epilogue
FC_DTYPE = jnp.bfloat16
LANE = 128
CHS = [3, 32, 64, 128, 256]
CONV_CFG = (((5, 5), (2, 2)),
            ((3, 3), (2, 2)),
            ((3, 3), (2, 2)),
            ((3, 3), (2, 2)))


def _round_up(x, m):
    return (x + m - 1) // m * m


# ---------------------------------------------------------------------------
# im2col (XLA side): tap-major-then-channel patches, same ordering as the
# reshaped weight matrix below.  Lowers to one fused slice+concat per layer.
# ---------------------------------------------------------------------------
def _im2col_nhwc(x, k, s):
    """x: (N, H, W, C) -> (patches (N, oh, ow, kh*kw*C), (oh, ow))."""
    n, h, w, c = x.shape
    kh, kw = k
    sh, sw = s
    oh = (h - kh) // sh + 1
    ow = (w - kw) // sw + 1
    cols = [x[:, i:i + sh * (oh - 1) + 1:sh, j:j + sw * (ow - 1) + 1:sw, :]
            for i in range(kh) for j in range(kw)]
    return jnp.concatenate(cols, axis=-1), (oh, ow)


# ---------------------------------------------------------------------------
# Pallas kernel: conv as im2col GEMM + BN (f32 scale/shift) + ReLU.
# One grid step computes a (TM, OC) tile of one image's flattened output.
# ---------------------------------------------------------------------------
def _conv_gemm_kernel(p_ref, w_ref, aff_ref, o_ref):
    # p_ref: (1, TM, Kp) bf16   w_ref: (Kp, OC) bf16   aff_ref: (2, OC) f32
    acc = jnp.dot(p_ref[0], w_ref[...], preferred_element_type=jnp.float32)
    y = jnp.maximum(acc * aff_ref[0:1, :] + aff_ref[1:2, :], 0.0)
    o_ref[0, :, :] = y.astype(o_ref.dtype)


def conv_gemm(pat, wmat, aff):
    """pat: (N, M, Kp) bf16 patches; wmat: (Kp, OC) bf16; aff: (2, OC) f32.
    Returns relu((pat @ wmat) * scale + shift) as (N, M, OC) bf16."""
    n, m, kp = pat.shape
    oc = wmat.shape[1]
    # Largest M tile keeping the f32 result tile <= ~16 vregs (64 KiB).
    tm = min(m, max(8, (16384 // oc) // 8 * 8))
    grid = (n, pl.cdiv(m, tm))                  # partial last M tile handled by Pallas
    return pl.pallas_call(
        _conv_gemm_kernel,
        out_shape=jax.ShapeDtypeStruct((n, m, oc), CONV_DTYPE),
        grid=grid,
        in_specs=[
            pl.BlockSpec((1, tm, kp), lambda i, t: (i, t, 0)),
            pl.BlockSpec((kp, oc), lambda i, t: (0, 0)),     # weights stay resident
            pl.BlockSpec((2, oc), lambda i, t: (0, 0)),
        ],
        out_specs=pl.BlockSpec((1, tm, oc), lambda i, t: (i, t, 0)),
        compiler_params=pltpu.CompilerParams(
            dimension_semantics=("parallel", "parallel")),
    )(pat, wmat, aff)


# ---------------------------------------------------------------------------
# Pallas kernel: fused conv4 -> flatten -> fc1 -> relu -> fc2 -> relu ->
# (dropout: eval identity) -> fc3, one call for the whole batch.
# ---------------------------------------------------------------------------
def _conv4_fc_kernel(p4_ref, w4_ref, aff4_ref, w1_ref, b1_ref, w2_ref, b2_ref,
                     w3_ref, b3_ref, o_ref, *, n_batch, n_pix):
    # conv4 GEMM over all (pixel-major, image) rows at once: M = P4 * N.
    acc4 = jnp.dot(p4_ref[...], w4_ref[...], preferred_element_type=jnp.float32)
    h4 = jnp.maximum(acc4 * aff4_ref[0:1, :] + aff4_ref[1:2, :], 0.0)
    h4 = h4.astype(jnp.bfloat16)
    # fc1 as a sum of per-pixel dots (rows ordered p*N + n); this reproduces torch's
    # NCHW flatten exactly without any in-kernel reshape / transpose.
    acc1 = jnp.zeros((n_batch, b1_ref.shape[1]), jnp.float32)
    for p in range(n_pix):
        acc1 = acc1 + jnp.dot(h4[p * n_batch:(p + 1) * n_batch, :], w1_ref[p],
                              preferred_element_type=jnp.float32)
    h1 = jnp.maximum(acc1 + b1_ref[...], 0.0).astype(jnp.bfloat16)
    h2 = jnp.maximum(jnp.dot(h1, w2_ref[...], preferred_element_type=jnp.float32)
                     + b2_ref[...], 0.0).astype(jnp.bfloat16)
    # TODO(synk): F.dropout(p=0.3) is identity in eval mode; training mask not implemented.
    out = jnp.dot(h2, w3_ref[...], preferred_element_type=jnp.float32) + b3_ref[...]
    o_ref[...] = out.astype(o_ref.dtype)


def conv4_fc_tail(pat4_pm, conv4_prep, fc_prep, n_batch, n_pix):
    w4, aff4 = conv4_prep
    w1r, b1, w2t, b2, w3t, b3 = fc_prep
    embed = w3t.shape[1]
    operands = (pat4_pm, w4, aff4, w1r, b1, w2t, b2, w3t, b3)
    kernel = functools.partial(_conv4_fc_kernel, n_batch=n_batch, n_pix=n_pix)
    in_specs = [pl.BlockSpec(a.shape, lambda i, nd=a.ndim: (0,) * nd) for a in operands]
    return pl.pallas_call(
        kernel,
        out_shape=jax.ShapeDtypeStruct((n_batch, embed), jnp.float32),
        grid=(1,),
        in_specs=in_specs,
        out_specs=pl.BlockSpec((n_batch, embed), lambda i: (0, 0)),
        compiler_params=pltpu.CompilerParams(dimension_semantics=("arbitrary",)),
    )(*operands)


# ---------------------------------------------------------------------------
# Forward pass
# ---------------------------------------------------------------------------
def encoder_cnn_forward(x_nchw, prep):
    n = x_nchw.shape[0]
    # Model-boundary layout change only: NCHW -> NHWC (channels on the lane dim), bf16.
    x = jnp.transpose(x_nchw, (0, 2, 3, 1)).astype(CONV_DTYPE)

    # conv1..conv3: XLA-built im2col patches feeding one GEMM+BN+ReLU Pallas call each.
    for li in range(3):
        k, s = CONV_CFG[li]
        wmat, aff = prep[f"conv{li + 1}"]
        pat, (oh, ow) = _im2col_nhwc(x, k, s)
        kp = wmat.shape[0]                                   # K padded to multiple of 128
        if pat.shape[-1] < kp:
            pat = jnp.pad(pat, ((0, 0), (0, 0), (0, 0), (0, kp - pat.shape[-1])))
        y = conv_gemm(pat.reshape(n, oh * ow, kp), wmat, aff)
        x = y.reshape(n, oh, ow, wmat.shape[1])

    # conv4 + fc1/fc2/fc3 fused into a single Pallas call.
    k, s = CONV_CFG[3]
    w4, _ = prep["conv4"]
    pat4, (oh4, ow4) = _im2col_nhwc(x, k, s)
    kp4 = w4.shape[0]
    if pat4.shape[-1] < kp4:
        pat4 = jnp.pad(pat4, ((0, 0), (0, 0), (0, 0), (0, kp4 - pat4.shape[-1])))
    n_pix = oh4 * ow4
    # Pixel-major rows: row index = pixel * N + image, matching the fc1 weight layout.
    pat4_pm = jnp.transpose(pat4, (1, 2, 0, 3)).reshape(n_pix * n, kp4)
    return conv4_fc_tail(pat4_pm, prep["conv4"], prep["fc"], n, n_pix)


# ---------------------------------------------------------------------------
# One-time parameter preparation (outside the hot path): weight matricization,
# K padding to 128 multiples, BN scale/shift as f32 epilogue terms, FC rearrange.
# ---------------------------------------------------------------------------
def prepare_params(params, conv4_shape):
    eps = 1e-5
    prep = {}
    for li in range(4):
        w, b, gamma, beta, mean, var = params[f"conv{li + 1}"]
        oc, ic, kh, kw = w.shape
        scale = gamma / jnp.sqrt(var + eps)                  # f32, applied in f32 epilogue
        shift = (b - mean) * scale + beta                    # conv bias + BN shift, f32
        # (kh*kw*Cin, OC), tap-major then channel (matches _im2col_nhwc ordering).
        wmat = jnp.transpose(w, (2, 3, 1, 0)).reshape(kh * kw * ic, oc)
        kp = _round_up(kh * kw * ic, LANE)                   # zero rows: exact, lane-dense LHS
        wmat = jnp.pad(wmat, ((0, kp - kh * kw * ic), (0, 0)))
        aff = jnp.stack([scale, shift]).astype(jnp.float32)  # (2, OC)
        prep[f"conv{li + 1}"] = (wmat.astype(CONV_DTYPE), aff)

    # FC: rearrange fc1's columns from torch's NCHW flatten (idx = c*P4 + p) into a
    # per-pixel stack (P4, C4, H1); pre-transpose fc2/fc3 to (in, out); bf16 weights.
    h4, w4s = conv4_shape
    p4 = h4 * w4s
    c4 = CHS[4]
    w1, b1 = params["fc1"]
    w2, b2 = params["fc2"]
    w3, b3 = params["fc3"]
    w1r = jnp.transpose(w1.reshape(w1.shape[0], c4, p4), (2, 1, 0))   # (P4, C4, H1)
    prep["fc"] = (w1r.astype(FC_DTYPE), b1.reshape(1, -1).astype(jnp.float32),
                  w2.T.astype(FC_DTYPE), b2.reshape(1, -1).astype(jnp.float32),
                  w3.T.astype(FC_DTYPE), b3.reshape(1, -1).astype(jnp.float32))
    return prep


# ---------------------------------------------------------------------------
# Deterministic parameter construction (synthetic, matches module shapes)
# ---------------------------------------------------------------------------
def make_params(key, img_x, img_y, fc_hidden1, fc_hidden2, embed_dim):
    def conv_out(sz, k, st):
        return ((sz[0] - (k[0] - 1) - 1) // st[0] + 1,
                (sz[1] - (k[1] - 1) - 1) // st[1] + 1)

    ks = [(5, 5), (3, 3), (3, 3), (3, 3)]
    shape = (img_x, img_y)
    keys = jax.random.split(key, 32)
    ki = iter(range(32))
    params = {}
    for li in range(4):
        ic, oc, k = CHS[li], CHS[li + 1], ks[li]
        w = 0.05 * jax.random.normal(keys[next(ki)], (oc, ic, k[0], k[1]), jnp.float32)
        b = 0.05 * jax.random.normal(keys[next(ki)], (oc,), jnp.float32)
        gamma = 1.0 + 0.1 * jax.random.normal(keys[next(ki)], (oc,), jnp.float32)
        beta = 0.1 * jax.random.normal(keys[next(ki)], (oc,), jnp.float32)
        mean = 0.1 * jax.random.normal(keys[next(ki)], (oc,), jnp.float32)
        var = 0.5 + jax.random.uniform(keys[next(ki)], (oc,), jnp.float32)
        params[f"conv{li + 1}"] = (w, b, gamma, beta, mean, var)
        shape = conv_out(shape, k, (2, 2))

    fc_in = CHS[4] * shape[0] * shape[1]
    dims = [(fc_in, fc_hidden1), (fc_hidden1, fc_hidden2), (fc_hidden2, embed_dim)]
    for li, (din, dout) in enumerate(dims):
        w = 0.05 * jax.random.normal(keys[next(ki)], (dout, din), jnp.float32)  # torch (out, in)
        b = 0.05 * jax.random.normal(keys[next(ki)], (dout,), jnp.float32)
        params[f"fc{li + 1}"] = (w, b)
    return params, shape


# ---------------------------------------------------------------------------
# Pure-JAX reference (NCHW, f32) for correctness check
# ---------------------------------------------------------------------------
def reference_forward(x, params):
    def conv_block(x, p, stride):
        w, b, gamma, beta, mean, var = p
        y = jax.lax.conv_general_dilated(
            x, w, window_strides=stride, padding="VALID",
            dimension_numbers=("NCHW", "OIHW", "NCHW"),
            precision=jax.lax.Precision.HIGHEST)
        y = y + b[None, :, None, None]
        y = (y - mean[None, :, None, None]) / jnp.sqrt(var[None, :, None, None] + 1e-5)
        y = y * gamma[None, :, None, None] + beta[None, :, None, None]
        return jnp.maximum(y, 0.0)

    for name in ("conv1", "conv2", "conv3", "conv4"):
        x = conv_block(x, params[name], (2, 2))
    x = x.reshape(x.shape[0], -1)
    w1, b1 = params["fc1"]
    w2, b2 = params["fc2"]
    w3, b3 = params["fc3"]
    x = jnp.maximum(x @ w1.T + b1, 0.0)
    x = jnp.maximum(x @ w2.T + b2, 0.0)
    return x @ w3.T + b3


if __name__ == "__main__":
    # Small shapes consistent with the module (scaled-down img / hidden dims).
    batch, img_x_, img_y_ = 2, 64, 64          # conv4 output -> (2, 2), flatten = 256*2*2
    fc_hidden1 = fc_hidden2 = 128
    embed_dim = 64

    key = jax.random.PRNGKey(0)
    kx, kp = jax.random.split(key)
    x = jax.random.normal(kx, (batch, 3, img_x_, img_y_), jnp.float32)
    params, conv4_shape = make_params(kp, img_x_, img_y_, fc_hidden1, fc_hidden2, embed_dim)
    prep = prepare_params(params, conv4_shape)

    fwd = jax.jit(encoder_cnn_forward)
    out = jax.block_until_ready(fwd(x, prep))

    assert out.shape == (batch, embed_dim), out.shape
    ref = reference_forward(x, params)
    max_err = float(jnp.max(jnp.abs(out - ref)))
    assert bool(jnp.allclose(out, ref, atol=5e-2, rtol=5e-2)), max_err
    print("KERNEL_OK")
</pallas_src>

<mosaic_0001>
module attributes {stable_mosaic.version = 11 : i64} {
  func.func @_conv_gemm_kernel(%arg0: i32, %arg1: i32, %arg2: memref<1x512x128xbf16, #tpu.memory_space<vmem>>, %arg3: memref<128x32xbf16, #tpu.memory_space<vmem>>, %arg4: memref<2x32xf32, #tpu.memory_space<vmem>>, %arg5: memref<1x512x32xbf16, #tpu.memory_space<vmem>>) attributes {dimension_semantics = [#tpu.dimension_semantics<parallel>, #tpu.dimension_semantics<parallel>], iteration_bounds = array<i64: 2, 2>, scalar_prefetch = 0 : i64, scratch_operands = 0 : i64, tpu.core_type = #tpu.core_type<tc>, window_params = [{transform_indices = @transform_0, window_bounds = array<i64: 1, 512, 128>}, {pipeline_mode = #tpu.pipeline_mode<synchronous>, transform_indices = @transform_1, window_bounds = array<i64: 128, 32>}, {pipeline_mode = #tpu.pipeline_mode<synchronous>, transform_indices = @transform_2, window_bounds = array<i64: 2, 32>}, {transform_indices = @transform_3, window_bounds = array<i64: 1, 512, 32>}]} {
    %c0 = arith.constant 0 : index
    %c0_0 = arith.constant 0 : index
    %c0_1 = arith.constant 0 : index
    %0 = vector.load %arg2[%c0, %c0_0, %c0_1] : memref<1x512x128xbf16, #tpu.memory_space<vmem>>, vector<1x512x128xbf16>
    %1 = vector.shape_cast %0 : vector<1x512x128xbf16> to vector<512x128xbf16>
    %c0_2 = arith.constant 0 : index
    %c0_3 = arith.constant 0 : index
    %2 = vector.load %arg3[%c0_2, %c0_3] : memref<128x32xbf16, #tpu.memory_space<vmem>>, vector<128x32xbf16>
    %cst = arith.constant dense<0.000000e+00> : vector<512x32xf32>
    %3 = tpu.matmul %1, %2, %cst {dimension_numbers = #tpu.dot_dimension_numbers<[1], [0], [0], [1], [0, 0, 1, 1], [], []>} : vector<512x128xbf16>, vector<128x32xbf16>, vector<512x32xf32> -> vector<512x32xf32>
    %c0_4 = arith.constant 0 : index
    %c0_5 = arith.constant 0 : index
    %4 = vector.load %arg4[%c0_4, %c0_5] : memref<2x32xf32, #tpu.memory_space<vmem>>, vector<1x32xf32>
    %5 = vector.broadcast %4 : vector<1x32xf32> to vector<512x32xf32>
    %6 = arith.mulf %3, %5 : vector<512x32xf32>
    %c1 = arith.constant 1 : index
    %c0_6 = arith.constant 0 : index
    %7 = vector.load %arg4[%c1, %c0_6] : memref<2x32xf32, #tpu.memory_space<vmem>>, vector<1x32xf32>
    %8 = vector.broadcast %7 : vector<1x32xf32> to vector<512x32xf32>
    %9 = arith.addf %6, %8 : vector<512x32xf32>
    %cst_7 = arith.constant 0.000000e+00 : f32
    %10 = vector.broadcast %cst_7 : f32 to vector<512x32xf32>
    %11 = arith.maximumf %9, %10 : vector<512x32xf32>
    %12 = arith.truncf %11 : vector<512x32xf32> to vector<512x32xbf16>
    %c0_8 = arith.constant 0 : index
    %c0_9 = arith.constant 0 : index
    %c0_10 = arith.constant 0 : index
    %13 = vector.load %arg5[%c0_8, %c0_9, %c0_10] : memref<1x512x32xbf16, #tpu.memory_space<vmem>>, vector<1x512x32xbf16>
    %14 = vector.shape_cast %13 : vector<1x512x32xbf16> to vector<512x32xbf16>
    %15 = vector.shape_cast %12 : vector<512x32xbf16> to vector<1x512x32xbf16>
    tpu.vector_store %arg5[%c0_8, %c0_9, %c0_10], %15 {strides = array<i32>} : memref<1x512x32xbf16, #tpu.memory_space<vmem>>, vector<1x512x32xbf16>,
    return
  }
  func.func @transform_0(%arg0: i32, %arg1: i32) -> (i32, i32, i32) {
    %c0_i32 = arith.constant 0 : i32
    %c0_i32_0 = arith.constant 0 : i32
    return %arg0, %arg1, %c0_i32 : i32, i32, i32
  }
  func.func @transform_1(%arg0: i32, %arg1: i32) -> (i32, i32) {
    %c0_i32 = arith.constant 0 : i32
    %c0_i32_0 = arith.constant 0 : i32
    %c0_i32_1 = arith.constant 0 : i32
    return %c0_i32, %c0_i32_0 : i32, i32
  }
  func.func @transform_2(%arg0: i32, %arg1: i32) -> (i32, i32) {
    %c0_i32 = arith.constant 0 : i32
    %c0_i32_0 = arith.constant 0 : i32
    %c0_i32_1 = arith.constant 0 : i32
    return %c0_i32, %c0_i32_0 : i32, i32
  }
  func.func @transform_3(%arg0: i32, %arg1: i32) -> (i32, i32, i32) {
    %c0_i32 = arith.constant 0 : i32
    %c0_i32_0 = arith.constant 0 : i32
    return %arg0, %arg1, %c0_i32 : i32, i32, i32
  }
}

module attributes {stable_mosaic.version = 11 : i64} {
  func.func @_conv_gemm_kernel(%arg0: i32, %arg1: i32, %arg2: memref<1x196x384xbf16, #tpu.memory_space<vmem>>, %arg3: memref<384x64xbf16, #tpu.memory_space<vmem>>, %arg4: memref<2x64xf32, #tpu.memory_space<vmem>>, %arg5: memref<1x196x64xbf16, #tpu.memory_space<vmem>>) attributes {dimension_semantics = [#tpu.dimension_semantics<parallel>, #tpu.dimension_semantics<parallel>], iteration_bounds = array<i64: 2, 1>, scalar_prefetch = 0 : i64, scratch_operands = 0 : i64, tpu.core_type = #tpu.core_type<tc>, window_params = [{transform_indices = @transform_0, window_bounds = array<i64: 1, 196, 384>}, {pipeline_mode = #tpu.pipeline_mode<synchronous>, transform_indices = @transform_1, window_bounds = array<i64: 384, 64>}, {pipeline_mode = #tpu.pipeline_mode<synchronous>, transform_indices = @transform_2, window_bounds = array<i64: 2, 64>}, {transform_indices = @transform_3, window_bounds = array<i64: 1, 196, 64>}]} {
    %c0 = arith.constant 0 : index
    %c0_0 = arith.constant 0 : index
    %c0_1 = arith.constant 0 : index
    %0 = vector.load %arg2[%c0, %c0_0, %c0_1] : memref<1x196x384xbf16, #tpu.memory_space<vmem>>, vector<1x196x384xbf16>
    %1 = vector.shape_cast %0 : vector<1x196x384xbf16> to vector<196x384xbf16>
    %c0_2 = arith.constant 0 : index
    %c0_3 = arith.constant 0 : index
    %2 = vector.load %arg3[%c0_2, %c0_3] : memref<384x64xbf16, #tpu.memory_space<vmem>>, vector<384x64xbf16>
    %cst = arith.constant dense<0.000000e+00> : vector<196x64xf32>
    %3 = tpu.matmul %1, %2, %cst {dimension_numbers = #tpu.dot_dimension_numbers<[1], [0], [0], [1], [0, 0, 1, 1], [], []>} : vector<196x384xbf16>, vector<384x64xbf16>, vector<196x64xf32> -> vector<196x64xf32>
    %c0_4 = arith.constant 0 : index
    %c0_5 = arith.constant 0 : index
    %4 = vector.load %arg4[%c0_4, %c0_5] : memref<2x64xf32, #tpu.memory_space<vmem>>, vector<1x64xf32>
    %5 = vector.broadcast %4 : vector<1x64xf32> to vector<196x64xf32>
    %6 = arith.mulf %3, %5 : vector<196x64xf32>
    %c1 = arith.constant 1 : index
    %c0_6 = arith.constant 0 : index
    %7 = vector.load %arg4[%c1, %c0_6] : memref<2x64xf32, #tpu.memory_space<vmem>>, vector<1x64xf32>
    %8 = vector.broadcast %7 : vector<1x64xf32> to vector<196x64xf32>
    %9 = arith.addf %6, %8 : vector<196x64xf32>
    %cst_7 = arith.constant 0.000000e+00 : f32
    %10 = vector.broadcast %cst_7 : f32 to vector<196x64xf32>
    %11 = arith.maximumf %9, %10 : vector<196x64xf32>
    %12 = arith.truncf %11 : vector<196x64xf32> to vector<196x64xbf16>
    %c0_8 = arith.constant 0 : index
    %c0_9 = arith.constant 0 : index
    %c0_10 = arith.constant 0 : index
    %13 = vector.load %arg5[%c0_8, %c0_9, %c0_10] : memref<1x196x64xbf16, #tpu.memory_space<vmem>>, vector<1x196x64xbf16>
    %14 = vector.shape_cast %13 : vector<1x196x64xbf16> to vector<196x64xbf16>
    %15 = vector.shape_cast %12 : vector<196x64xbf16> to vector<1x196x64xbf16>
    tpu.vector_store %arg5[%c0_8, %c0_9, %c0_10], %15 {strides = array<i32>} : memref<1x196x64xbf16, #tpu.memory_space<vmem>>, vector<1x196x64xbf16>,
    return
  }
  func.func @transform_0(%arg0: i32, %arg1: i32) -> (i32, i32, i32) {
    %c0_i32 = arith.constant 0 : i32
    %c0_i32_0 = arith.constant 0 : i32
    return %arg0, %arg1, %c0_i32 : i32, i32, i32
  }
  func.func @transform_1(%arg0: i32, %arg1: i32) -> (i32, i32) {
    %c0_i32 = arith.constant 0 : i32
    %c0_i32_0 = arith.constant 0 : i32
    %c0_i32_1 = arith.constant 0 : i32
    return %c0_i32, %c0_i32_0 : i32, i32
  }
  func.func @transform_2(%arg0: i32, %arg1: i32) -> (i32, i32) {
    %c0_i32 = arith.constant 0 : i32
    %c0_i32_0 = arith.constant 0 : i32
    %c0_i32_1 = arith.constant 0 : i32
    return %c0_i32, %c0_i32_0 : i32, i32
  }
  func.func @transform_3(%arg0: i32, %arg1: i32) -> (i32, i32, i32) {
    %c0_i32 = arith.constant 0 : i32
    %c0_i32_0 = arith.constant 0 : i32
    return %arg0, %arg1, %c0_i32 : i32, i32, i32
  }
}

module attributes {stable_mosaic.version = 11 : i64} {
  func.func @_conv_gemm_kernel(%arg0: i32, %arg1: i32, %arg2: memref<1x36x640xbf16, #tpu.memory_space<vmem>>, %arg3: memref<640x128xbf16, #tpu.memory_space<vmem>>, %arg4: memref<2x128xf32, #tpu.memory_space<vmem>>, %arg5: memref<1x36x128xbf16, #tpu.memory_space<vmem>>) attributes {dimension_semantics = [#tpu.dimension_semantics<parallel>, #tpu.dimension_semantics<parallel>], iteration_bounds = array<i64: 2, 1>, scalar_prefetch = 0 : i64, scratch_operands = 0 : i64, tpu.core_type = #tpu.core_type<tc>, window_params = [{transform_indices = @transform_0, window_bounds = array<i64: 1, 36, 640>}, {pipeline_mode = #tpu.pipeline_mode<synchronous>, transform_indices = @transform_1, window_bounds = array<i64: 640, 128>}, {pipeline_mode = #tpu.pipeline_mode<synchronous>, transform_indices = @transform_2, window_bounds = array<i64: 2, 128>}, {transform_indices = @transform_3, window_bounds = array<i64: 1, 36, 128>}]} {
    %c0 = arith.constant 0 : index
    %c0_0 = arith.constant 0 : index
    %c0_1 = arith.constant 0 : index
    %0 = vector.load %arg2[%c0, %c0_0, %c0_1] : memref<1x36x640xbf16, #tpu.memory_space<vmem>>, vector<1x36x640xbf16>
    %1 = vector.shape_cast %0 : vector<1x36x640xbf16> to vector<36x640xbf16>
    %c0_2 = arith.constant 0 : index
    %c0_3 = arith.constant 0 : index
    %2 = vector.load %arg3[%c0_2, %c0_3] : memref<640x128xbf16, #tpu.memory_space<vmem>>, vector<640x128xbf16>
    %cst = arith.constant dense<0.000000e+00> : vector<36x128xf32>
    %3 = tpu.matmul %1, %2, %cst {dimension_numbers = #tpu.dot_dimension_numbers<[1], [0], [0], [1], [0, 0, 1, 1], [], []>} : vector<36x640xbf16>, vector<640x128xbf16>, vector<36x128xf32> -> vector<36x128xf32>
    %c0_4 = arith.constant 0 : index
    %c0_5 = arith.constant 0 : index
    %4 = vector.load %arg4[%c0_4, %c0_5] : memref<2x128xf32, #tpu.memory_space<vmem>>, vector<1x128xf32>
    %5 = vector.broadcast %4 : vector<1x128xf32> to vector<36x128xf32>
    %6 = arith.mulf %3, %5 : vector<36x128xf32>
    %c1 = arith.constant 1 : index
    %c0_6 = arith.constant 0 : index
    %7 = vector.load %arg4[%c1, %c0_6] : memref<2x128xf32, #tpu.memory_space<vmem>>, vector<1x128xf32>
    %8 = vector.broadcast %7 : vector<1x128xf32> to vector<36x128xf32>
    %9 = arith.addf %6, %8 : vector<36x128xf32>
    %cst_7 = arith.constant 0.000000e+00 : f32
    %10 = vector.broadcast %cst_7 : f32 to vector<36x128xf32>
    %11 = arith.maximumf %9, %10 : vector<36x128xf32>
    %12 = arith.truncf %11 : vector<36x128xf32> to vector<36x128xbf16>
    %c0_8 = arith.constant 0 : index
    %c0_9 = arith.constant 0 : index
    %c0_10 = arith.constant 0 : index
    %13 = vector.load %arg5[%c0_8, %c0_9, %c0_10] : memref<1x36x128xbf16, #tpu.memory_space<vmem>>, vector<1x36x128xbf16>
    %14 = vector.shape_cast %13 : vector<1x36x128xbf16> to vector<36x128xbf16>
    %15 = vector.shape_cast %12 : vector<36x128xbf16> to vector<1x36x128xbf16>
    tpu.vector_store %arg5[%c0_8, %c0_9, %c0_10], %15 {strides = array<i32>} : memref<1x36x128xbf16, #tpu.memory_space<vmem>>, vector<1x36x128xbf16>,
    return
  }
  func.func @transform_0(%arg0: i32, %arg1: i32) -> (i32, i32, i32) {
    %c0_i32 = arith.constant 0 : i32
    %c0_i32_0 = arith.constant 0 : i32
    return %arg0, %arg1, %c0_i32 : i32, i32, i32
  }
  func.func @transform_1(%arg0: i32, %arg1: i32) -> (i32, i32) {
    %c0_i32 = arith.constant 0 : i32
    %c0_i32_0 = arith.constant 0 : i32
    %c0_i32_1 = arith.constant 0 : i32
    return %c0_i32, %c0_i32_0 : i32, i32
  }
  func.func @transform_2(%arg0: i32, %arg1: i32) -> (i32, i32) {
    %c0_i32 = arith.constant 0 : i32
    %c0_i32_0 = arith.constant 0 : i32
    %c0_i32_1 = arith.constant 0 : i32
    return %c0_i32, %c0_i32_0 : i32, i32
  }
  func.func @transform_3(%arg0: i32, %arg1: i32) -> (i32, i32, i32) {
    %c0_i32 = arith.constant 0 : i32
    %c0_i32_0 = arith.constant 0 : i32
    return %arg0, %arg1, %c0_i32 : i32, i32, i32
  }
}

module attributes {stable_mosaic.version = 11 : i64} {
  func.func @_conv4_fc_kernel(%arg0: i32, %arg1: memref<8x1152xbf16, #tpu.memory_space<vmem>>, %arg2: memref<1152x256xbf16, #tpu.memory_space<vmem>>, %arg3: memref<2x256xf32, #tpu.memory_space<vmem>>, %arg4: memref<4x256x128xbf16, #tpu.memory_space<vmem>>, %arg5: memref<1x128xf32, #tpu.memory_space<vmem>>, %arg6: memref<128x128xbf16, #tpu.memory_space<vmem>>, %arg7: memref<1x128xf32, #tpu.memory_space<vmem>>, %arg8: memref<128x64xbf16, #tpu.memory_space<vmem>>, %arg9: memref<1x64xf32, #tpu.memory_space<vmem>>, %arg10: memref<2x64xf32, #tpu.memory_space<vmem>>) attributes {dimension_semantics = [#tpu.dimension_semantics<arbitrary>], iteration_bounds = array<i64: 1>, scalar_prefetch = 0 : i64, scratch_operands = 0 : i64, tpu.core_type = #tpu.core_type<tc>, window_params = [{pipeline_mode = #tpu.pipeline_mode<synchronous>, transform_indices = @transform_0, window_bounds = array<i64: 8, 1152>}, {pipeline_mode = #tpu.pipeline_mode<synchronous>, transform_indices = @transform_1, window_bounds = array<i64: 1152, 256>}, {pipeline_mode = #tpu.pipeline_mode<synchronous>, transform_indices = @transform_2, window_bounds = array<i64: 2, 256>}, {pipeline_mode = #tpu.pipeline_mode<synchronous>, transform_indices = @transform_3, window_bounds = array<i64: 4, 256, 128>}, {pipeline_mode = #tpu.pipeline_mode<synchronous>, transform_indices = @transform_4, window_bounds = array<i64: 1, 128>}, {pipeline_mode = #tpu.pipeline_mode<synchronous>, transform_indices = @transform_5, window_bounds = array<i64: 128, 128>}, {pipeline_mode = #tpu.pipeline_mode<synchronous>, transform_indices = @transform_6, window_bounds = array<i64: 1, 128>}, {pipeline_mode = #tpu.pipeline_mode<synchronous>, transform_indices = @transform_7, window_bounds = array<i64: 128, 64>}, {pipeline_mode = #tpu.pipeline_mode<synchronous>, transform_indices = @transform_8, window_bounds = array<i64: 1, 64>}, {pipeline_mode = #tpu.pipeline_mode<synchronous>, transform_indices = @transform_9, window_bounds = array<i64: 2, 64>}]} {
    %c0 = arith.constant 0 : index
    %c0_0 = arith.constant 0 : index
    %0 = vector.load %arg1[%c0, %c0_0] : memref<8x1152xbf16, #tpu.memory_space<vmem>>, vector<8x1152xbf16>
    %c0_1 = arith.constant 0 : index
    %c0_2 = arith.constant 0 : index
    %1 = vector.load %arg2[%c0_1, %c0_2] : memref<1152x256xbf16, #tpu.memory_space<vmem>>, vector<1152x256xbf16>
    %cst = arith.constant dense<0.000000e+00> : vector<8x256xf32>
    %2 = tpu.matmul %0, %1, %cst {dimension_numbers = #tpu.dot_dimension_numbers<[1], [0], [0], [1], [0, 0, 1, 1], [], []>} : vector<8x1152xbf16>, vector<1152x256xbf16>, vector<8x256xf32> -> vector<8x256xf32>
    %c0_3 = arith.constant 0 : index
    %c0_4 = arith.constant 0 : index
    %3 = vector.load %arg3[%c0_3, %c0_4] : memref<2x256xf32, #tpu.memory_space<vmem>>, vector<1x256xf32>
    %4 = vector.broadcast %3 : vector<1x256xf32> to vector<8x256xf32>
    %5 = arith.mulf %2, %4 : vector<8x256xf32>
    %c1 = arith.constant 1 : index
    %c0_5 = arith.constant 0 : index
    %6 = vector.load %arg3[%c1, %c0_5] : memref<2x256xf32, #tpu.memory_space<vmem>>, vector<1x256xf32>
    %7 = vector.broadcast %6 : vector<1x256xf32> to vector<8x256xf32>
    %8 = arith.addf %5, %7 : vector<8x256xf32>
    %cst_6 = arith.constant 0.000000e+00 : f32
    %9 = vector.broadcast %cst_6 : f32 to vector<8x256xf32>
    %10 = arith.maximumf %8, %9 : vector<8x256xf32>
    %11 = arith.truncf %10 : vector<8x256xf32> to vector<8x256xbf16>
    %cst_7 = arith.constant 0.000000e+00 : f32
    %12 = vector.broadcast %cst_7 : f32 to vector<2x128xf32>
    %13 = vector.extract_strided_slice %11 {offsets = [0, 0], sizes = [2, 256], strides = [1, 1]} : vector<8x256xbf16> to vector<2x256xbf16>
    %c0_8 = arith.constant 0 : index
    %c0_9 = arith.constant 0 : index
    %c0_10 = arith.constant 0 : index
    %14 = vector.load %arg4[%c0_8, %c0_9, %c0_10] : memref<4x256x128xbf16, #tpu.memory_space<vmem>>, vector<1x256x128xbf16>
    %15 = vector.shape_cast %14 : vector<1x256x128xbf16> to vector<256x128xbf16>
    %cst_11 = arith.constant dense<0.000000e+00> : vector<2x128xf32>
    %16 = tpu.matmul %13, %15, %cst_11 {dimension_numbers = #tpu.dot_dimension_numbers<[1], [0], [0], [1], [0, 0, 1, 1], [], []>} : vector<2x256xbf16>, vector<256x128xbf16>, vector<2x128xf32> -> vector<2x128xf32>
    %17 = arith.addf %12, %16 : vector<2x128xf32>
    %18 = vector.extract_strided_slice %11 {offsets = [2, 0], sizes = [2, 256], strides = [1, 1]} : vector<8x256xbf16> to vector<2x256xbf16>
    %c1_12 = arith.constant 1 : index
    %c0_13 = arith.constant 0 : index
    %c0_14 = arith.constant 0 : index
    %19 = vector.load %arg4[%c1_12, %c0_13, %c0_14] : memref<4x256x128xbf16, #tpu.memory_space<vmem>>, vector<1x256x128xbf16>
    %20 = vector.shape_cast %19 : vector<1x256x128xbf16> to vector<256x128xbf16>
    %cst_15 = arith.constant dense<0.000000e+00> : vector<2x128xf32>
    %21 = tpu.matmul %18, %20, %cst_15 {dimension_numbers = #tpu.dot_dimension_numbers<[1], [0], [0], [1], [0, 0, 1, 1], [], []>} : vector<2x256xbf16>, vector<256x128xbf16>, vector<2x128xf32> -> vector<2x128xf32>
    %22 = arith.addf %17, %21 : vector<2x128xf32>
    %23 = vector.extract_strided_slice %11 {offsets = [4, 0], sizes = [2, 256], strides = [1, 1]} : vector<8x256xbf16> to vector<2x256xbf16>
    %c2 = arith.constant 2 : index
    %c0_16 = arith.constant 0 : index
    %c0_17 = arith.constant 0 : index
    %24 = vector.load %arg4[%c2, %c0_16, %c0_17] : memref<4x256x128xbf16, #tpu.memory_space<vmem>>, vector<1x256x128xbf16>
    %25 = vector.shape_cast %24 : vector<1x256x128xbf16> to vector<256x128xbf16>
    %cst_18 = arith.constant dense<0.000000e+00> : vector<2x128xf32>
    %26 = tpu.matmul %23, %25, %cst_18 {dimension_numbers = #tpu.dot_dimension_numbers<[1], [0], [0], [1], [0, 0, 1, 1], [], []>} : vector<2x256xbf16>, vector<256x128xbf16>, vector<2x128xf32> -> vector<2x128xf32>
    %27 = arith.addf %22, %26 : vector<2x128xf32>
    %28 = vector.extract_strided_slice %11 {offsets = [6, 0], sizes = [2, 256], strides = [1, 1]} : vector<8x256xbf16> to vector<2x256xbf16>
    %c3 = arith.constant 3 : index
    %c0_19 = arith.constant 0 : index
    %c0_20 = arith.constant 0 : index
    %29 = vector.load %arg4[%c3, %c0_19, %c0_20] : memref<4x256x128xbf16, #tpu.memory_space<vmem>>, vector<1x256x128xbf16>
    %30 = vector.shape_cast %29 : vector<1x256x128xbf16> to vector<256x128xbf16>
    %cst_21 = arith.constant dense<0.000000e+00> : vector<2x128xf32>
    %31 = tpu.matmul %28, %30, %cst_21 {dimension_numbers = #tpu.dot_dimension_numbers<[1], [0], [0], [1], [0, 0, 1, 1], [], []>} : vector<2x256xbf16>, vector<256x128xbf16>, vector<2x128xf32> -> vector<2x128xf32>
    %32 = arith.addf %27, %31 : vector<2x128xf32>
    %c0_22 = arith.constant 0 : index
    %c0_23 = arith.constant 0 : index
    %33 = vector.load %arg5[%c0_22, %c0_23] : memref<1x128xf32, #tpu.memory_space<vmem>>, vector<1x128xf32>
    %34 = vector.broadcast %33 : vector<1x128xf32> to vector<2x128xf32>
    %35 = arith.addf %32, %34 : vector<2x128xf32>
    %cst_24 = arith.constant 0.000000e+00 : f32
    %36 = vector.broadcast %cst_24 : f32 to vector<2x128xf32>
    %37 = arith.maximumf %35, %36 : vector<2x128xf32>
    %38 = arith.truncf %37 : vector<2x128xf32> to vector<2x128xbf16>
    %c0_25 = arith.constant 0 : index
    %c0_26 = arith.constant 0 : index
    %39 = vector.load %arg6[%c0_25, %c0_26] : memref<128x128xbf16, #tpu.memory_space<vmem>>, vector<128x128xbf16>
    %cst_27 = arith.constant dense<0.000000e+00> : vector<2x128xf32>
    %40 = tpu.matmul %38, %39, %cst_27 {dimension_numbers = #tpu.dot_dimension_numbers<[1], [0], [0], [1], [0, 0, 1, 1], [], []>} : vector<2x128xbf16>, vector<128x128xbf16>, vector<2x128xf32> -> vector<2x128xf32>
    %c0_28 = arith.constant 0 : index
    %c0_29 = arith.constant 0 : index
    %41 = vector.load %arg7[%c0_28, %c0_29] : memref<1x128xf32, #tpu.memory_space<vmem>>, vector<1x128xf32>
    %42 = vector.broadcast %41 : vector<1x128xf32> to vector<2x128xf32>
    %43 = arith.addf %40, %42 : vector<2x128xf32>
    %cst_30 = arith.constant 0.000000e+00 : f32
    %44 = vector.broadcast %cst_30 : f32 to vector<2x128xf32>
    %45 = arith.maximumf %43, %44 : vector<2x128xf32>
    %46 = arith.truncf %45 : vector<2x128xf32> to vector<2x128xbf16>
    %c0_31 = arith.constant 0 : index
    %c0_32 = arith.constant 0 : index
    %47 = vector.load %arg8[%c0_31, %c0_32] : memref<128x64xbf16, #tpu.memory_space<vmem>>, vector<128x64xbf16>
    %cst_33 = arith.constant dense<0.000000e+00> : vector<2x64xf32>
    %48 = tpu.matmul %46, %47, %cst_33 {dimension_numbers = #tpu.dot_dimension_numbers<[1], [0], [0], [1], [0, 0, 1, 1], [], []>} : vector<2x128xbf16>, vector<128x64xbf16>, vector<2x64xf32> -> vector<2x64xf32>
    %c0_34 = arith.constant 0 : index
    %c0_35 = arith.constant 0 : index
    %49 = vector.load %arg9[%c0_34, %c0_35] : memref<1x64xf32, #tpu.memory_space<vmem>>, vector<1x64xf32>
    %50 = vector.broadcast %49 : vector<1x64xf32> to vector<2x64xf32>
    %51 = arith.addf %48, %50 : vector<2x64xf32>
    %c0_36 = arith.constant 0 : index
    %c0_37 = arith.constant 0 : index
    %52 = vector.load %arg10[%c0_36, %c0_37] : memref<2x64xf32, #tpu.memory_space<vmem>>, vector<2x64xf32>
    tpu.vector_store %arg10[%c0_36, %c0_37], %51 {strides = array<i32>} : memref<2x64xf32, #tpu.memory_space<vmem>>, vector<2x64xf32>,
    return
  }
  func.func @transform_0(%arg0: i32) -> (i32, i32) {
    %c0_i32 = arith.constant 0 : i32
    %c0_i32_0 = arith.constant 0 : i32
    %c0_i32_1 = arith.constant 0 : i32
    return %c0_i32, %c0_i32_0 : i32, i32
  }
  func.func @transform_1(%arg0: i32) -> (i32, i32) {
    %c0_i32 = arith.constant 0 : i32
    %c0_i32_0 = arith.constant 0 : i32
    %c0_i32_1 = arith.constant 0 : i32
    return %c0_i32, %c0_i32_0 : i32, i32
  }
  func.func @transform_2(%arg0: i32) -> (i32, i32) {
    %c0_i32 = arith.constant 0 : i32
    %c0_i32_0 = arith.constant 0 : i32
    %c0_i32_1 = arith.constant 0 : i32
    return %c0_i32, %c0_i32_0 : i32, i32
  }
  func.func @transform_3(%arg0: i32) -> (i32, i32, i32) {
    %c0_i32 = arith.constant 0 : i32
    %c0_i32_0 = arith.constant 0 : i32
    %c0_i32_1 = arith.constant 0 : i32
    %c0_i32_2 = arith.constant 0 : i32
    return %c0_i32, %c0_i32_0, %c0_i32_1 : i32, i32, i32
  }
  func.func @transform_4(%arg0: i32) -> (i32, i32) {
    %c0_i32 = arith.constant 0 : i32
    %c0_i32_0 = arith.constant 0 : i32
    %c0_i32_1 = arith.constant 0 : i32
    return %c0_i32, %c0_i32_0 : i32, i32
  }
  func.func @transform_5(%arg0: i32) -> (i32, i32) {
    %c0_i32 = arith.constant 0 : i32
    %c0_i32_0 = arith.constant 0 : i32
    %c0_i32_1 = arith.constant 0 : i32
    return %c0_i32, %c0_i32_0 : i32, i32
  }
  func.func @transform_6(%arg0: i32) -> (i32, i32) {
    %c0_i32 = arith.constant 0 : i32
    %c0_i32_0 = arith.constant 0 : i32
    %c0_i32_1 = arith.constant 0 : i32
    return %c0_i32, %c0_i32_0 : i32, i32
  }
  func.func @transform_7(%arg0: i32) -> (i32, i32) {
    %c0_i32 = arith.constant 0 : i32
    %c0_i32_0 = arith.constant 0 : i32
    %c0_i32_1 = arith.constant 0 : i32
    return %c0_i32, %c0_i32_0 : i32, i32
  }
  func.func @transform_8(%arg0: i32) -> (i32, i32) {
    %c0_i32 = arith.constant 0 : i32
    %c0_i32_0 = arith.constant 0 : i32
    %c0_i32_1 = arith.constant 0 : i32
    return %c0_i32, %c0_i32_0 : i32, i32
  }
  func.func @transform_9(%arg0: i32) -> (i32, i32) {
    %c0_i32 = arith.constant 0 : i32
    %c0_i32_0 = arith.constant 0 : i32
    %c0_i32_1 = arith.constant 0 : i32
    return %c0_i32, %c0_i32_0 : i32, i32
  }
}

</mosaic_0001>

<bundles_post_ra>
// kernel: encoder_cnn_forward.4
= control target key start
LH: loop header
LB: loop body
LE: loop exit
PB: predicated region body
PF: predicated region fallthrough
CT: control target
= control target key end

     0   :  { %s2478_s12 = smov 0   ;;  %s2480_s13 = smov 0   ;;  %s3082_s0 = inlined_call_operand.vmem [shape: bf16[2,900,128], index: 0, kind: input, shape index: {}]   ;;  %s3083_s1 = inlined_call_operand.vmem [shape: bf16[128,32], index: 1, kind: input, shape index: {}]   ;;  %s3084_s2 = inlined_call_operand.vmem [shape: f32[2,32], index: 2, kind: input, shape index: {}]   ;;  %s3085_s3 = inlined_call_operand.vmem [shape: bf16[2,900,32], index: 3, kind: output, shape index: {}]  }
   0x1   :  { %s2482_s14 = smov 0   ;;  %s2484_s15 = smov 0  }
   0x2   :  { %s2486_s16 = smov 0   ;;  %s2488_s17 = smov 0  }
   0x3   :  { %s2490_s18 = smov 0  }
   0x4 LB: > { %s22_s19 = sadd.s32 1, %s2416_s16  ;;  %s25_s20 = sadd.s32 1, %s2420_s17  ;;  %s2424_s18 = sphi %s2490_s18, %s13_s18   ;;  %s2420_s17 = sphi %s2488_s17, %s3095_s17   ;;  %s2416_s16 = sphi %s2486_s16, %s3094_s16   ;;  %s2412_s15 = sphi %s2484_s15, %s3093_s15   ;;  %s2408_s14 = sphi %s2482_s14, %s3092_s14   ;;  %s2404_s13 = sphi %s2480_s13, %s3091_s13   ;;  %s2400_s12 = sphi %s2478_s12, %s3090_s12  }
   0x5   : > { %p23_p0 = scmp.ge.s32.totalorder %s22_s19, 2  ;;  %s1843_s21 = sadd.s32 4294967295, %s2424_s18  }
   0x6   : > { %p114_p1 = scmp.ne.s32.totalorder %s2404_s13, %s2400_s12  ;;  %p115_p2 = scmp.eq.s32.totalorder %s1843_s21, 3 }
   0x7   : > { %s3097_s19 = smov (%p23_p0, %s22_s19), 0  ;;  %s3099_s20 = smov (!%p23_p0, %s25_s20), %s2420_s17 }
   0x8   : > { %s100_s22 = ssub.s32 %s2416_s16, %s3097_s19  ;;  %p27_p3 = scmp.ge.s32.totalorder %s3099_s20, 2 }
   0x9   : > { %p1847_p4 = scmp.ge.s32.totalorder %s2424_s18, 1  ;;  %p2522_p5 = por %p115_p2, %p114_p1 }
   0xa   : > { %p166_p6 = scmp.lt.s32.totalorder %s2424_s18, 5  ;;  %s3101_s20 = smov (%p27_p3, %s3099_s20), 0 }
   0xb   : > { %s99_s24 = ssub.s32 %s2420_s17, %s3101_s20  ;;  %s104_s26 = sadd.s32 1, %s2404_s13 }
   0xc   : > { %p167_p7 = pnand %p1847_p4, %p166_p6  ;;  %s101_s25 = sor.u32 %s100_s22, %s99_s24 }
   0xd   : > { %p102_p8 = scmp.eq.s32.totalorder %s101_s25, 0  ;;  %s2538_s30 = sshll.u32 (!%p167_p7), %s2408_s14, 6 }
   0xe   : > { %170 = sbr.rel (%p167_p7) target bundleno = 402 (0x192), region = 32  ;;  %p202_p9 = scmp.lt.s32.totalorder (!%p167_p7), %s2412_s15, 1 }
   0xf   : > { %s2533_s27 = scalar_select %p102_p8, %s2404_s13, %s104_s26  }
  0x10   : > { %p204_p10 = scmp.lt.s32.totalorder (!%p167_p7), %s2538_s30, 112  ;;  %s194_s14 = sand.u32 (!%p167_p7), 1, %s2400_s12  }
  0x11   : > { %s1848_s24 = sshll.u32 (!%p167_p7), %s194_s14, 8 }
  0x12   : > { %s2627_s12 = scalar_lea.vmem (!%p167_p7), [#allocation2], %s1848_s24  }
  0x13   : > { %v2298_v0 = vld [vmem:[%s3083_s1 + $0x38] sm:$0xff]   ;;  %v2299_v1 = vld [vmem:[%s3083_s1 + $0x30] sm:$0xff]   ;;  %s203_s6 = scalar_select %p202_p9, %s2412_s15, 1  ;;  %v2300_v2 = vld [vmem:[%s3083_s1 + $0x28] sm:$0xff]   ;;  %vm1288_vm0 = vcmask 257024  }
  0x14   : > { %2080 = vmatprep.subr.bf16.mxu0 %v2298_v0  ;;  %2160 = vmatprep.subr.bf16.mxu1 %v2298_v0  ;;  %s205_s9 = scalar_select %p204_p10, %s2538_s30, 112  ;;  %v2301_v3 = vld [vmem:[%s3083_s1 + $0x20] sm:$0xff]   ;;  %v2302_v6 = vld [vmem:[%s3083_s1 + $0x18] sm:$0xff]   ;;  %v2303_v7 = vld [vmem:[%s3083_s1 + $0x10] sm:$0xff]  }
  0x15   : > { %2081 = vmatpush3.bf16.msra.mxu0 %v2298_v0  ;;  %2168 = vmatpush3.bf16.msra.mxu1 %v2298_v0  ;;  %s2176_s10 = smul.u32 113, %s203_s6  ;;  %v2304_v8 = vld [vmem:[%s3083_s1 + $0x8] sm:$0xff]   ;;  %v2305_v9 = vld [vmem:[%s3083_s1] sm:$0xff]   ;;  %s1361_s25 = ssub.s32 (%p2522_p5), 113, %s2538_s30 }
  0x16   : > { %2082 = vmatprep.subr.bf16.mxu0 %v2299_v1  ;;  %2161 = vmatprep.subr.bf16.mxu1 %v2299_v1  ;;  %v2605_v40 = vld [vmem:[%s3084_s2] ss:$0 sm:$0xff]  ;;  %v2611_v42 = vld [vmem:[%s3084_s2 + $0x1] ss:$0 sm:$0xff]  ;;  %p1362_p11 = scmp.lt.s32.totalorder (%p2522_p5), %s1361_s25, 64 }
  0x17   : > { %s207_s11 = sadd.s32 %s2176_s10, %s205_s9 }
  0x18   : > { %s1850_s22 = sshll.u32 %s207_s11, 2 }
  0x19   : > { %2083 = vmatpush3.bf16.msra.mxu0 %v2299_v1  ;;  %2169 = vmatpush3.bf16.msra.mxu1 %v2299_v1  ;;  %s2556_s26 = scalar_lea.vmem %s3082_s0, %s1850_s22 }
  0x1a   : > { %2084 = vmatprep.subr.bf16.mxu0 %v2300_v2  ;;  %2162 = vmatprep.subr.bf16.mxu1 %v2300_v2  ;;  %v2306_v4 = vld [vmem:[%s2556_s26] sm:$0xff]   ;;  %v2308_v10 = vld [vmem:[%s2556_s26 + $0x8] sm:$0xff]   ;;  %v2310_v12 = vld [vmem:[%s2556_s26 + $0x10] sm:$0xff]  }
  0x1b   : > { %v2307_v5 = vld [vmem:[%s2556_s26 + $0x80] sm:$0xff]   ;;  %2096 = vmatprep.mubr.bf16.mxu0 %v2306_v4  ;;  %v2309_v11 = vld [vmem:[%s2556_s26 + $0x88] sm:$0xff]   ;;  %v2311_v13 = vld [vmem:[%s2556_s26 + $0x90] sm:$0xff]  }
  0x1c   : > { %2128 = vmatprep.mubr.bf16.mxu1 %v2307_v5  ;;  %v2312_v14 = vld [vmem:[%s2556_s26 + $0x18] sm:$0xff]   ;;  %v2314_v16 = vld [vmem:[%s2556_s26 + $0x20] sm:$0xff]   ;;  %v2316_v18 = vld [vmem:[%s2556_s26 + $0x28] sm:$0xff]  }
  0x1d   : > { %2085 = vmatpush3.bf16.msra.mxu0 %v2300_v2  ;;  %2170 = vmatpush3.bf16.msra.mxu1 %v2300_v2  ;;  %v2313_v15 = vld [vmem:[%s2556_s26 + $0x98] sm:$0xff]   ;;  %v2315_v17 = vld [vmem:[%s2556_s26 + $0xa0] sm:$0xff]   ;;  %v2317_v19 = vld [vmem:[%s2556_s26 + $0xa8] sm:$0xff]  }
  0x1e   : > { %2086 = vmatprep.subr.bf16.mxu0 %v2301_v3  ;;  %2163 = vmatprep.subr.bf16.mxu1 %v2301_v3  ;;  %v2318_v20 = vld [vmem:[%s2556_s26 + $0x30] sm:$0xff]   ;;  %v2320_v22 = vld [vmem:[%s2556_s26 + $0x38] sm:$0xff]   ;;  %v2322_v24 = vld [vmem:[%s2556_s26 + $0x40] sm:$0xff]  }
  0x1f   : > { %v2319_v21 = vld [vmem:[%s2556_s26 + $0xb0] sm:$0xff]   ;;  %v2321_v23 = vld [vmem:[%s2556_s26 + $0xb8] sm:$0xff]   ;;  %v2323_v25 = vld [vmem:[%s2556_s26 + $0xc0] sm:$0xff]  }
  0x20   : > { %v2324_v26 = vld [vmem:[%s2556_s26 + $0x48] sm:$0xff]   ;;  %v2326_v28 = vld [vmem:[%s2556_s26 + $0x50] sm:$0xff]   ;;  %v2328_v30 = vld [vmem:[%s2556_s26 + $0x58] sm:$0xff]  }
  0x21   : > { %2087 = vmatpush3.bf16.msra.mxu0 %v2301_v3  ;;  %2171 = vmatpush3.bf16.msra.mxu1 %v2301_v3  ;;  %v2325_v27 = vld [vmem:[%s2556_s26 + $0xc8] sm:$0xff]   ;;  %v2327_v29 = vld [vmem:[%s2556_s26 + $0xd0] sm:$0xff]   ;;  %v2329_v31 = vld [vmem:[%s2556_s26 + $0xd8] sm:$0xff]  }
  0x22   : > { %2088 = vmatprep.subr.bf16.mxu0 %v2302_v6  ;;  %2164 = vmatprep.subr.bf16.mxu1 %v2302_v6  ;;  %v2330_v32 = vld [vmem:[%s2556_s26 + $0x60] sm:$0xff]   ;;  %v2332_v34 = vld [vmem:[%s2556_s26 + $0x68] sm:$0xff]   ;;  %v2334_v36 = vld [vmem:[%s2556_s26 + $0x70] sm:$0xff]  }
  0x23   : > { %v2331_v33 = vld [vmem:[%s2556_s26 + $0xe0] sm:$0xff]   ;;  %v2333_v35 = vld [vmem:[%s2556_s26 + $0xe8] sm:$0xff]   ;;  %v2335_v37 = vld [vmem:[%s2556_s26 + $0xf0] sm:$0xff]  }
  0x24   : > { %v2336_v38 = vld [vmem:[%s2556_s26 + $0x78] sm:$0xff]  }
  0x25   : > { %2089 = vmatpush3.bf16.msra.mxu0 %v2302_v6  ;;  %2172 = vmatpush3.bf16.msra.mxu1 %v2302_v6  ;;  %v2337_v39 = vld [vmem:[%s2556_s26 + $0xf8] sm:$0xff]   ;;  %s2177_s26 = smul.u32 (%p2522_p5), 113, %s2412_s15 }
  0x26   : > { %2090 = vmatprep.subr.bf16.mxu0 %v2303_v7  ;;  %2165 = vmatprep.subr.bf16.mxu1 %v2303_v7 }
  0x27   : > { %s1367_s28 = sadd.s32 (%p2522_p5), %s2177_s26, %s2538_s30 }
  0x28   : > { %s1961_s29 = sshll.u32 (%p2522_p5), %s1367_s28, 2 }
  0x29   : > { %2091 = vmatpush3.bf16.msra.mxu0 %v2303_v7  ;;  %2173 = vmatpush3.bf16.msra.mxu1 %v2303_v7  ;;  %s2882_s7 = scalar_lea.vmem (%p2522_p5), %s3085_s3, %s1961_s29  }
  0x2a   : > { %2092 = vmatprep.subr.bf16.mxu0 %v2304_v8  ;;  %2166 = vmatprep.subr.bf16.mxu1 %v2304_v8 }
  0x2d   : > { %2093 = vmatpush3.bf16.msra.mxu0 %v2304_v8  ;;  %2174 = vmatpush3.bf16.msra.mxu1 %v2304_v8 }
  0x2e   : > { %2094 = vmatprep.subr.bf16.mxu0 %v2305_v9  ;;  %2167 = vmatprep.subr.bf16.mxu1 %v2305_v9 }
  0x31   : > { %2095 = vmatpush3.bf16.msra.mxu0 %v2305_v9  ;;  %2175 = vmatpush3.bf16.msra.mxu1 %v2305_v9 }
  0x34   : > { %2097 = vmatmul.mubr.bf16.vlgmr.msra.gmra.mxu0 %v2308_v10  ;;  %2129 = vmatmul.mubr.bf16.vlgmr.msra.gmra.mxu1 %v2309_v11 }
  0x35   : > { %2100 = vmatprep.mubr.bf16.mxu0 %v2310_v12  ;;  %2132 = vmatprep.mubr.bf16.mxu1 %v2311_v13 }
  0x3c   : > { %2101 = vmatmul.mubr.bf16.gmra.mxu0 %v2312_v14  ;;  %2133 = vmatmul.mubr.bf16.gmra.mxu1 %v2313_v15 }
  0x3d   : > { %2104 = vmatprep.mubr.bf16.mxu0 %v2314_v16  ;;  %2136 = vmatprep.mubr.bf16.mxu1 %v2315_v17 }
  0x44   : > { %2105 = vmatmul.mubr.bf16.gmra.mxu0 %v2316_v18  ;;  %2137 = vmatmul.mubr.bf16.gmra.mxu1 %v2317_v19 }
  0x45   : > { %2108 = vmatprep.mubr.bf16.mxu0 %v2318_v20  ;;  %2140 = vmatprep.mubr.bf16.mxu1 %v2319_v21 }
  0x4c   : > { %2109 = vmatmul.mubr.bf16.gmra.mxu0 %v2320_v22  ;;  %2141 = vmatmul.mubr.bf16.gmra.mxu1 %v2321_v23 }
  0x4d   : > { %2112 = vmatprep.mubr.bf16.mxu0 %v2322_v24  ;;  %2144 = vmatprep.mubr.bf16.mxu1 %v2323_v25 }
  0x54   : > { %2113 = vmatmul.mubr.bf16.gmra.mxu0 %v2324_v26  ;;  %2145 = vmatmul.mubr.bf16.gmra.mxu1 %v2325_v27 }
  0x55   : > { %2116 = vmatprep.mubr.bf16.mxu0 %v2326_v28  ;;  %2148 = vmatprep.mubr.bf16.mxu1 %v2327_v29 }
  0x5c   : > { %2117 = vmatmul.mubr.bf16.gmra.mxu0 %v2328_v30  ;;  %2149 = vmatmul.mubr.bf16.gmra.mxu1 %v2329_v31 }
  0x5d   : > { %2120 = vmatprep.mubr.bf16.mxu0 %v2330_v32  ;;  %2152 = vmatprep.mubr.bf16.mxu1 %v2331_v33 }
  0x64   : > { %2121 = vmatmul.mubr.bf16.gmra.mxu0 %v2332_v34  ;;  %2153 = vmatmul.mubr.bf16.gmra.mxu1 %v2333_v35 }
  0x65   : > { %2124 = vmatprep.mubr.bf16.mxu0 %v2334_v36  ;;  %2156 = vmatprep.mubr.bf16.mxu1 %v2335_v37 }
  0x6c   : > { %2125 = vmatmul.mubr.bf16.gmra.mxu0 %v2336_v38  ;;  %2157 = vmatmul.mubr.bf16.gmra.mxu1 %v2337_v39 }
  0xf4   : > { %v2098_v41 = vpop.f32.mrf.mxu0  ;;  %v2130_v43 = vpop.f32.mrf.mxu1 }
  0xf5   : > { %v837_v44 = vmul.f32 %v2098_v41, %v2605_v40  ;;  %v869_v45 = vmul.f32 %v2130_v43, %v2605_v40 }
  0xf6   : > { %v575_v46 = vpop.f32.mrf.mxu0  ;;  %v703_v47 = vpop.f32.mrf.mxu1 }
  0xf7   : > { %v906_v48 = vadd.f32 %v2611_v42, %v837_v44  ;;  %v938_v49 = vadd.f32 %v2611_v42, %v869_v45  ;;  %v835_v50 = vmul.f32 %v2605_v40, %v575_v46  ;;  %v867_v51 = vmul.f32 %v2605_v40, %v703_v47 }
  0xf8   : > { %v2099_v52 = vpop.f32.mrf.mxu0  ;;  %v2131_v53 = vpop.f32.mrf.mxu1 }
  0xf9   : > { %v970_v54 = vmax.f32 %v906_v48, 0.0  ;;  %v1002_v55 = vmax.f32 %v938_v49, 0.0  ;;  %v904_v56 = vadd.f32 %v2611_v42, %v835_v50  ;;  %v936_v57 = vadd.f32 %v2611_v42, %v867_v51 }
  0xfa   : > { %v838_v58 = vmul.f32 %v2099_v52, %v2605_v40  ;;  %v870_v59 = vmul.f32 %v2131_v53, %v2605_v40  ;;  %v578_v60 = vpop.f32.mrf.mxu0  ;;  %v706_v61 = vpop.f32.mrf.mxu1 }
  0xfb   : > { %v1976_v62 = vpack.c.bf16 %v970_v54, %v970_v54  ;;  %v2008_v63 = vpack.c.bf16 %v1002_v55, %v1002_v55  ;;  %v968_v0 = vmax.f32 %v904_v56, 0.0  ;;  %v1000_v1 = vmax.f32 %v936_v57, 0.0 }
  0xfc   : > { %v907_v2 = vadd.f32 %v2611_v42, %v838_v58  ;;  %v939_v3 = vadd.f32 %v2611_v42, %v870_v59  ;;  %v836_v4 = vmul.f32 %v2605_v40, %v578_v60  ;;  %v868_v5 = vmul.f32 %v2605_v40, %v706_v61  ;;  %v2102_v6 = vpop.f32.mrf.mxu0  ;;  %v2134_v7 = vpop.f32.mrf.mxu1 }
  0xfd   : > { %1291 = vst.msk [vmem:[%s2627_s12 + $0x8] sm:$0xf] %vm1288_vm0, %v1976_v62  ;;  %1323 = vst.msk [vmem:[%s2627_s12 + $0x88] sm:$0xf] %vm1288_vm0, %v2008_v63  ;;  %v1974_v8 = vpack.c.bf16 %v968_v0, %v968_v0  ;;  %v2006_v9 = vpack.c.bf16 %v1000_v1, %v1000_v1  ;;  %v841_v10 = vmul.f32 %v2102_v6, %v2605_v40 }
  0xfe   : > { %v873_v11 = vmul.f32 %v2134_v7, %v2605_v40  ;;  %v971_v12 = vmax.f32 %v907_v2, 0.0  ;;  %v1003_v13 = vmax.f32 %v939_v3, 0.0  ;;  %v905_v14 = vadd.f32 %v2611_v42, %v836_v4  ;;  %v591_v16 = vpop.f32.mrf.mxu0  ;;  %v719_v17 = vpop.f32.mrf.mxu1 }
  0xff   : > { %v937_v15 = vadd.f32 %v2611_v42, %v868_v5  ;;  %1289 = vst.msk [vmem:[%s2627_s12] sm:$0xf] %vm1288_vm0, %v1974_v8  ;;  %1321 = vst.msk [vmem:[%s2627_s12 + $0x80] sm:$0xf] %vm1288_vm0, %v2006_v9  ;;  %v910_v18 = vadd.f32 %v2611_v42, %v841_v10  ;;  %v839_v20 = vmul.f32 %v2605_v40, %v591_v16 }
 0x100   : > { %v942_v19 = vadd.f32 %v2611_v42, %v873_v11  ;;  %v871_v21 = vmul.f32 %v2605_v40, %v719_v17  ;;  %v1977_v22 = vpack.c.bf16 %v971_v12, %v971_v12  ;;  %v2009_v23 = vpack.c.bf16 %v1003_v13, %v1003_v13  ;;  %v2103_v26 = vpop.f32.mrf.mxu0  ;;  %v2135_v27 = vpop.f32.mrf.mxu1 }
 0x101   : > { %v969_v24 = vmax.f32 %v905_v14, 0.0  ;;  %v1001_v25 = vmax.f32 %v937_v15, 0.0  ;;  %v974_v28 = vmax.f32 %v910_v18, 0.0  ;;  %v908_v30 = vadd.f32 %v2611_v42, %v839_v20 }
 0x102   : > { %v1006_v29 = vmax.f32 %v942_v19, 0.0  ;;  %v940_v31 = vadd.f32 %v2611_v42, %v871_v21  ;;  %1292 = vst.msk [vmem:[%s2627_s12 + $0xc] sm:$0xf] %vm1288_vm0, %v1977_v22  ;;  %1324 = vst.msk [vmem:[%s2627_s12 + $0x8c] sm:$0xf] %vm1288_vm0, %v2009_v23  ;;  %v842_v34 = vmul.f32 %v2103_v26, %v2605_v40  ;;  %v874_v35 = vmul.f32 %v2135_v27, %v2605_v40  ;;  %v594_v36 = vpop.f32.mrf.mxu0  ;;  %v722_v37 = vpop.f32.mrf.mxu1 }
 0x103   : > { %v1975_v32 = vpack.c.bf16 %v969_v24, %v969_v24  ;;  %v2007_v33 = vpack.c.bf16 %v1001_v25, %v1001_v25  ;;  %v1980_v38 = vpack.c.bf16 %v974_v28, %v974_v28  ;;  %v972_v41 = vmax.f32 %v908_v30, 0.0 }
 0x104   : > { %v2012_v39 = vpack.c.bf16 %v1006_v29, %v1006_v29  ;;  %v1004_v43 = vmax.f32 %v940_v31, 0.0  ;;  %v911_v44 = vadd.f32 %v2611_v42, %v842_v34  ;;  %v943_v45 = vadd.f32 %v2611_v42, %v874_v35  ;;  %v2106_v48 = vpop.f32.mrf.mxu0  ;;  %v2138_v49 = vpop.f32.mrf.mxu1 }
 0x105   : > { %1290 = vst.msk [vmem:[%s2627_s12 + $0x4] sm:$0xf] %vm1288_vm0, %v1975_v32  ;;  %1322 = vst.msk [vmem:[%s2627_s12 + $0x84] sm:$0xf] %vm1288_vm0, %v2007_v33  ;;  %v840_v46 = vmul.f32 %v2605_v40, %v594_v36  ;;  %v872_v47 = vmul.f32 %v2605_v40, %v722_v37  ;;  %v1978_v50 = vpack.c.bf16 %v972_v41, %v972_v41 }
 0x106   : > { %1295 = vst.msk [vmem:[%s2627_s12 + $0x18] sm:$0xf] %vm1288_vm0, %v1980_v38  ;;  %1327 = vst.msk [vmem:[%s2627_s12 + $0x98] sm:$0xf] %vm1288_vm0, %v2012_v39  ;;  %v2010_v51 = vpack.c.bf16 %v1004_v43, %v1004_v43  ;;  %v845_v52 = vmul.f32 %v2106_v48, %v2605_v40  ;;  %v877_v53 = vmul.f32 %v2138_v49, %v2605_v40  ;;  %v975_v54 = vmax.f32 %v911_v44, 0.0  ;;  %v607_v58 = vpop.f32.mrf.mxu0  ;;  %v735_v59 = vpop.f32.mrf.mxu1 }
 0x107   : > { %v1007_v55 = vmax.f32 %v943_v45, 0.0  ;;  %v909_v56 = vadd.f32 %v2611_v42, %v840_v46  ;;  %v941_v57 = vadd.f32 %v2611_v42, %v872_v47  ;;  %1293 = vst.msk [vmem:[%s2627_s12 + $0x10] sm:$0xf] %vm1288_vm0, %v1978_v50  ;;  %v843_v62 = vmul.f32 %v2605_v40, %v607_v58 }
 0x108   : > { %1325 = vst.msk [vmem:[%s2627_s12 + $0x90] sm:$0xf] %vm1288_vm0, %v2010_v51  ;;  %v914_v60 = vadd.f32 %v2611_v42, %v845_v52  ;;  %v946_v61 = vadd.f32 %v2611_v42, %v877_v53  ;;  %v875_v63 = vmul.f32 %v2605_v40, %v735_v59  ;;  %v1981_v0 = vpack.c.bf16 %v975_v54, %v975_v54  ;;  %v2107_v4 = vpop.f32.mrf.mxu0  ;;  %v2139_v5 = vpop.f32.mrf.mxu1 }
 0x109   : > { %v2013_v1 = vpack.c.bf16 %v1007_v55, %v1007_v55  ;;  %v973_v2 = vmax.f32 %v909_v56, 0.0  ;;  %v1005_v3 = vmax.f32 %v941_v57, 0.0  ;;  %v912_v8 = vadd.f32 %v2611_v42, %v843_v62 }
 0x10a   : > { %v978_v6 = vmax.f32 %v914_v60, 0.0  ;;  %v1010_v7 = vmax.f32 %v946_v61, 0.0  ;;  %v944_v9 = vadd.f32 %v2611_v42, %v875_v63  ;;  %1296 = vst.msk [vmem:[%s2627_s12 + $0x1c] sm:$0xf] %vm1288_vm0, %v1981_v0  ;;  %v846_v12 = vmul.f32 %v2107_v4, %v2605_v40  ;;  %v610_v14 = vpop.f32.mrf.mxu0  ;;  %v738_v15 = vpop.f32.mrf.mxu1 }
 0x10b   : > { %1328 = vst.msk [vmem:[%s2627_s12 + $0x9c] sm:$0xf] %vm1288_vm0, %v2013_v1  ;;  %v1979_v10 = vpack.c.bf16 %v973_v2, %v973_v2  ;;  %v2011_v11 = vpack.c.bf16 %v1005_v3, %v1005_v3  ;;  %v878_v13 = vmul.f32 %v2139_v5, %v2605_v40  ;;  %v976_v18 = vmax.f32 %v912_v8, 0.0 }
 0x10c   : > { %v1984_v16 = vpack.c.bf16 %v978_v6, %v978_v6  ;;  %v2016_v17 = vpack.c.bf16 %v1010_v7, %v1010_v7  ;;  %v1008_v19 = vmax.f32 %v944_v9, 0.0  ;;  %v915_v20 = vadd.f32 %v2611_v42, %v846_v12  ;;  %v2110_v24 = vpop.f32.mrf.mxu0  ;;  %v2142_v25 = vpop.f32.mrf.mxu1 }
 0x10d   : > { %1294 = vst.msk [vmem:[%s2627_s12 + $0x14] sm:$0xf] %vm1288_vm0, %v1979_v10  ;;  %1326 = vst.msk [vmem:[%s2627_s12 + $0x94] sm:$0xf] %vm1288_vm0, %v2011_v11  ;;  %v947_v21 = vadd.f32 %v2611_v42, %v878_v13  ;;  %v844_v22 = vmul.f32 %v2605_v40, %v610_v14  ;;  %v876_v23 = vmul.f32 %v2605_v40, %v738_v15 }
 0x10e   : > { %1299 = vst.msk [vmem:[%s2627_s12 + $0x28] sm:$0xf] %vm1288_vm0, %v1984_v16  ;;  %1331 = vst.msk [vmem:[%s2627_s12 + $0xa8] sm:$0xf] %vm1288_vm0, %v2016_v17  ;;  %v1982_v26 = vpack.c.bf16 %v976_v18, %v976_v18  ;;  %v2014_v27 = vpack.c.bf16 %v1008_v19, %v1008_v19  ;;  %v849_v28 = vmul.f32 %v2110_v24, %v2605_v40  ;;  %v979_v30 = vmax.f32 %v915_v20, 0.0  ;;  %v623_v34 = vpop.f32.mrf.mxu0  ;;  %v751_v35 = vpop.f32.mrf.mxu1 }
 0x10f   : > { %v881_v29 = vmul.f32 %v2142_v25, %v2605_v40  ;;  %v1011_v31 = vmax.f32 %v947_v21, 0.0  ;;  %v913_v32 = vadd.f32 %v2611_v42, %v844_v22  ;;  %v945_v33 = vadd.f32 %v2611_v42, %v876_v23 }
 0x110   : > { %1297 = vst.msk [vmem:[%s2627_s12 + $0x20] sm:$0xf] %vm1288_vm0, %v1982_v26  ;;  %1329 = vst.msk [vmem:[%s2627_s12 + $0xa0] sm:$0xf] %vm1288_vm0, %v2014_v27  ;;  %v918_v36 = vadd.f32 %v2611_v42, %v849_v28  ;;  %v847_v38 = vmul.f32 %v2605_v40, %v623_v34  ;;  %v879_v39 = vmul.f32 %v2605_v40, %v751_v35  ;;  %v2111_v46 = vpop.f32.mrf.mxu0  ;;  %v2143_v47 = vpop.f32.mrf.mxu1 }
 0x111   : > { %v950_v37 = vadd.f32 %v2611_v42, %v881_v29  ;;  %v1985_v41 = vpack.c.bf16 %v979_v30, %v979_v30  ;;  %v2017_v43 = vpack.c.bf16 %v1011_v31, %v1011_v31  ;;  %v977_v44 = vmax.f32 %v913_v32, 0.0 }
 0x112   : > { %v1009_v45 = vmax.f32 %v945_v33, 0.0  ;;  %v982_v48 = vmax.f32 %v918_v36, 0.0  ;;  %v916_v50 = vadd.f32 %v2611_v42, %v847_v38  ;;  %v948_v51 = vadd.f32 %v2611_v42, %v879_v39  ;;  %v626_v56 = vpop.f32.mrf.mxu0  ;;  %v754_v57 = vpop.f32.mrf.mxu1 }
 0x113   : > { %v1014_v49 = vmax.f32 %v950_v37, 0.0  ;;  %1300 = vst.msk [vmem:[%s2627_s12 + $0x2c] sm:$0xf] %vm1288_vm0, %v1985_v41  ;;  %1332 = vst.msk [vmem:[%s2627_s12 + $0xac] sm:$0xf] %vm1288_vm0, %v2017_v43  ;;  %v1983_v52 = vpack.c.bf16 %v977_v44, %v977_v44  ;;  %v850_v54 = vmul.f32 %v2111_v46, %v2605_v40  ;;  %v882_v55 = vmul.f32 %v2143_v47, %v2605_v40 }
 0x114   : > { %v2015_v53 = vpack.c.bf16 %v1009_v45, %v1009_v45  ;;  %v1988_v58 = vpack.c.bf16 %v982_v48, %v982_v48  ;;  %v980_v60 = vmax.f32 %v916_v50, 0.0  ;;  %v1012_v61 = vmax.f32 %v948_v51, 0.0  ;;  %v2114_v2 = vpop.f32.mrf.mxu0  ;;  %v2146_v3 = vpop.f32.mrf.mxu1 }
 0x115   : > { %v2020_v59 = vpack.c.bf16 %v1014_v49, %v1014_v49  ;;  %1298 = vst.msk [vmem:[%s2627_s12 + $0x24] sm:$0xf] %vm1288_vm0, %v1983_v52  ;;  %v919_v62 = vadd.f32 %v2611_v42, %v850_v54  ;;  %v951_v63 = vadd.f32 %v2611_v42, %v882_v55  ;;  %v848_v0 = vmul.f32 %v2605_v40, %v626_v56 }
 0x116   : > { %1330 = vst.msk [vmem:[%s2627_s12 + $0xa4] sm:$0xf] %vm1288_vm0, %v2015_v53  ;;  %v880_v1 = vmul.f32 %v2605_v40, %v754_v57  ;;  %1303 = vst.msk [vmem:[%s2627_s12 + $0x38] sm:$0xf] %vm1288_vm0, %v1988_v58  ;;  %v1986_v4 = vpack.c.bf16 %v980_v60, %v980_v60  ;;  %v2018_v5 = vpack.c.bf16 %v1012_v61, %v1012_v61  ;;  %v639_v12 = vpop.f32.mrf.mxu0  ;;  %v767_v13 = vpop.f32.mrf.mxu1 }
 0x117   : > { %1335 = vst.msk [vmem:[%s2627_s12 + $0xb8] sm:$0xf] %vm1288_vm0, %v2020_v59  ;;  %v853_v6 = vmul.f32 %v2114_v2, %v2605_v40  ;;  %v885_v7 = vmul.f32 %v2146_v3, %v2605_v40  ;;  %v983_v8 = vmax.f32 %v919_v62, 0.0  ;;  %v1015_v9 = vmax.f32 %v951_v63, 0.0 }
 0x118   : > { %v917_v10 = vadd.f32 %v2611_v42, %v848_v0  ;;  %v949_v11 = vadd.f32 %v2611_v42, %v880_v1  ;;  %1301 = vst.msk [vmem:[%s2627_s12 + $0x30] sm:$0xf] %vm1288_vm0, %v1986_v4  ;;  %1333 = vst.msk [vmem:[%s2627_s12 + $0xb0] sm:$0xf] %vm1288_vm0, %v2018_v5  ;;  %v851_v16 = vmul.f32 %v2605_v40, %v639_v12  ;;  %v2115_v22 = vpop.f32.mrf.mxu0  ;;  %v2147_v23 = vpop.f32.mrf.mxu1 }
 0x119   : > { %v922_v14 = vadd.f32 %v2611_v42, %v853_v6  ;;  %v954_v15 = vadd.f32 %v2611_v42, %v885_v7  ;;  %v883_v17 = vmul.f32 %v2605_v40, %v767_v13  ;;  %v1989_v18 = vpack.c.bf16 %v983_v8, %v983_v8 }
 0x11a   : > { %v2021_v19 = vpack.c.bf16 %v1015_v9, %v1015_v9  ;;  %v981_v20 = vmax.f32 %v917_v10, 0.0  ;;  %v1013_v21 = vmax.f32 %v949_v11, 0.0  ;;  %v920_v26 = vadd.f32 %v2611_v42, %v851_v16  ;;  %v642_v32 = vpop.f32.mrf.mxu0  ;;  %v770_v33 = vpop.f32.mrf.mxu1 }
 0x11b   : > { %v986_v24 = vmax.f32 %v922_v14, 0.0  ;;  %v1018_v25 = vmax.f32 %v954_v15, 0.0  ;;  %v952_v27 = vadd.f32 %v2611_v42, %v883_v17  ;;  %1304 = vst.msk [vmem:[%s2627_s12 + $0x3c] sm:$0xf] %vm1288_vm0, %v1989_v18  ;;  %v854_v30 = vmul.f32 %v2115_v22, %v2605_v40 }
 0x11c   : > { %1336 = vst.msk [vmem:[%s2627_s12 + $0xbc] sm:$0xf] %vm1288_vm0, %v2021_v19  ;;  %v1987_v28 = vpack.c.bf16 %v981_v20, %v981_v20  ;;  %v2019_v29 = vpack.c.bf16 %v1013_v21, %v1013_v21  ;;  %v886_v31 = vmul.f32 %v2147_v23, %v2605_v40  ;;  %v984_v36 = vmax.f32 %v920_v26, 0.0  ;;  %v2118_v44 = vpop.f32.mrf.mxu0  ;;  %v2150_v45 = vpop.f32.mrf.mxu1 }
 0x11d   : > { %v1992_v34 = vpack.c.bf16 %v986_v24, %v986_v24  ;;  %v2024_v35 = vpack.c.bf16 %v1018_v25, %v1018_v25  ;;  %v1016_v37 = vmax.f32 %v952_v27, 0.0  ;;  %v923_v38 = vadd.f32 %v2611_v42, %v854_v30 }
 0x11e   : > { %1302 = vst.msk [vmem:[%s2627_s12 + $0x34] sm:$0xf] %vm1288_vm0, %v1987_v28  ;;  %1334 = vst.msk [vmem:[%s2627_s12 + $0xb4] sm:$0xf] %vm1288_vm0, %v2019_v29  ;;  %v955_v39 = vadd.f32 %v2611_v42, %v886_v31  ;;  %v852_v41 = vmul.f32 %v2605_v40, %v642_v32  ;;  %v884_v43 = vmul.f32 %v2605_v40, %v770_v33  ;;  %v655_v54 = vpop.f32.mrf.mxu0  ;;  %v783_v55 = vpop.f32.mrf.mxu1 }
 0x11f   : > { %1307 = vst.msk [vmem:[%s2627_s12 + $0x48] sm:$0xf] %vm1288_vm0, %v1992_v34  ;;  %1339 = vst.msk [vmem:[%s2627_s12 + $0xc8] sm:$0xf] %vm1288_vm0, %v2024_v35  ;;  %v1990_v46 = vpack.c.bf16 %v984_v36, %v984_v36  ;;  %v2022_v47 = vpack.c.bf16 %v1016_v37, %v1016_v37  ;;  %v857_v48 = vmul.f32 %v2118_v44, %v2605_v40  ;;  %v987_v50 = vmax.f32 %v923_v38, 0.0 }
 0x120   : > { %v889_v49 = vmul.f32 %v2150_v45, %v2605_v40  ;;  %v1019_v51 = vmax.f32 %v955_v39, 0.0  ;;  %v921_v52 = vadd.f32 %v2611_v42, %v852_v41  ;;  %v953_v53 = vadd.f32 %v2611_v42, %v884_v43  ;;  %v2119_v0 = vpop.f32.mrf.mxu0  ;;  %v2151_v1 = vpop.f32.mrf.mxu1 }
 0x121   : > { %1305 = vst.msk [vmem:[%s2627_s12 + $0x40] sm:$0xf] %vm1288_vm0, %v1990_v46  ;;  %1337 = vst.msk [vmem:[%s2627_s12 + $0xc0] sm:$0xf] %vm1288_vm0, %v2022_v47  ;;  %v926_v56 = vadd.f32 %v2611_v42, %v857_v48  ;;  %v855_v58 = vmul.f32 %v2605_v40, %v655_v54  ;;  %v887_v59 = vmul.f32 %v2605_v40, %v783_v55 }
 0x122   : > { %v958_v57 = vadd.f32 %v2611_v42, %v889_v49  ;;  %v1993_v60 = vpack.c.bf16 %v987_v50, %v987_v50  ;;  %v2025_v61 = vpack.c.bf16 %v1019_v51, %v1019_v51  ;;  %v985_v62 = vmax.f32 %v921_v52, 0.0  ;;  %v658_v10 = vpop.f32.mrf.mxu0  ;;  %v786_v11 = vpop.f32.mrf.mxu1 }
 0x123   : > { %v1017_v63 = vmax.f32 %v953_v53, 0.0  ;;  %v990_v2 = vmax.f32 %v926_v56, 0.0  ;;  %v924_v4 = vadd.f32 %v2611_v42, %v855_v58  ;;  %v956_v5 = vadd.f32 %v2611_v42, %v887_v59 }
 0x124   : > { %v1022_v3 = vmax.f32 %v958_v57, 0.0  ;;  %1308 = vst.msk [vmem:[%s2627_s12 + $0x4c] sm:$0xf] %vm1288_vm0, %v1993_v60  ;;  %1340 = vst.msk [vmem:[%s2627_s12 + $0xcc] sm:$0xf] %vm1288_vm0, %v2025_v61  ;;  %v1991_v6 = vpack.c.bf16 %v985_v62, %v985_v62  ;;  %v858_v8 = vmul.f32 %v2119_v0, %v2605_v40  ;;  %v890_v9 = vmul.f32 %v2151_v1, %v2605_v40  ;;  %v2122_v20 = vpop.f32.mrf.mxu0  ;;  %v2154_v21 = vpop.f32.mrf.mxu1 }
 0x125   : > { %v2023_v7 = vpack.c.bf16 %v1017_v63, %v1017_v63  ;;  %v1996_v12 = vpack.c.bf16 %v990_v2, %v990_v2  ;;  %v988_v14 = vmax.f32 %v924_v4, 0.0  ;;  %v1020_v15 = vmax.f32 %v956_v5, 0.0 }
 0x126   : > { %v2028_v13 = vpack.c.bf16 %v1022_v3, %v1022_v3  ;;  %1306 = vst.msk [vmem:[%s2627_s12 + $0x44] sm:$0xf] %vm1288_vm0, %v1991_v6  ;;  %v927_v16 = vadd.f32 %v2611_v42, %v858_v8  ;;  %v959_v17 = vadd.f32 %v2611_v42, %v890_v9  ;;  %v856_v18 = vmul.f32 %v2605_v40, %v658_v10  ;;  %v671_v30 = vpop.f32.mrf.mxu0  ;;  %v799_v31 = vpop.f32.mrf.mxu1 }
 0x127   : > { %1338 = vst.msk [vmem:[%s2627_s12 + $0xc4] sm:$0xf] %vm1288_vm0, %v2023_v7  ;;  %v888_v19 = vmul.f32 %v2605_v40, %v786_v11  ;;  %1311 = vst.msk [vmem:[%s2627_s12 + $0x58] sm:$0xf] %vm1288_vm0, %v1996_v12  ;;  %v1994_v22 = vpack.c.bf16 %v988_v14, %v988_v14  ;;  %v2026_v23 = vpack.c.bf16 %v1020_v15, %v1020_v15 }
 0x128   : > { %1343 = vst.msk [vmem:[%s2627_s12 + $0xd8] sm:$0xf] %vm1288_vm0, %v2028_v13  ;;  %v861_v24 = vmul.f32 %v2122_v20, %v2605_v40  ;;  %v893_v25 = vmul.f32 %v2154_v21, %v2605_v40  ;;  %v991_v26 = vmax.f32 %v927_v16, 0.0  ;;  %v1023_v27 = vmax.f32 %v959_v17, 0.0  ;;  %v2123_v41 = vpop.f32.mrf.mxu0  ;;  %v2155_v43 = vpop.f32.mrf.mxu1 }
 0x129   : > { %v925_v28 = vadd.f32 %v2611_v42, %v856_v18  ;;  %v957_v29 = vadd.f32 %v2611_v42, %v888_v19  ;;  %1309 = vst.msk [vmem:[%s2627_s12 + $0x50] sm:$0xf] %vm1288_vm0, %v1994_v22  ;;  %1341 = vst.msk [vmem:[%s2627_s12 + $0xd0] sm:$0xf] %vm1288_vm0, %v2026_v23  ;;  %v859_v34 = vmul.f32 %v2605_v40, %v671_v30 }
 0x12a   : > { %v930_v32 = vadd.f32 %v2611_v42, %v861_v24  ;;  %v962_v33 = vadd.f32 %v2611_v42, %v893_v25  ;;  %v891_v35 = vmul.f32 %v2605_v40, %v799_v31  ;;  %v1997_v36 = vpack.c.bf16 %v991_v26, %v991_v26  ;;  %v674_v52 = vpop.f32.mrf.mxu0  ;;  %v802_v53 = vpop.f32.mrf.mxu1 }
 0x12b   : > { %v2029_v37 = vpack.c.bf16 %v1023_v27, %v1023_v27  ;;  %v989_v38 = vmax.f32 %v925_v28, 0.0  ;;  %v1021_v39 = vmax.f32 %v957_v29, 0.0  ;;  %v928_v46 = vadd.f32 %v2611_v42, %v859_v34 }
 0x12c   : > { %v994_v44 = vmax.f32 %v930_v32, 0.0  ;;  %v1026_v45 = vmax.f32 %v962_v33, 0.0  ;;  %v960_v47 = vadd.f32 %v2611_v42, %v891_v35  ;;  %1312 = vst.msk [vmem:[%s2627_s12 + $0x5c] sm:$0xf] %vm1288_vm0, %v1997_v36  ;;  %v862_v50 = vmul.f32 %v2123_v41, %v2605_v40  ;;  %v2126_v62 = vpop.f32.mrf.mxu0  ;;  %v2158_v63 = vpop.f32.mrf.mxu1 }
 0x12d   : > { %1344 = vst.msk [vmem:[%s2627_s12 + $0xdc] sm:$0xf] %vm1288_vm0, %v2029_v37  ;;  %v1995_v48 = vpack.c.bf16 %v989_v38, %v989_v38  ;;  %v2027_v49 = vpack.c.bf16 %v1021_v39, %v1021_v39  ;;  %v894_v51 = vmul.f32 %v2155_v43, %v2605_v40  ;;  %v992_v56 = vmax.f32 %v928_v46, 0.0 }
 0x12e   : > { %v2000_v54 = vpack.c.bf16 %v994_v44, %v994_v44  ;;  %v2032_v55 = vpack.c.bf16 %v1026_v45, %v1026_v45  ;;  %v1024_v57 = vmax.f32 %v960_v47, 0.0  ;;  %v931_v58 = vadd.f32 %v2611_v42, %v862_v50  ;;  %v687_v8 = vpop.f32.mrf.mxu0  ;;  %v815_v9 = vpop.f32.mrf.mxu1 }
 0x12f   : > { %1310 = vst.msk [vmem:[%s2627_s12 + $0x54] sm:$0xf] %vm1288_vm0, %v1995_v48  ;;  %1342 = vst.msk [vmem:[%s2627_s12 + $0xd4] sm:$0xf] %vm1288_vm0, %v2027_v49  ;;  %v963_v59 = vadd.f32 %v2611_v42, %v894_v51  ;;  %v860_v60 = vmul.f32 %v2605_v40, %v674_v52  ;;  %v892_v61 = vmul.f32 %v2605_v40, %v802_v53 }
 0x130   : > { %1315 = vst.msk [vmem:[%s2627_s12 + $0x68] sm:$0xf] %vm1288_vm0, %v2000_v54  ;;  %1347 = vst.msk [vmem:[%s2627_s12 + $0xe8] sm:$0xf] %vm1288_vm0, %v2032_v55  ;;  %v1998_v0 = vpack.c.bf16 %v992_v56, %v992_v56  ;;  %v2030_v1 = vpack.c.bf16 %v1024_v57, %v1024_v57  ;;  %v865_v2 = vmul.f32 %v2126_v62, %v2605_v40  ;;  %v995_v4 = vmax.f32 %v931_v58, 0.0  ;;  %v2127_v18 = vpop.f32.mrf.mxu0  ;;  %v2159_v19 = vpop.f32.mrf.mxu1 }
 0x131   : > { %v897_v3 = vmul.f32 %v2158_v63, %v2605_v40  ;;  %v1027_v5 = vmax.f32 %v963_v59, 0.0  ;;  %v929_v6 = vadd.f32 %v2611_v42, %v860_v60  ;;  %v961_v7 = vadd.f32 %v2611_v42, %v892_v61 }
 0x132   : > { %1313 = vst.msk [vmem:[%s2627_s12 + $0x60] sm:$0xf] %vm1288_vm0, %v1998_v0  ;;  %1345 = vst.msk [vmem:[%s2627_s12 + $0xe0] sm:$0xf] %vm1288_vm0, %v2030_v1  ;;  %v934_v10 = vadd.f32 %v2611_v42, %v865_v2  ;;  %v863_v12 = vmul.f32 %v2605_v40, %v687_v8  ;;  %v895_v13 = vmul.f32 %v2605_v40, %v815_v9  ;;  %v690_v28 = vpop.f32.mrf.mxu0  ;;  %v818_v29 = vpop.f32.mrf.mxu1 }
 0x133   : > { %v966_v11 = vadd.f32 %v2611_v42, %v897_v3  ;;  %v2001_v14 = vpack.c.bf16 %v995_v4, %v995_v4  ;;  %v2033_v15 = vpack.c.bf16 %v1027_v5, %v1027_v5  ;;  %v993_v16 = vmax.f32 %v929_v6, 0.0 }
 0x134   : > { %v1025_v17 = vmax.f32 %v961_v7, 0.0  ;;  %v998_v20 = vmax.f32 %v934_v10, 0.0  ;;  %v932_v22 = vadd.f32 %v2611_v42, %v863_v12  ;;  %v964_v23 = vadd.f32 %v2611_v42, %v895_v13 }
 0x135   : > { %v1030_v21 = vmax.f32 %v966_v11, 0.0  ;;  %1316 = vst.msk [vmem:[%s2627_s12 + $0x6c] sm:$0xf] %vm1288_vm0, %v2001_v14  ;;  %1348 = vst.msk [vmem:[%s2627_s12 + $0xec] sm:$0xf] %vm1288_vm0, %v2033_v15  ;;  %v1999_v24 = vpack.c.bf16 %v993_v16, %v993_v16  ;;  %v866_v26 = vmul.f32 %v2127_v18, %v2605_v40  ;;  %v898_v27 = vmul.f32 %v2159_v19, %v2605_v40 }
 0x136   : > { %v2031_v25 = vpack.c.bf16 %v1025_v17, %v1025_v17  ;;  %v2004_v30 = vpack.c.bf16 %v998_v20, %v998_v20  ;;  %v996_v32 = vmax.f32 %v932_v22, 0.0  ;;  %v1028_v33 = vmax.f32 %v964_v23, 0.0 }
 0x137   : > { %v2036_v31 = vpack.c.bf16 %v1030_v21, %v1030_v21  ;;  %1314 = vst.msk [vmem:[%s2627_s12 + $0x64] sm:$0xf] %vm1288_vm0, %v1999_v24  ;;  %v935_v34 = vadd.f32 %v2611_v42, %v866_v26  ;;  %v967_v35 = vadd.f32 %v2611_v42, %v898_v27  ;;  %v864_v36 = vmul.f32 %v2605_v40, %v690_v28 }
 0x138   : > { %1346 = vst.msk [vmem:[%s2627_s12 + $0xe4] sm:$0xf] %vm1288_vm0, %v2031_v25  ;;  %v896_v37 = vmul.f32 %v2605_v40, %v818_v29  ;;  %1319 = vst.msk [vmem:[%s2627_s12 + $0x78] sm:$0xf] %vm1288_vm0, %v2004_v30  ;;  %v2002_v38 = vpack.c.bf16 %v996_v32, %v996_v32  ;;  %v2034_v39 = vpack.c.bf16 %v1028_v33, %v1028_v33 }
 0x139   : > { %1351 = vst.msk [vmem:[%s2627_s12 + $0xf8] sm:$0xf] %vm1288_vm0, %v2036_v31  ;;  %v999_v41 = vmax.f32 %v935_v34, 0.0  ;;  %v1031_v43 = vmax.f32 %v967_v35, 0.0  ;;  %v933_v44 = vadd.f32 %v2611_v42, %v864_v36 }
 0x13a   : > { %v965_v45 = vadd.f32 %v2611_v42, %v896_v37  ;;  %1317 = vst.msk [vmem:[%s2627_s12 + $0x70] sm:$0xf] %vm1288_vm0, %v2002_v38  ;;  %1349 = vst.msk [vmem:[%s2627_s12 + $0xf0] sm:$0xf] %vm1288_vm0, %v2034_v39 }
 0x13b   : > { %v2005_v40 = vpack.c.bf16 %v999_v41, %v999_v41  ;;  %v2037_v46 = vpack.c.bf16 %v1031_v43, %v1031_v43  ;;  %v997_v47 = vmax.f32 %v933_v44, 0.0 }
 0x13c   : > { %v1029_v48 = vmax.f32 %v965_v45, 0.0  ;;  %1359 = sbr.rel (!%p2522_p5) target bundleno = 402 (0x192), region = 36 }
 0x13d   : > { %1320 = vst.msk [vmem:[%s2627_s12 + $0x7c] sm:$0xf] %vm1288_vm0, %v2005_v40  ;;  %1352 = vst.msk [vmem:[%s2627_s12 + $0xfc] sm:$0xf] %vm1288_vm0, %v2037_v46  ;;  %v2003_v49 = vpack.c.bf16 %v997_v47, %v997_v47 }
 0x13e   : > { %v2035_v50 = vpack.c.bf16 %v1029_v48, %v1029_v48 }
 0x13f   : > { %1318 = vst.msk [vmem:[%s2627_s12 + $0x74] sm:$0xf] %vm1288_vm0, %v2003_v49 }
 0x140   : > { %1350 = vst.msk [vmem:[%s2627_s12 + $0xf4] sm:$0xf] %vm1288_vm0, %v2035_v50 }
 0x141   : > { %s3103_s25 = smov (!%p1362_p11, %s1361_s25), 64 }
 0x142   : > { %s1959_s4 = sshll.u32 %s3103_s25, 6 }
 0x143   : > { %p1962_p12 = scmp.eq.s32.totalorder %s1959_s4, 0 }
 0x144   : > { %s2885_s23 = sshrl.u32 (!%p1962_p12), %s3103_s25, 6 }
 0x145   : > { %1372 = sbr.rel (%p1962_p12) target bundleno = 402 (0x192), region = 40  ;;  %p1963_p13 = scmp.le.s32.totalorder (!%p1962_p12), %s2885_s23, 0 }
 0x14a   : > { %1788 = sbr.rel (%p1963_p13) target bundleno = 385 (0x181), region = 112  ;;  %s3087_s15 = smov (!%p1963_p13), %s2882_s7 }
 0x14b   : > { %s3088_s30 = smov (!%p1963_p13), %s2627_s12  ;;  %s2894_s8 = smov (!%p1963_p13), 0  }
 0x14c   : > { %s2896_s9 = smov (!%p1963_p13), 0  }
 0x14f LB: >> { %v1389_v42 = vld [vmem:[%s2432_s30] sm:$0xf]  ;;  %v1391_v51 = vld [vmem:[%s2432_s30 + $0x4] sm:$0xf]  ;;  %v1393_v52 = vld [vmem:[%s2432_s30 + $0x8] sm:$0xf]  ;;  %s2440_s9 = sphi %s2896_s9, %s1383_s9   ;;  %s2436_s8 = sphi %s2894_s8, %s3089_s8   ;;  %s2432_s30 = sphi %s3088_s30, %s1522_s30   ;;  %s2428_s15 = sphi %s3087_s15, %s1523_s15  }
 0x150   : >> { %1390 = vst [vmem:[%s2428_s15] sm:$0xf] %v1389_v42  ;;  %1392 = vst [vmem:[%s2428_s15 + $0x4] sm:$0xf] %v1391_v51  ;;  %v1395_v53 = vld [vmem:[%s2432_s30 + $0xc] sm:$0xf]  ;;  %s1517_s10 = sadd.s32 1, %s2436_s8 }
 0x151   : >> { %1394 = vst [vmem:[%s2428_s15 + $0x8] sm:$0xf] %v1393_v52  ;;  %v1397_v54 = vld [vmem:[%s2432_s30 + $0x10] sm:$0xf]  ;;  %v1399_v55 = vld [vmem:[%s2432_s30 + $0x14] sm:$0xf]  ;;  %p1518_p0 = scmp.ge.s32.totalorder %s1517_s10, %s2885_s23 }
 0x152   : >> { %1396 = vst [vmem:[%s2428_s15 + $0xc] sm:$0xf] %v1395_v53  ;;  %1398 = vst [vmem:[%s2428_s15 + $0x10] sm:$0xf] %v1397_v54  ;;  %v1401_v56 = vld [vmem:[%s2432_s30 + $0x18] sm:$0xf] }
 0x153   : >> { %1400 = vst [vmem:[%s2428_s15 + $0x14] sm:$0xf] %v1399_v55  ;;  %v1403_v57 = vld [vmem:[%s2432_s30 + $0x1c] sm:$0xf]  ;;  %v1405_v58 = vld [vmem:[%s2432_s30 + $0x20] sm:$0xf] }
 0x154   : >> { %1402 = vst [vmem:[%s2428_s15 + $0x18] sm:$0xf] %v1401_v56  ;;  %1404 = vst [vmem:[%s2428_s15 + $0x1c] sm:$0xf] %v1403_v57  ;;  %v1407_v59 = vld [vmem:[%s2432_s30 + $0x24] sm:$0xf] }
 0x155   : >> { %1406 = vst [vmem:[%s2428_s15 + $0x20] sm:$0xf] %v1405_v58  ;;  %v1409_v60 = vld [vmem:[%s2432_s30 + $0x28] sm:$0xf]  ;;  %v1411_v61 = vld [vmem:[%s2432_s30 + $0x2c] sm:$0xf] }
 0x156   : >> { %1408 = vst [vmem:[%s2428_s15 + $0x24] sm:$0xf] %v1407_v59  ;;  %1410 = vst [vmem:[%s2428_s15 + $0x28] sm:$0xf] %v1409_v60  ;;  %v1413_v62 = vld [vmem:[%s2432_s30 + $0x30] sm:$0xf] }
 0x157   : >> { %1412 = vst [vmem:[%s2428_s15 + $0x2c] sm:$0xf] %v1411_v61  ;;  %v1415_v63 = vld [vmem:[%s2432_s30 + $0x34] sm:$0xf]  ;;  %v1417_v0 = vld [vmem:[%s2432_s30 + $0x38] sm:$0xf] }
 0x158   : >> { %1414 = vst [vmem:[%s2428_s15 + $0x30] sm:$0xf] %v1413_v62  ;;  %1416 = vst [vmem:[%s2428_s15 + $0x34] sm:$0xf] %v1415_v63  ;;  %v1419_v1 = vld [vmem:[%s2432_s30 + $0x3c] sm:$0xf] }
 0x159   : >> { %1418 = vst [vmem:[%s2428_s15 + $0x38] sm:$0xf] %v1417_v0  ;;  %v1421_v2 = vld [vmem:[%s2432_s30 + $0x40] sm:$0xf]  ;;  %v1423_v3 = vld [vmem:[%s2432_s30 + $0x44] sm:$0xf] }
 0x15a   : >> { %1420 = vst [vmem:[%s2428_s15 + $0x3c] sm:$0xf] %v1419_v1  ;;  %1422 = vst [vmem:[%s2428_s15 + $0x40] sm:$0xf] %v1421_v2  ;;  %v1425_v4 = vld [vmem:[%s2432_s30 + $0x48] sm:$0xf] }
 0x15b   : >> { %1424 = vst [vmem:[%s2428_s15 + $0x44] sm:$0xf] %v1423_v3  ;;  %v1427_v5 = vld [vmem:[%s2432_s30 + $0x4c] sm:$0xf]  ;;  %v1429_v6 = vld [vmem:[%s2432_s30 + $0x50] sm:$0xf] }
 0x15c   : >> { %1426 = vst [vmem:[%s2428_s15 + $0x48] sm:$0xf] %v1425_v4  ;;  %1428 = vst [vmem:[%s2428_s15 + $0x4c] sm:$0xf] %v1427_v5  ;;  %v1431_v7 = vld [vmem:[%s2432_s30 + $0x54] sm:$0xf] }
 0x15d   : >> { %1430 = vst [vmem:[%s2428_s15 + $0x50] sm:$0xf] %v1429_v6  ;;  %v1433_v8 = vld [vmem:[%s2432_s30 + $0x58] sm:$0xf]  ;;  %v1435_v9 = vld [vmem:[%s2432_s30 + $0x5c] sm:$0xf] }
 0x15e   : >> { %1432 = vst [vmem:[%s2428_s15 + $0x54] sm:$0xf] %v1431_v7  ;;  %1434 = vst [vmem:[%s2428_s15 + $0x58] sm:$0xf] %v1433_v8  ;;  %v1437_v10 = vld [vmem:[%s2432_s30 + $0x60] sm:$0xf] }
 0x15f   : >> { %1436 = vst [vmem:[%s2428_s15 + $0x5c] sm:$0xf] %v1435_v9  ;;  %v1439_v11 = vld [vmem:[%s2432_s30 + $0x64] sm:$0xf]  ;;  %v1441_v12 = vld [vmem:[%s2432_s30 + $0x68] sm:$0xf] }
 0x160   : >> { %1438 = vst [vmem:[%s2428_s15 + $0x60] sm:$0xf] %v1437_v10  ;;  %1440 = vst [vmem:[%s2428_s15 + $0x64] sm:$0xf] %v1439_v11  ;;  %v1443_v13 = vld [vmem:[%s2432_s30 + $0x6c] sm:$0xf] }
 0x161   : >> { %1442 = vst [vmem:[%s2428_s15 + $0x68] sm:$0xf] %v1441_v12  ;;  %v1445_v14 = vld [vmem:[%s2432_s30 + $0x70] sm:$0xf]  ;;  %v1447_v15 = vld [vmem:[%s2432_s30 + $0x74] sm:$0xf] }
 0x162   : >> { %1444 = vst [vmem:[%s2428_s15 + $0x6c] sm:$0xf] %v1443_v13  ;;  %1446 = vst [vmem:[%s2428_s15 + $0x70] sm:$0xf] %v1445_v14  ;;  %v1449_v16 = vld [vmem:[%s2432_s30 + $0x78] sm:$0xf] }
 0x163   : >> { %1448 = vst [vmem:[%s2428_s15 + $0x74] sm:$0xf] %v1447_v15  ;;  %v1451_v17 = vld [vmem:[%s2432_s30 + $0x7c] sm:$0xf]  ;;  %v1453_v18 = vld [vmem:[%s2432_s30 + $0x80] sm:$0xf] }
 0x164   : >> { %1450 = vst [vmem:[%s2428_s15 + $0x78] sm:$0xf] %v1449_v16  ;;  %1452 = vst [vmem:[%s2428_s15 + $0x7c] sm:$0xf] %v1451_v17  ;;  %v1455_v19 = vld [vmem:[%s2432_s30 + $0x84] sm:$0xf] }
 0x165   : >> { %1454 = vst [vmem:[%s2428_s15 + $0x80] sm:$0xf] %v1453_v18  ;;  %v1457_v20 = vld [vmem:[%s2432_s30 + $0x88] sm:$0xf]  ;;  %v1459_v21 = vld [vmem:[%s2432_s30 + $0x8c] sm:$0xf] }
 0x166   : >> { %1456 = vst [vmem:[%s2428_s15 + $0x84] sm:$0xf] %v1455_v19  ;;  %1458 = vst [vmem:[%s2428_s15 + $0x88] sm:$0xf] %v1457_v20  ;;  %v1461_v22 = vld [vmem:[%s2432_s30 + $0x90] sm:$0xf] }
 0x167   : >> { %1460 = vst [vmem:[%s2428_s15 + $0x8c] sm:$0xf] %v1459_v21  ;;  %v1463_v23 = vld [vmem:[%s2432_s30 + $0x94] sm:$0xf]  ;;  %v1465_v24 = vld [vmem:[%s2432_s30 + $0x98] sm:$0xf] }
 0x168   : >> { %1462 = vst [vmem:[%s2428_s15 + $0x90] sm:$0xf] %v1461_v22  ;;  %1464 = vst [vmem:[%s2428_s15 + $0x94] sm:$0xf] %v1463_v23  ;;  %v1467_v25 = vld [vmem:[%s2432_s30 + $0x9c] sm:$0xf] }
 0x169   : >> { %1466 = vst [vmem:[%s2428_s15 + $0x98] sm:$0xf] %v1465_v24  ;;  %v1469_v26 = vld [vmem:[%s2432_s30 + $0xa0] sm:$0xf]  ;;  %v1471_v27 = vld [vmem:[%s2432_s30 + $0xa4] sm:$0xf] }
 0x16a   : >> { %1468 = vst [vmem:[%s2428_s15 + $0x9c] sm:$0xf] %v1467_v25  ;;  %1470 = vst [vmem:[%s2428_s15 + $0xa0] sm:$0xf] %v1469_v26  ;;  %v1473_v28 = vld [vmem:[%s2432_s30 + $0xa8] sm:$0xf] }
 0x16b   : >> { %1472 = vst [vmem:[%s2428_s15 + $0xa4] sm:$0xf] %v1471_v27  ;;  %v1475_v29 = vld [vmem:[%s2432_s30 + $0xac] sm:$0xf]  ;;  %v1477_v30 = vld [vmem:[%s2432_s30 + $0xb0] sm:$0xf] }
 0x16c   : >> { %1474 = vst [vmem:[%s2428_s15 + $0xa8] sm:$0xf] %v1473_v28  ;;  %1476 = vst [vmem:[%s2428_s15 + $0xac] sm:$0xf] %v1475_v29  ;;  %v1479_v31 = vld [vmem:[%s2432_s30 + $0xb4] sm:$0xf] }
 0x16d   : >> { %1478 = vst [vmem:[%s2428_s15 + $0xb0] sm:$0xf] %v1477_v30  ;;  %v1481_v32 = vld [vmem:[%s2432_s30 + $0xb8] sm:$0xf]  ;;  %v1483_v33 = vld [vmem:[%s2432_s30 + $0xbc] sm:$0xf] }
 0x16e   : >> { %1480 = vst [vmem:[%s2428_s15 + $0xb4] sm:$0xf] %v1479_v31  ;;  %1482 = vst [vmem:[%s2428_s15 + $0xb8] sm:$0xf] %v1481_v32  ;;  %v1485_v34 = vld [vmem:[%s2432_s30 + $0xc0] sm:$0xf] }
 0x16f   : >> { %1484 = vst [vmem:[%s2428_s15 + $0xbc] sm:$0xf] %v1483_v33  ;;  %v1487_v35 = vld [vmem:[%s2432_s30 + $0xc4] sm:$0xf]  ;;  %v1489_v36 = vld [vmem:[%s2432_s30 + $0xc8] sm:$0xf] }
 0x170   : >> { %1486 = vst [vmem:[%s2428_s15 + $0xc0] sm:$0xf] %v1485_v34  ;;  %1488 = vst [vmem:[%s2428_s15 + $0xc4] sm:$0xf] %v1487_v35  ;;  %v1491_v37 = vld [vmem:[%s2432_s30 + $0xcc] sm:$0xf] }
 0x171   : >> { %1490 = vst [vmem:[%s2428_s15 + $0xc8] sm:$0xf] %v1489_v36  ;;  %v1493_v38 = vld [vmem:[%s2432_s30 + $0xd0] sm:$0xf]  ;;  %v1495_v39 = vld [vmem:[%s2432_s30 + $0xd4] sm:$0xf] }
 0x172   : >> { %1492 = vst [vmem:[%s2428_s15 + $0xcc] sm:$0xf] %v1491_v37  ;;  %1494 = vst [vmem:[%s2428_s15 + $0xd0] sm:$0xf] %v1493_v38  ;;  %v1497_v41 = vld [vmem:[%s2432_s30 + $0xd8] sm:$0xf] }
 0x173   : >> { %1496 = vst [vmem:[%s2428_s15 + $0xd4] sm:$0xf] %v1495_v39  ;;  %v1499_v43 = vld [vmem:[%s2432_s30 + $0xdc] sm:$0xf]  ;;  %v1501_v44 = vld [vmem:[%s2432_s30 + $0xe0] sm:$0xf] }
 0x174   : >> { %1498 = vst [vmem:[%s2428_s15 + $0xd8] sm:$0xf] %v1497_v41  ;;  %1500 = vst [vmem:[%s2428_s15 + $0xdc] sm:$0xf] %v1499_v43  ;;  %v1503_v45 = vld [vmem:[%s2432_s30 + $0xe4] sm:$0xf] }
 0x175   : >> { %1502 = vst [vmem:[%s2428_s15 + $0xe0] sm:$0xf] %v1501_v44  ;;  %v1505_v40 = vld [vmem:[%s2432_s30 + $0xe8] sm:$0xf]  ;;  %v1507_v46 = vld [vmem:[%s2432_s30 + $0xec] sm:$0xf] }
 0x176   : >> { %1504 = vst [vmem:[%s2428_s15 + $0xe4] sm:$0xf] %v1503_v45  ;;  %1506 = vst [vmem:[%s2428_s15 + $0xe8] sm:$0xf] %v1505_v40  ;;  %v1509_v47 = vld [vmem:[%s2432_s30 + $0xf0] sm:$0xf] }
 0x177   : >> { %1508 = vst [vmem:[%s2428_s15 + $0xec] sm:$0xf] %v1507_v46  ;;  %v1511_v48 = vld [vmem:[%s2432_s30 + $0xf4] sm:$0xf]  ;;  %v1513_v49 = vld [vmem:[%s2432_s30 + $0xf8] sm:$0xf] }
 0x178   : >> { %1510 = vst [vmem:[%s2428_s15 + $0xf0] sm:$0xf] %v1509_v47  ;;  %1512 = vst [vmem:[%s2428_s15 + $0xf4] sm:$0xf] %v1511_v48  ;;  %v1515_v50 = vld [vmem:[%s2432_s30 + $0xfc] sm:$0xf] }
 0x179   : >> { %1514 = vst [vmem:[%s2428_s15 + $0xf8] sm:$0xf] %v1513_v49  ;;  %1516 = vst [vmem:[%s2428_s15 + $0xfc] sm:$0xf] %v1515_v50  ;;  %s3105_s10 = smov (%p1518_p0, %s1517_s10), 0  ;;  %s1383_s9 = sadd.s32 1, %s2440_s9  }
 0x17a   : >> { %s1964_s11 = sshll.u32 %s3105_s10, 8  ;;  %p1382_p1 = scmp.ge.s32.totalorder %s1383_s9, %s2885_s23 }
 0x17b   : >> { %s1522_s30 = scalar_lea.vmem %s2627_s12, %s1964_s11 [#allocation2]   ;;  %s1523_s15 = scalar_lea.vmem %s2882_s7, %s1964_s11  }
 0x17c   : >> { %s3089_s8 = smov %s3105_s10  ;;  %1385 = sbr.rel (!%p1382_p1) target bundleno = 335 (0x14f), region = 118 }
 0x181 PF: > { %s3053_s14 = sand.u32 63, %s3103_s25   ;;  %s2038_s21 = sshll.u32 %s2885_s23, 8 }
 0x182   : > { %s1528_s22 = scalar_lea.vmem %s2627_s12, %s2038_s21 [#allocation2]   ;;  %s1530_s24 = scalar_lea.vmem %s2882_s7, %s2038_s21  }
 0x183   : > { %p1969_p2 = scmp.le.s32.totalorder %s3053_s14, 0 }
 0x184   : > { %s2442_s26 = smov (!%p1969_p2), %s1530_s24   ;;  %s2446_s28 = smov (!%p1969_p2), %s1528_s22  }
 0x185   : > { %1802 = sbr.rel (%p1969_p2) target bundleno = 402 (0x192), region = 123  ;;  %s2450_s29 = smov (!%p1969_p2), 0  }
 0x186   : > { %s2454_s4 = smov (!%p1969_p2), 0  }
 0x18a LB: >> { %v1540_v42 = vld [vmem:[%s2448_s28] sm:$0xf]  ;;  %s1542_s25 = sadd.s32 1, %s2452_s29  ;;  %s1534_s4 = sadd.s32 1, %s2456_s4   ;;  %s2456_s4 = sphi %s2454_s4, %s1534_s4   ;;  %s2452_s29 = sphi %s2450_s29, %s2451_s29   ;;  %s2448_s28 = sphi %s2446_s28, %s1547_s28   ;;  %s2444_s26 = sphi %s2442_s26, %s1548_s26  }
 0x18b   : >> { %1541 = vst [vmem:[%s2444_s26] sm:$0xf] %v1540_v42  ;;  %p1543_p3 = scmp.ge.s32.totalorder %s1542_s25, %s3053_s14  ;;  %p1533_p4 = scmp.ge.s32.totalorder %s1534_s4, %s3053_s14 }
 0x18d   : >> { %s3107_s25 = smov (%p1543_p3, %s1542_s25), 0  ;;  %1536 = sbr.rel (!%p1533_p4) target bundleno = 394 (0x18a), region = 129 }
 0x18e   : >> { %s1970_s12 = sshll.u32 %s3107_s25, 2  ;;  %s2451_s29 = smov %s3107_s25  }
 0x18f   : >> { %s1547_s28 = scalar_lea.vmem %s1528_s22, %s1970_s12 [#allocation2]   ;;  %s1548_s26 = scalar_lea.vmem %s1530_s24, %s1970_s12  }
 0x192 PF: > { %s13_s18 = sadd.s32 1, %s2424_s18   ;;  %s3090_s12 = smov %s2404_s13 }
 0x193   : > { %p10_p5 = scmp.ge.s32.totalorder %s13_s18, 6   ;;  %s3091_s13 = smov %s2533_s27 }
 0x194   : > { %s3092_s14 = smov %s2416_s16  ;;  %s3093_s15 = smov %s2420_s17 }
 0x195   : > { %s3094_s16 = smov %s3097_s19  ;;  %s3095_s17 = smov %s3101_s20 }
 0x196   :  { %12 = sbr.rel (!%p10_p5) target bundleno = 4 (0x4), region = 140 }

// kernel: encoder_cnn_forward.5
= control target key start
LH: loop header
LB: loop body
LE: loop exit
PB: predicated region body
PF: predicated region fallthrough
CT: control target
= control target key end

     0   :  { %s1690_s12 = smov 0   ;;  %s1692_s13 = smov 0   ;;  %s1988_s0 = inlined_call_operand.vmem [shape: bf16[2,196,384], index: 0, kind: input, shape index: {}]   ;;  %s1989_s1 = inlined_call_operand.vmem [shape: bf16[384,64], index: 1, kind: input, shape index: {}]   ;;  %s1990_s2 = inlined_call_operand.vmem [shape: f32[2,64], index: 2, kind: input, shape index: {}]   ;;  %s1991_s3 = inlined_call_operand.vmem [shape: bf16[2,196,64], index: 3, kind: output, shape index: {}]  }
   0x1   :  { %s1694_s14 = smov 0  }
   0x2 LB: > { %s25_s15 = sadd.s32 1, %s1662_s13  ;;  %p1238_p0 = scmp.ge.s32.totalorder %s1666_s14, 1  ;;  %s1666_s14 = sphi %s1694_s14, %s13_s14   ;;  %s1662_s13 = sphi %s1692_s13, %s1993_s13   ;;  %s1658_s12 = sphi %s1690_s12, %s1992_s12  }
   0x3   : > { %p27_p1 = scmp.ge.s32.totalorder %s25_s15, 2  ;;  %p159_p2 = scmp.lt.s32.totalorder %s1666_s14, 3 }
   0x5   : > { %s1995_s15 = smov (%p27_p1, %s25_s15), 0  ;;  %p160_p3 = pnand %p1238_p0, %p159_p2 }
   0x6   : > { %p193_p4 = scmp.lt.s32.totalorder (!%p160_p3), %s1658_s12, 1 }
   0x7   : > { %163 = sbr.rel (%p160_p3) target bundleno = 350 (0x15e), region = 32 }
   0xc   : > { %v1569_v0 = vld [vmem:[%s1989_s1 + $0x78] sm:$0xff]   ;;  %v1668_v1 = vmov 0.0   ;;  %vm1669_vm0 = vmmov 0   ;;  %v1572_v4 = vld [vmem:[%s1989_s1 + $0x70] sm:$0xff]   ;;  %v1575_v7 = vld [vmem:[%s1989_s1 + $0x68] sm:$0xff]   ;;  %s1997_s12 = smov (!%p193_p4, %s1658_s12), 1 }
   0xd   : > { %1473 = vmatprep.subr.bf16.mxu1 %v1668_v1  ;;  %v1570_v2 = vld [vmem:[%s1989_s1 + $0xb8] sm:$0xff]   ;;  %1358 = vmatprep.subr.bf16.mxu0 %v1569_v0  ;;  %v1573_v5 = vld [vmem:[%s1989_s1 + $0xb0] sm:$0xff]   ;;  %v1576_v8 = vld [vmem:[%s1989_s1 + $0xa8] sm:$0xff]   ;;  %s1541_s25 = smul.u32 300, %s1997_s12  ;;  %vm1117_vm1 = vcmask 519168   ;;  %vm1142_vm2 = vcmask 517120  }
   0xe   : > { %v1571_v3 = vld [vmem:[%s1989_s1 + $0x38] sm:$0xff]   ;;  %1489 = vmatprep.mubr.msk.bf16.mxu1 %vm1669_vm0, %v1668_v1  ;;  %1474 = vmatpush3.bf16.msra.mxu1 %v1570_v2  ;;  %v1574_v6 = vld [vmem:[%s1989_s1 + $0x30] sm:$0xff]   ;;  %v1577_v9 = vld [vmem:[%s1989_s1 + $0x28] sm:$0xff]   ;;  %s1542_s26 = smul.u32 100, %s1997_s12 }
   0xf   : > { %1359 = vmatpush3.bf16.msra.mxu0 %v1571_v3  ;;  %1475 = vmatprep.subr.bf16.mxu1 %v1668_v1  ;;  %v1578_v10 = vld [vmem:[%s1989_s1 + $0x60] sm:$0xff]   ;;  %v1581_v13 = vld [vmem:[%s1989_s1 + $0x58] sm:$0xff]   ;;  %v1584_v16 = vld [vmem:[%s1989_s1 + $0x50] sm:$0xff]   ;;  %s1786_s9 = scalar_lea.vmem %s1988_s0, %s1541_s25 }
  0x10   : > { %1360 = vmatprep.subr.bf16.mxu0 %v1572_v4  ;;  %v1579_v11 = vld [vmem:[%s1989_s1 + $0xa0] sm:$0xff]   ;;  %v1582_v14 = vld [vmem:[%s1989_s1 + $0x98] sm:$0xff]   ;;  %v1585_v17 = vld [vmem:[%s1989_s1 + $0x90] sm:$0xff]   ;;  %s1881_s29 = scalar_lea.vmem %s1991_s3, %s1542_s26 }
  0x11   : > { %v1580_v12 = vld [vmem:[%s1989_s1 + $0x20] sm:$0xff]   ;;  %v1583_v15 = vld [vmem:[%s1989_s1 + $0x18] sm:$0xff]   ;;  %v1586_v18 = vld [vmem:[%s1989_s1 + $0x10] sm:$0xff]  }
  0x12   : > { %1476 = vmatpush3.bf16.msra.mxu1 %v1573_v5  ;;  %v1587_v19 = vld [vmem:[%s1989_s1 + $0x48] sm:$0xff]   ;;  %v1590_v22 = vld [vmem:[%s1989_s1 + $0x40] sm:$0xff]   ;;  %v1604_v33 = vld [vmem:[%s1786_s9 + $0x30] ss:$12 sps:$4 sm:$0xff]  }
  0x13   : > { %1361 = vmatpush3.bf16.msra.mxu0 %v1574_v6  ;;  %1477 = vmatprep.subr.bf16.mxu1 %v1668_v1  ;;  %v1588_v20 = vld [vmem:[%s1989_s1 + $0x88] sm:$0xff]   ;;  %v1595_v23 = vld [vmem:[%s1786_s9 + $0x4] ss:$12 sps:$4 sm:$0xff]   ;;  %v1601_v31 = vld [vmem:[%s1786_s9 + $0x34] ss:$12 sps:$4 sm:$0xff]  }
  0x14   : > { %1362 = vmatprep.subr.bf16.mxu0 %v1575_v7  ;;  %v1589_v21 = vld [vmem:[%s1989_s1 + $0x8] sm:$0xff]   ;;  %v1591_v24 = vld [vmem:[%s1989_s1 + $0x80] sm:$0xff]   ;;  %691 = vmatprep.mubr.bf16.mxu0 %v1595_v23  ;;  %v1607_v35 = vld [vmem:[%s1786_s9 + $0x50] ss:$12 sps:$4 sm:$0xff]  }
  0x15   : > { %v1592_v25 = vld [vmem:[%s1989_s1] sm:$0xff]   ;;  %v1596_v26 = vld [vmem:[%s1786_s9 + $0x8] ss:$12 sps:$4 sm:$0xff]   ;;  %v1605_v34 = vld [vmem:[%s1786_s9 + $0x4c] ss:$12 sps:$4 sm:$0xff]  }
  0x16   : > { %1478 = vmatpush3.bf16.msra.mxu1 %v1576_v8  ;;  %v1593_v27 = vld [vmem:[%s1786_s9] ss:$12 sps:$4 sm:$0xff]   ;;  %v1597_v28 = vld [vmem:[%s1786_s9 + $0x1c] ss:$12 sps:$4 sm:$0xff]   ;;  %v1600_v30 = vld [vmem:[%s1786_s9 + $0x18] ss:$12 sps:$4 sm:$0xff]  }
  0x17   : > { %1363 = vmatpush3.bf16.msra.mxu0 %v1577_v9  ;;  %1479 = vmatprep.subr.bf16.mxu1 %v1668_v1  ;;  %v1599_v29 = vld [vmem:[%s1786_s9 + $0x20] ss:$12 sps:$4 sm:$0xff]   ;;  %v1603_v32 = vld [vmem:[%s1786_s9 + $0x38] ss:$12 sps:$4 sm:$0xff]   ;;  %v1608_v36 = vld [vmem:[%s1786_s9 + $0x48] ss:$12 sps:$4 sm:$0xff]  }
  0x18   : > { %1364 = vmatprep.subr.bf16.mxu0 %v1578_v10  ;;  %v1609_v37 = vld [vmem:[%s1786_s9 + $0x64] ss:$12 sps:$4 sm:$0xff]   ;;  %v1611_v38 = vld [vmem:[%s1786_s9 + $0x68] ss:$12 sps:$4 sm:$0xff]   ;;  %v1612_v39 = vld [vmem:[%s1786_s9 + $0x60] ss:$12 sps:$4 sm:$0xff]  }
  0x19   : > { %v1613_v40 = vld [vmem:[%s1786_s9 + $0x7c] ss:$12 sps:$4 sm:$0xff]   ;;  %v1615_v41 = vld [vmem:[%s1786_s9 + $0x80] ss:$12 sps:$4 sm:$0xff]   ;;  %v1616_v42 = vld [vmem:[%s1786_s9 + $0x78] ss:$12 sps:$4 sm:$0xff]  }
  0x1a   : > { %1480 = vmatpush3.bf16.msra.mxu1 %v1579_v11  ;;  %v1617_v43 = vld [vmem:[%s1786_s9 + $0x94] ss:$12 sps:$4 sm:$0xff]   ;;  %v1619_v44 = vld [vmem:[%s1786_s9 + $0x98] ss:$12 sps:$4 sm:$0xff]   ;;  %v1620_v45 = vld [vmem:[%s1786_s9 + $0x90] ss:$12 sps:$4 sm:$0xff]  }
  0x1b   : > { %1365 = vmatpush3.bf16.msra.mxu0 %v1580_v12  ;;  %1481 = vmatprep.subr.bf16.mxu1 %v1668_v1  ;;  %v1621_v46 = vld [vmem:[%s1786_s9 + $0xac] ss:$12 sps:$4 sm:$0xff]   ;;  %v1623_v47 = vld [vmem:[%s1786_s9 + $0xb0] ss:$12 sps:$4 sm:$0xff]   ;;  %v1624_v48 = vld [vmem:[%s1786_s9 + $0xa8] ss:$12 sps:$4 sm:$0xff]  }
  0x1c   : > { %1366 = vmatprep.subr.bf16.mxu0 %v1581_v13  ;;  %v1625_v49 = vld [vmem:[%s1786_s9 + $0xc4] ss:$12 sps:$4 sm:$0xff]   ;;  %v1627_v50 = vld [vmem:[%s1786_s9 + $0xc8] ss:$12 sps:$4 sm:$0xff]   ;;  %v1628_v51 = vld [vmem:[%s1786_s9 + $0xc0] ss:$12 sps:$4 sm:$0xff]  }
  0x1d   : > { %v1629_v52 = vld [vmem:[%s1786_s9 + $0xdc] ss:$12 sps:$4 sm:$0xff]   ;;  %v1631_v53 = vld [vmem:[%s1786_s9 + $0xe0] ss:$12 sps:$4 sm:$0xff]   ;;  %v1632_v54 = vld [vmem:[%s1786_s9 + $0xd8] ss:$12 sps:$4 sm:$0xff]  }
  0x1e   : > { %1482 = vmatpush3.bf16.msra.mxu1 %v1582_v14  ;;  %v1633_v55 = vld [vmem:[%s1786_s9 + $0xf4] ss:$12 sps:$4 sm:$0xff]   ;;  %v1635_v56 = vld [vmem:[%s1786_s9 + $0xf8] ss:$12 sps:$4 sm:$0xff]   ;;  %v1636_v57 = vld [vmem:[%s1786_s9 + $0xf0] ss:$12 sps:$4 sm:$0xff]  }
  0x1f   : > { %1367 = vmatpush3.bf16.msra.mxu0 %v1583_v15  ;;  %1483 = vmatprep.subr.bf16.mxu1 %v1668_v1  ;;  %v1637_v58 = vld [vmem:[%s1786_s9 + $0x10c] ss:$12 sps:$4 sm:$0xff]   ;;  %v262_v59 = vld [vmem:[%s1786_s9 + $0x120] sm:$0x33]  ;;  %v1639_v60 = vld [vmem:[%s1786_s9 + $0x110] ss:$12 sps:$4 sm:$0xff]  }
  0x20   : > { %1368 = vmatprep.subr.bf16.mxu0 %v1584_v16  ;;  %v1640_v61 = vld [vmem:[%s1786_s9 + $0x108] ss:$12 sps:$4 sm:$0xff]   ;;  %v1278_v62 = vcombine.high %v262_v59, %v262_v59  ;;  %v1277_v0 = vcombine.low %v262_v59, %v262_v59  ;;  %v1867_v8 = vld [vmem:[%s1990_s2] ss:$0 sm:$0xff]  ;;  %v1872_v11 = vld [vmem:[%s1990_s2 + $0x1] ss:$0 sm:$0xff] }
  0x21   : > { %v1642_v63 = vld [vmem:[%s1786_s9 + $0x128] ss:$0 sps:$4 sm:$0x33]  }
  0x22   : > { %1484 = vmatpush3.bf16.msra.mxu1 %v1585_v17 }
  0x23   : > { %1369 = vmatpush3.bf16.msra.mxu0 %v1586_v18  ;;  %1485 = vmatprep.subr.bf16.mxu1 %v1668_v1 }
  0x24   : > { %1370 = vmatprep.subr.bf16.mxu0 %v1587_v19 }
  0x26   : > { %1486 = vmatpush3.bf16.msra.mxu1 %v1588_v20 }
  0x27   : > { %1371 = vmatpush3.bf16.msra.mxu0 %v1589_v21  ;;  %1487 = vmatprep.subr.bf16.mxu1 %v1668_v1 }
  0x28   : > { %1372 = vmatprep.subr.bf16.mxu0 %v1590_v22 }
  0x2a   : > { %1488 = vmatpush3.bf16.msra.mxu1 %v1591_v24 }
  0x2b   : > { %1373 = vmatpush3.bf16.msra.mxu0 %v1592_v25 }
  0x2d   : > { %1490 = vmatmul.mubr.bf16.vlgmr.msra.gmra.mxu1 %v1596_v26 }
  0x2e   : > { %692 = vmatmul.mubr.bf16.vlgmr.msra.gmra.mxu0 %v1593_v27  ;;  %1493 = vmatprep.mubr.msk.bf16.mxu1 %vm1669_vm0, %v1668_v1 }
  0x2f   : > { %699 = vmatprep.mubr.bf16.mxu0 %v1597_v28 }
  0x35   : > { %1494 = vmatmul.mubr.bf16.gmra.mxu1 %v1599_v29 }
  0x36   : > { %700 = vmatmul.mubr.bf16.gmra.mxu0 %v1600_v30  ;;  %1497 = vmatprep.mubr.msk.bf16.mxu1 %vm1669_vm0, %v1668_v1 }
  0x37   : > { %707 = vmatprep.mubr.bf16.mxu0 %v1601_v31 }
  0x3d   : > { %1498 = vmatmul.mubr.bf16.gmra.mxu1 %v1603_v32 }
  0x3e   : > { %708 = vmatmul.mubr.bf16.gmra.mxu0 %v1604_v33  ;;  %1501 = vmatprep.mubr.msk.bf16.mxu1 %vm1669_vm0, %v1668_v1 }
  0x3f   : > { %715 = vmatprep.mubr.bf16.mxu0 %v1605_v34 }
  0x45   : > { %1502 = vmatmul.mubr.bf16.gmra.mxu1 %v1607_v35 }
  0x46   : > { %716 = vmatmul.mubr.bf16.gmra.mxu0 %v1608_v36  ;;  %1505 = vmatprep.mubr.msk.bf16.mxu1 %vm1669_vm0, %v1668_v1 }
  0x47   : > { %723 = vmatprep.mubr.bf16.mxu0 %v1609_v37 }
  0x4d   : > { %1506 = vmatmul.mubr.bf16.gmra.mxu1 %v1611_v38 }
  0x4e   : > { %724 = vmatmul.mubr.bf16.gmra.mxu0 %v1612_v39  ;;  %1509 = vmatprep.mubr.msk.bf16.mxu1 %vm1669_vm0, %v1668_v1 }
  0x4f   : > { %731 = vmatprep.mubr.bf16.mxu0 %v1613_v40 }
  0x55   : > { %1510 = vmatmul.mubr.bf16.gmra.mxu1 %v1615_v41 }
  0x56   : > { %732 = vmatmul.mubr.bf16.gmra.mxu0 %v1616_v42  ;;  %1513 = vmatprep.mubr.msk.bf16.mxu1 %vm1669_vm0, %v1668_v1 }
  0x57   : > { %739 = vmatprep.mubr.bf16.mxu0 %v1617_v43 }
  0x5d   : > { %1514 = vmatmul.mubr.bf16.gmra.mxu1 %v1619_v44 }
  0x5e   : > { %740 = vmatmul.mubr.bf16.gmra.mxu0 %v1620_v45  ;;  %1517 = vmatprep.mubr.msk.bf16.mxu1 %vm1669_vm0, %v1668_v1 }
  0x5f   : > { %747 = vmatprep.mubr.bf16.mxu0 %v1621_v46 }
  0x65   : > { %1518 = vmatmul.mubr.bf16.gmra.mxu1 %v1623_v47 }
  0x66   : > { %748 = vmatmul.mubr.bf16.gmra.mxu0 %v1624_v48  ;;  %1521 = vmatprep.mubr.msk.bf16.mxu1 %vm1669_vm0, %v1668_v1 }
  0x67   : > { %755 = vmatprep.mubr.bf16.mxu0 %v1625_v49 }
  0x6d   : > { %1522 = vmatmul.mubr.bf16.gmra.mxu1 %v1627_v50 }
  0x6e   : > { %756 = vmatmul.mubr.bf16.gmra.mxu0 %v1628_v51  ;;  %1525 = vmatprep.mubr.msk.bf16.mxu1 %vm1669_vm0, %v1668_v1 }
  0x6f   : > { %763 = vmatprep.mubr.bf16.mxu0 %v1629_v52 }
  0x75   : > { %1526 = vmatmul.mubr.bf16.gmra.mxu1 %v1631_v53 }
  0x76   : > { %764 = vmatmul.mubr.bf16.gmra.mxu0 %v1632_v54  ;;  %1529 = vmatprep.mubr.msk.bf16.mxu1 %vm1669_vm0, %v1668_v1 }
  0x77   : > { %771 = vmatprep.mubr.bf16.mxu0 %v1633_v55 }
  0x7d   : > { %1530 = vmatmul.mubr.bf16.gmra.mxu1 %v1635_v56 }
  0x7e   : > { %772 = vmatmul.mubr.bf16.gmra.mxu0 %v1636_v57  ;;  %1533 = vmatprep.mubr.msk.bf16.mxu1 %vm1669_vm0, %v1668_v1 }
  0x7f   : > { %779 = vmatprep.mubr.bf16.mxu0 %v1637_v58 }
  0x85   : > { %1534 = vmatmul.mubr.bf16.gmra.mxu1 %v1639_v60 }
  0x86   : > { %780 = vmatmul.mubr.bf16.gmra.mxu0 %v1640_v61  ;;  %1537 = vmatprep.mubr.msk.bf16.mxu1 %vm1669_vm0, %v1668_v1 }
  0x87   : > { %787 = vmatprep.mubr.bf16.mxu0 %v1278_v62 }
  0x8d   : > { %1538 = vmatmul.mubr.bf16.gmra.mxu1 %v1642_v63 }
  0x8e   : > { %788 = vmatmul.mubr.bf16.gmra.mxu0 %v1277_v0 }
  0xed   : > { %v829_v2 = vpop.f32.mrf.mxu1 }
  0xee   : > { %v1374_v3 = vpop.f32.mrf.mxu0 }
  0xef   : > { %v1491_v4 = vpop.f32.mrf.mxu1 }
  0xf0   : > { %v1375_v5 = vpop.f32.mrf.mxu0 }
  0xf1   : > { %v1376_v6 = vadd.f32 %v1375_v5, %v1374_v3  ;;  %v832_v7 = vpop.f32.mrf.mxu1 }
  0xf2   : > { %v1377_v9 = vpop.f32.mrf.mxu0 }
  0xf3   : > { %v830_v10 = vadd.f32 %v1376_v6, %v829_v2  ;;  %v1492_v1 = vpop.f32.mrf.mxu1 }
  0xf4   : > { %v1378_v12 = vpop.f32.mrf.mxu0 }
  0xf5   : > { %v936_v13 = vmul.f32 %v1867_v8, %v830_v10  ;;  %v1379_v14 = vadd.f32 %v1378_v12, %v1377_v9  ;;  %v837_v15 = vpop.f32.mrf.mxu1 }
  0xf6   : > { %v1380_v16 = vpop.f32.mrf.mxu0 }
  0xf7   : > { %v966_v17 = vadd.f32 %v1872_v11, %v936_v13  ;;  %v833_v18 = vadd.f32 %v1379_v14, %v832_v7  ;;  %v1495_v19 = vpop.f32.mrf.mxu1 }
  0xf8   : > { %v1381_v20 = vpop.f32.mrf.mxu0 }
  0xf9   : > { %v991_v21 = vmax.f32 %v966_v17, 0.0  ;;  %v937_v22 = vmul.f32 %v1867_v8, %v833_v18  ;;  %v1382_v23 = vadd.f32 %v1381_v20, %v1380_v16  ;;  %v840_v24 = vpop.f32.mrf.mxu1 }
  0xfa   : > { %v1383_v25 = vpop.f32.mrf.mxu0 }
  0xfb   : > { %v1333_v26 = vpack.c.bf16 %v991_v21, %v991_v21  ;;  %v967_v27 = vadd.f32 %v1872_v11, %v937_v22  ;;  %v838_v28 = vadd.f32 %v1382_v23, %v837_v15  ;;  %v1496_v29 = vpop.f32.mrf.mxu1 }
  0xfc   : > { %v1384_v30 = vpop.f32.mrf.mxu0 }
  0xfd   : > { %1118 = vst.msk [vmem:[%s1881_s29] sm:$0xf] %vm1117_vm1, %v1333_v26  ;;  %v992_v31 = vmax.f32 %v967_v27, 0.0  ;;  %v938_v32 = vmul.f32 %v1867_v8, %v838_v28  ;;  %v1385_v33 = vadd.f32 %v1384_v30, %v1383_v25  ;;  %v845_v34 = vpop.f32.mrf.mxu1 }
  0xfe   : > { %v1386_v35 = vpop.f32.mrf.mxu0 }
  0xff   : > { %v1334_v36 = vpack.c.bf16 %v992_v31, %v992_v31  ;;  %v968_v37 = vadd.f32 %v1872_v11, %v938_v32  ;;  %v841_v38 = vadd.f32 %v1385_v33, %v840_v24  ;;  %v1499_v39 = vpop.f32.mrf.mxu1 }
 0x100   : > { %v1387_v40 = vpop.f32.mrf.mxu0 }
 0x101   : > { %1119 = vst.msk [vmem:[%s1881_s29 + $0x4] sm:$0xf] %vm1117_vm1, %v1334_v36  ;;  %v993_v41 = vmax.f32 %v968_v37, 0.0  ;;  %v939_v42 = vmul.f32 %v1867_v8, %v841_v38  ;;  %v1388_v43 = vadd.f32 %v1387_v40, %v1386_v35  ;;  %v848_v44 = vpop.f32.mrf.mxu1 }
 0x102   : > { %v1389_v45 = vpop.f32.mrf.mxu0 }
 0x103   : > { %v1335_v46 = vpack.c.bf16 %v993_v41, %v993_v41  ;;  %v969_v47 = vadd.f32 %v1872_v11, %v939_v42  ;;  %v846_v48 = vadd.f32 %v1388_v43, %v845_v34  ;;  %v1500_v49 = vpop.f32.mrf.mxu1 }
 0x104   : > { %v1390_v50 = vpop.f32.mrf.mxu0 }
 0x105   : > { %1120 = vst.msk [vmem:[%s1881_s29 + $0x8] sm:$0xf] %vm1117_vm1, %v1335_v46  ;;  %v994_v51 = vmax.f32 %v969_v47, 0.0  ;;  %v940_v52 = vmul.f32 %v1867_v8, %v846_v48  ;;  %v1391_v53 = vadd.f32 %v1390_v50, %v1389_v45  ;;  %v853_v54 = vpop.f32.mrf.mxu1 }
 0x106   : > { %v1392_v55 = vpop.f32.mrf.mxu0 }
 0x107   : > { %v1336_v56 = vpack.c.bf16 %v994_v51, %v994_v51  ;;  %v970_v57 = vadd.f32 %v1872_v11, %v940_v52  ;;  %v849_v58 = vadd.f32 %v1391_v53, %v848_v44  ;;  %v1503_v59 = vpop.f32.mrf.mxu1 }
 0x108   : > { %v1393_v60 = vpop.f32.mrf.mxu0 }
 0x109   : > { %1121 = vst.msk [vmem:[%s1881_s29 + $0xc] sm:$0xf] %vm1117_vm1, %v1336_v56  ;;  %v995_v61 = vmax.f32 %v970_v57, 0.0  ;;  %v941_v62 = vmul.f32 %v1867_v8, %v849_v58  ;;  %v1394_v63 = vadd.f32 %v1393_v60, %v1392_v55  ;;  %v856_v0 = vpop.f32.mrf.mxu1 }
 0x10a   : > { %v1395_v2 = vpop.f32.mrf.mxu0 }
 0x10b   : > { %v1337_v3 = vpack.c.bf16 %v995_v61, %v995_v61  ;;  %v971_v4 = vadd.f32 %v1872_v11, %v941_v62  ;;  %v854_v5 = vadd.f32 %v1394_v63, %v853_v54  ;;  %v1504_v6 = vpop.f32.mrf.mxu1 }
 0x10c   : > { %v1396_v7 = vpop.f32.mrf.mxu0 }
 0x10d   : > { %1122 = vst.msk [vmem:[%s1881_s29 + $0x10] sm:$0xf] %vm1117_vm1, %v1337_v3  ;;  %v996_v9 = vmax.f32 %v971_v4, 0.0  ;;  %v942_v10 = vmul.f32 %v1867_v8, %v854_v5  ;;  %v1397_v1 = vadd.f32 %v1396_v7, %v1395_v2  ;;  %v861_v12 = vpop.f32.mrf.mxu1 }
 0x10e   : > { %v1398_v13 = vpop.f32.mrf.mxu0 }
 0x10f   : > { %v1338_v14 = vpack.c.bf16 %v996_v9, %v996_v9  ;;  %v972_v15 = vadd.f32 %v1872_v11, %v942_v10  ;;  %v857_v16 = vadd.f32 %v1397_v1, %v856_v0  ;;  %v1507_v17 = vpop.f32.mrf.mxu1 }
 0x110   : > { %v1399_v18 = vpop.f32.mrf.mxu0 }
 0x111   : > { %1123 = vst.msk [vmem:[%s1881_s29 + $0x14] sm:$0xf] %vm1117_vm1, %v1338_v14  ;;  %v997_v19 = vmax.f32 %v972_v15, 0.0  ;;  %v943_v20 = vmul.f32 %v1867_v8, %v857_v16  ;;  %v1400_v21 = vadd.f32 %v1399_v18, %v1398_v13  ;;  %v864_v22 = vpop.f32.mrf.mxu1 }
 0x112   : > { %v1401_v23 = vpop.f32.mrf.mxu0 }
 0x113   : > { %v1339_v24 = vpack.c.bf16 %v997_v19, %v997_v19  ;;  %v973_v25 = vadd.f32 %v1872_v11, %v943_v20  ;;  %v862_v26 = vadd.f32 %v1400_v21, %v861_v12  ;;  %v1508_v27 = vpop.f32.mrf.mxu1 }
 0x114   : > { %v1402_v28 = vpop.f32.mrf.mxu0 }
 0x115   : > { %1124 = vst.msk [vmem:[%s1881_s29 + $0x18] sm:$0xf] %vm1117_vm1, %v1339_v24  ;;  %v998_v29 = vmax.f32 %v973_v25, 0.0  ;;  %v944_v30 = vmul.f32 %v1867_v8, %v862_v26  ;;  %v1403_v31 = vadd.f32 %v1402_v28, %v1401_v23  ;;  %v869_v32 = vpop.f32.mrf.mxu1 }
 0x116   : > { %v1404_v33 = vpop.f32.mrf.mxu0 }
 0x117   : > { %v1340_v34 = vpack.c.bf16 %v998_v29, %v998_v29  ;;  %v974_v35 = vadd.f32 %v1872_v11, %v944_v30  ;;  %v865_v36 = vadd.f32 %v1403_v31, %v864_v22  ;;  %v1511_v37 = vpop.f32.mrf.mxu1 }
 0x118   : > { %v1405_v38 = vpop.f32.mrf.mxu0 }
 0x119   : > { %1125 = vst.msk [vmem:[%s1881_s29 + $0x1c] sm:$0xf] %vm1117_vm1, %v1340_v34  ;;  %v999_v39 = vmax.f32 %v974_v35, 0.0  ;;  %v945_v40 = vmul.f32 %v1867_v8, %v865_v36  ;;  %v1406_v41 = vadd.f32 %v1405_v38, %v1404_v33  ;;  %v872_v42 = vpop.f32.mrf.mxu1 }
 0x11a   : > { %v1407_v43 = vpop.f32.mrf.mxu0 }
 0x11b   : > { %v1341_v44 = vpack.c.bf16 %v999_v39, %v999_v39  ;;  %v975_v45 = vadd.f32 %v1872_v11, %v945_v40  ;;  %v870_v46 = vadd.f32 %v1406_v41, %v869_v32  ;;  %v1512_v47 = vpop.f32.mrf.mxu1 }
 0x11c   : > { %v1408_v48 = vpop.f32.mrf.mxu0 }
 0x11d   : > { %1126 = vst.msk [vmem:[%s1881_s29 + $0x20] sm:$0xf] %vm1117_vm1, %v1341_v44  ;;  %v1000_v49 = vmax.f32 %v975_v45, 0.0  ;;  %v946_v50 = vmul.f32 %v1867_v8, %v870_v46  ;;  %v1409_v51 = vadd.f32 %v1408_v48, %v1407_v43  ;;  %v877_v52 = vpop.f32.mrf.mxu1 }
 0x11e   : > { %v1410_v53 = vpop.f32.mrf.mxu0 }
 0x11f   : > { %v1342_v54 = vpack.c.bf16 %v1000_v49, %v1000_v49  ;;  %v976_v55 = vadd.f32 %v1872_v11, %v946_v50  ;;  %v873_v56 = vadd.f32 %v1409_v51, %v872_v42  ;;  %v1515_v57 = vpop.f32.mrf.mxu1 }
 0x120   : > { %v1411_v58 = vpop.f32.mrf.mxu0 }
 0x121   : > { %1127 = vst.msk [vmem:[%s1881_s29 + $0x24] sm:$0xf] %vm1117_vm1, %v1342_v54  ;;  %v1001_v59 = vmax.f32 %v976_v55, 0.0  ;;  %v947_v60 = vmul.f32 %v1867_v8, %v873_v56  ;;  %v1412_v61 = vadd.f32 %v1411_v58, %v1410_v53  ;;  %v880_v62 = vpop.f32.mrf.mxu1 }
 0x122   : > { %v1413_v63 = vpop.f32.mrf.mxu0 }
 0x123   : > { %v1343_v0 = vpack.c.bf16 %v1001_v59, %v1001_v59  ;;  %v977_v2 = vadd.f32 %v1872_v11, %v947_v60  ;;  %v878_v3 = vadd.f32 %v1412_v61, %v877_v52  ;;  %v1516_v4 = vpop.f32.mrf.mxu1 }
 0x124   : > { %v1414_v5 = vpop.f32.mrf.mxu0 }
 0x125   : > { %1128 = vst.msk [vmem:[%s1881_s29 + $0x28] sm:$0xf] %vm1117_vm1, %v1343_v0  ;;  %v1002_v6 = vmax.f32 %v977_v2, 0.0  ;;  %v948_v7 = vmul.f32 %v1867_v8, %v878_v3  ;;  %v1415_v9 = vadd.f32 %v1414_v5, %v1413_v63  ;;  %v885_v10 = vpop.f32.mrf.mxu1 }
 0x126   : > { %v1416_v1 = vpop.f32.mrf.mxu0 }
 0x127   : > { %v1344_v12 = vpack.c.bf16 %v1002_v6, %v1002_v6  ;;  %v978_v13 = vadd.f32 %v1872_v11, %v948_v7  ;;  %v881_v14 = vadd.f32 %v1415_v9, %v880_v62  ;;  %v1519_v15 = vpop.f32.mrf.mxu1 }
 0x128   : > { %v1417_v16 = vpop.f32.mrf.mxu0 }
 0x129   : > { %1129 = vst.msk [vmem:[%s1881_s29 + $0x2c] sm:$0xf] %vm1117_vm1, %v1344_v12  ;;  %v1003_v17 = vmax.f32 %v978_v13, 0.0  ;;  %v949_v18 = vmul.f32 %v1867_v8, %v881_v14  ;;  %v1418_v19 = vadd.f32 %v1417_v16, %v1416_v1  ;;  %v888_v20 = vpop.f32.mrf.mxu1 }
 0x12a   : > { %v1419_v21 = vpop.f32.mrf.mxu0 }
 0x12b   : > { %v1345_v22 = vpack.c.bf16 %v1003_v17, %v1003_v17  ;;  %v979_v23 = vadd.f32 %v1872_v11, %v949_v18  ;;  %v886_v24 = vadd.f32 %v1418_v19, %v885_v10  ;;  %v1520_v25 = vpop.f32.mrf.mxu1 }
 0x12c   : > { %v1420_v26 = vpop.f32.mrf.mxu0 }
 0x12d   : > { %1130 = vst.msk [vmem:[%s1881_s29 + $0x30] sm:$0xf] %vm1117_vm1, %v1345_v22  ;;  %v1004_v27 = vmax.f32 %v979_v23, 0.0  ;;  %v950_v28 = vmul.f32 %v1867_v8, %v886_v24  ;;  %v1421_v29 = vadd.f32 %v1420_v26, %v1419_v21  ;;  %v893_v30 = vpop.f32.mrf.mxu1 }
 0x12e   : > { %v1422_v31 = vpop.f32.mrf.mxu0 }
 0x12f   : > { %v1346_v32 = vpack.c.bf16 %v1004_v27, %v1004_v27  ;;  %v980_v33 = vadd.f32 %v1872_v11, %v950_v28  ;;  %v889_v34 = vadd.f32 %v1421_v29, %v888_v20  ;;  %v1523_v35 = vpop.f32.mrf.mxu1 }
 0x130   : > { %v1423_v36 = vpop.f32.mrf.mxu0 }
 0x131   : > { %1131 = vst.msk [vmem:[%s1881_s29 + $0x34] sm:$0xf] %vm1117_vm1, %v1346_v32  ;;  %v1005_v37 = vmax.f32 %v980_v33, 0.0  ;;  %v951_v38 = vmul.f32 %v1867_v8, %v889_v34  ;;  %v1424_v39 = vadd.f32 %v1423_v36, %v1422_v31  ;;  %v896_v40 = vpop.f32.mrf.mxu1 }
 0x132   : > { %v1425_v41 = vpop.f32.mrf.mxu0 }
 0x133   : > { %v1347_v42 = vpack.c.bf16 %v1005_v37, %v1005_v37  ;;  %v981_v43 = vadd.f32 %v1872_v11, %v951_v38  ;;  %v894_v44 = vadd.f32 %v1424_v39, %v893_v30  ;;  %v1524_v45 = vpop.f32.mrf.mxu1 }
 0x134   : > { %v1426_v46 = vpop.f32.mrf.mxu0 }
 0x135   : > { %1132 = vst.msk [vmem:[%s1881_s29 + $0x38] sm:$0xf] %vm1117_vm1, %v1347_v42  ;;  %v1006_v47 = vmax.f32 %v981_v43, 0.0  ;;  %v952_v48 = vmul.f32 %v1867_v8, %v894_v44  ;;  %v1427_v49 = vadd.f32 %v1426_v46, %v1425_v41  ;;  %v901_v50 = vpop.f32.mrf.mxu1 }
 0x136   : > { %v1428_v51 = vpop.f32.mrf.mxu0 }
 0x137   : > { %v1348_v52 = vpack.c.bf16 %v1006_v47, %v1006_v47  ;;  %v982_v53 = vadd.f32 %v1872_v11, %v952_v48  ;;  %v897_v54 = vadd.f32 %v1427_v49, %v896_v40  ;;  %v1527_v55 = vpop.f32.mrf.mxu1 }
 0x138   : > { %v1429_v56 = vpop.f32.mrf.mxu0 }
 0x139   : > { %1133 = vst.msk [vmem:[%s1881_s29 + $0x3c] sm:$0xf] %vm1117_vm1, %v1348_v52  ;;  %v1007_v57 = vmax.f32 %v982_v53, 0.0  ;;  %v953_v58 = vmul.f32 %v1867_v8, %v897_v54  ;;  %v1430_v59 = vadd.f32 %v1429_v56, %v1428_v51  ;;  %v904_v60 = vpop.f32.mrf.mxu1 }
 0x13a   : > { %v1431_v61 = vpop.f32.mrf.mxu0 }
 0x13b   : > { %v1349_v62 = vpack.c.bf16 %v1007_v57, %v1007_v57  ;;  %v983_v63 = vadd.f32 %v1872_v11, %v953_v58  ;;  %v902_v0 = vadd.f32 %v1430_v59, %v901_v50  ;;  %v1528_v2 = vpop.f32.mrf.mxu1 }
 0x13c   : > { %v1432_v3 = vpop.f32.mrf.mxu0 }
 0x13d   : > { %1134 = vst.msk [vmem:[%s1881_s29 + $0x40] sm:$0xf] %vm1117_vm1, %v1349_v62  ;;  %v1008_v4 = vmax.f32 %v983_v63, 0.0  ;;  %v954_v5 = vmul.f32 %v1867_v8, %v902_v0  ;;  %v1433_v6 = vadd.f32 %v1432_v3, %v1431_v61  ;;  %v909_v7 = vpop.f32.mrf.mxu1 }
 0x13e   : > { %v1434_v9 = vpop.f32.mrf.mxu0 }
 0x13f   : > { %v1350_v10 = vpack.c.bf16 %v1008_v4, %v1008_v4  ;;  %v984_v1 = vadd.f32 %v1872_v11, %v954_v5  ;;  %v905_v12 = vadd.f32 %v1433_v6, %v904_v60  ;;  %v1531_v13 = vpop.f32.mrf.mxu1 }
 0x140   : > { %v1435_v14 = vpop.f32.mrf.mxu0 }
 0x141   : > { %1135 = vst.msk [vmem:[%s1881_s29 + $0x44] sm:$0xf] %vm1117_vm1, %v1350_v10  ;;  %v1009_v15 = vmax.f32 %v984_v1, 0.0  ;;  %v955_v16 = vmul.f32 %v1867_v8, %v905_v12  ;;  %v1436_v17 = vadd.f32 %v1435_v14, %v1434_v9  ;;  %v912_v18 = vpop.f32.mrf.mxu1 }
 0x142   : > { %v1437_v19 = vpop.f32.mrf.mxu0 }
 0x143   : > { %v1351_v20 = vpack.c.bf16 %v1009_v15, %v1009_v15  ;;  %v985_v21 = vadd.f32 %v1872_v11, %v955_v16  ;;  %v910_v22 = vadd.f32 %v1436_v17, %v909_v7  ;;  %v1532_v23 = vpop.f32.mrf.mxu1 }
 0x144   : > { %v1438_v24 = vpop.f32.mrf.mxu0 }
 0x145   : > { %1136 = vst.msk [vmem:[%s1881_s29 + $0x48] sm:$0xf] %vm1117_vm1, %v1351_v20  ;;  %v1010_v25 = vmax.f32 %v985_v21, 0.0  ;;  %v956_v26 = vmul.f32 %v1867_v8, %v910_v22  ;;  %v1439_v27 = vadd.f32 %v1438_v24, %v1437_v19  ;;  %v917_v28 = vpop.f32.mrf.mxu1 }
 0x146   : > { %v1440_v29 = vpop.f32.mrf.mxu0 }
 0x147   : > { %v1352_v30 = vpack.c.bf16 %v1010_v25, %v1010_v25  ;;  %v986_v31 = vadd.f32 %v1872_v11, %v956_v26  ;;  %v913_v32 = vadd.f32 %v1439_v27, %v912_v18  ;;  %v1535_v33 = vpop.f32.mrf.mxu1 }
 0x148   : > { %v1441_v34 = vpop.f32.mrf.mxu0 }
 0x149   : > { %1137 = vst.msk [vmem:[%s1881_s29 + $0x4c] sm:$0xf] %vm1117_vm1, %v1352_v30  ;;  %v1011_v35 = vmax.f32 %v986_v31, 0.0  ;;  %v957_v36 = vmul.f32 %v1867_v8, %v913_v32  ;;  %v1442_v37 = vadd.f32 %v1441_v34, %v1440_v29  ;;  %v920_v38 = vpop.f32.mrf.mxu1 }
 0x14a   : > { %v1443_v39 = vpop.f32.mrf.mxu0 }
 0x14b   : > { %v1353_v40 = vpack.c.bf16 %v1011_v35, %v1011_v35  ;;  %v987_v41 = vadd.f32 %v1872_v11, %v957_v36  ;;  %v918_v42 = vadd.f32 %v1442_v37, %v917_v28  ;;  %v1536_v43 = vpop.f32.mrf.mxu1 }
 0x14c   : > { %v1444_v44 = vpop.f32.mrf.mxu0 }
 0x14d   : > { %1138 = vst.msk [vmem:[%s1881_s29 + $0x50] sm:$0xf] %vm1117_vm1, %v1353_v40  ;;  %v1012_v45 = vmax.f32 %v987_v41, 0.0  ;;  %v958_v46 = vmul.f32 %v1867_v8, %v918_v42  ;;  %v1445_v47 = vadd.f32 %v1444_v44, %v1443_v39  ;;  %v925_v48 = vpop.f32.mrf.mxu1 }
 0x14e   : > { %v1446_v49 = vpop.f32.mrf.mxu0 }
 0x14f   : > { %v1354_v50 = vpack.c.bf16 %v1012_v45, %v1012_v45  ;;  %v988_v51 = vadd.f32 %v1872_v11, %v958_v46  ;;  %v921_v52 = vadd.f32 %v1445_v47, %v920_v38  ;;  %v1539_v53 = vpop.f32.mrf.mxu1 }
 0x150   : > { %v1447_v54 = vpop.f32.mrf.mxu0 }
 0x151   : > { %1139 = vst.msk [vmem:[%s1881_s29 + $0x54] sm:$0xf] %vm1117_vm1, %v1354_v50  ;;  %v1013_v55 = vmax.f32 %v988_v51, 0.0  ;;  %v959_v56 = vmul.f32 %v1867_v8, %v921_v52  ;;  %v1448_v57 = vadd.f32 %v1447_v54, %v1446_v49  ;;  %v928_v58 = vpop.f32.mrf.mxu1 }
 0x152   : > { %v1449_v59 = vpop.f32.mrf.mxu0 }
 0x153   : > { %v1355_v60 = vpack.c.bf16 %v1013_v55, %v1013_v55  ;;  %v989_v61 = vadd.f32 %v1872_v11, %v959_v56  ;;  %v926_v62 = vadd.f32 %v1448_v57, %v925_v48  ;;  %v1540_v63 = vpop.f32.mrf.mxu1 }
 0x154   : > { %v1450_v0 = vpop.f32.mrf.mxu0 }
 0x155   : > { %1140 = vst.msk [vmem:[%s1881_s29 + $0x58] sm:$0xf] %vm1117_vm1, %v1355_v60  ;;  %v1014_v2 = vmax.f32 %v989_v61, 0.0  ;;  %v960_v3 = vmul.f32 %v1867_v8, %v926_v62 }
 0x157   : > { %v1356_v4 = vpack.c.bf16 %v1014_v2, %v1014_v2  ;;  %v990_v5 = vadd.f32 %v1872_v11, %v960_v3 }
 0x159   : > { %1141 = vst.msk [vmem:[%s1881_s29 + $0x5c] sm:$0xf] %vm1117_vm1, %v1356_v4  ;;  %v1015_v6 = vmax.f32 %v990_v5, 0.0 }
 0x15b   : > { %v1357_v7 = vpack.c.bf16 %v1015_v6, %v1015_v6 }
 0x15d   : > { %1143 = vst.msk [vmem:[%s1881_s29 + $0x60] sm:$0x3] %vm1142_vm2, %v1357_v7 }
 0x15e PF: > { %s13_s14 = sadd.s32 1, %s1666_s14   ;;  %s1992_s12 = smov %s1662_s13 }
 0x15f   : > { %p10_p5 = scmp.ge.s32.totalorder %s13_s14, 4   ;;  %s1993_s13 = smov %s1995_s15 }
 0x161   :  { %12 = sbr.rel (!%p10_p5) target bundleno = 2 (0x2), region = 62 }

// kernel: encoder_cnn_forward.6
= control target key start
LH: loop header
LB: loop body
LE: loop exit
PB: predicated region body
PF: predicated region fallthrough
CT: control target
= control target key end

     0   :  { %s1271_s12 = smov 0   ;;  %s1273_s13 = smov 0   ;;  %s1475_s0 = inlined_call_operand.vmem [shape: bf16[2,36,640], index: 0, kind: input, shape index: {}]   ;;  %s1476_s1 = inlined_call_operand.vmem [shape: bf16[640,128], index: 1, kind: input, shape index: {}]   ;;  %s1477_s2 = inlined_call_operand.vmem [shape: f32[2,128], index: 2, kind: input, shape index: {}]   ;;  %s1478_s3 = inlined_call_operand.vmem [shape: bf16[2,36,128], index: 3, kind: output, shape index: {}]  }
   0x1   :  { %s1275_s14 = smov 0  }
   0x2 LB: > { %s25_s15 = sadd.s32 1, %s1243_s13  ;;  %p932_p0 = scmp.ge.s32.totalorder %s1247_s14, 1  ;;  %s1247_s14 = sphi %s1275_s14, %s13_s14   ;;  %s1243_s13 = sphi %s1273_s13, %s1480_s13   ;;  %s1239_s12 = sphi %s1271_s12, %s1479_s12  }
   0x3   : > { %p27_p1 = scmp.ge.s32.totalorder %s25_s15, 2  ;;  %p159_p2 = scmp.lt.s32.totalorder %s1247_s14, 3 }
   0x5   : > { %s1482_s15 = smov (%p27_p1, %s25_s15), 0  ;;  %p160_p3 = pnand %p932_p0, %p159_p2 }
   0x6   : > { %p193_p4 = scmp.lt.s32.totalorder (!%p160_p3), %s1239_s12, 1 }
   0x7   : > { %163 = sbr.rel (%p160_p3) target bundleno = 291 (0x123), region = 32 }
   0xc   : > { %v1166_v0 = vld [vmem:[%s1476_s1 + $0x78] sm:$0xff]   ;;  %v1170_v4 = vld [vmem:[%s1476_s1 + $0x70] sm:$0xff]   ;;  %v1174_v8 = vld [vmem:[%s1476_s1 + $0x68] sm:$0xff]   ;;  %s1484_s12 = smov (!%p193_p4, %s1239_s12), 1  ;;  %v1249_v34 = vmov 0.0   ;;  %vm1250_vm0 = vmmov 0  }
   0xd   : > { %v1167_v1 = vld [vmem:[%s1476_s1 + $0xf8] sm:$0xff]   ;;  %1015 = vmatprep.subr.bf16.mxu0 %v1166_v0  ;;  %v1171_v5 = vld [vmem:[%s1476_s1 + $0xf0] sm:$0xff]   ;;  %v1175_v9 = vld [vmem:[%s1476_s1 + $0xe8] sm:$0xff]   ;;  %s1138_s22 = smul.u32 100, %s1484_s12 }
   0xe   : > { %v1168_v2 = vld [vmem:[%s1476_s1 + $0x38] sm:$0xff]   ;;  %1049 = vmatprep.subr.bf16.mxu1 %v1167_v1  ;;  %v1172_v6 = vld [vmem:[%s1476_s1 + $0x30] sm:$0xff]   ;;  %v1176_v10 = vld [vmem:[%s1476_s1 + $0x28] sm:$0xff]   ;;  %s1139_s8 = smul.u32 20, %s1484_s12 }
   0xf   : > { %v1169_v3 = vld [vmem:[%s1476_s1 + $0xb8] sm:$0xff]   ;;  %1016 = vmatpush3.bf16.msra.mxu0 %v1168_v2  ;;  %v1173_v7 = vld [vmem:[%s1476_s1 + $0xb0] sm:$0xff]   ;;  %v1177_v11 = vld [vmem:[%s1476_s1 + $0xa8] sm:$0xff]   ;;  %s1389_s6 = scalar_lea.vmem %s1475_s0, %s1138_s22 }
  0x10   : > { %1050 = vmatpush3.bf16.msra.mxu1 %v1169_v3  ;;  %1017 = vmatprep.subr.bf16.mxu0 %v1170_v4  ;;  %v1178_v12 = vld [vmem:[%s1476_s1 + $0x60] sm:$0xff]   ;;  %v1182_v16 = vld [vmem:[%s1476_s1 + $0x58] sm:$0xff]   ;;  %v1186_v20 = vld [vmem:[%s1476_s1 + $0x50] sm:$0xff]   ;;  %s211_s11 = scalar_lea.vmem %s1478_s3, %s1139_s8 }
  0x11   : > { %1051 = vmatprep.subr.bf16.mxu1 %v1171_v5  ;;  %v1179_v13 = vld [vmem:[%s1476_s1 + $0xe0] sm:$0xff]   ;;  %v1183_v17 = vld [vmem:[%s1476_s1 + $0xd8] sm:$0xff]   ;;  %v1187_v21 = vld [vmem:[%s1476_s1 + $0xd0] sm:$0xff]  }
  0x12   : > { %v1180_v14 = vld [vmem:[%s1476_s1 + $0x20] sm:$0xff]   ;;  %v1184_v18 = vld [vmem:[%s1476_s1 + $0x18] sm:$0xff]   ;;  %v1188_v22 = vld [vmem:[%s1476_s1 + $0x10] sm:$0xff]  }
  0x13   : > { %1018 = vmatpush3.bf16.msra.mxu0 %v1172_v6  ;;  %v1181_v15 = vld [vmem:[%s1476_s1 + $0xa0] sm:$0xff]   ;;  %v1185_v19 = vld [vmem:[%s1476_s1 + $0x98] sm:$0xff]   ;;  %v1189_v23 = vld [vmem:[%s1476_s1 + $0x90] sm:$0xff]  }
  0x14   : > { %1052 = vmatpush3.bf16.msra.mxu1 %v1173_v7  ;;  %1019 = vmatprep.subr.bf16.mxu0 %v1174_v8  ;;  %v1190_v24 = vld [vmem:[%s1476_s1 + $0x48] sm:$0xff]   ;;  %v1194_v28 = vld [vmem:[%s1476_s1 + $0x40] sm:$0xff]   ;;  %v1204_v37 = vld [vmem:[%s1476_s1 + $0x138] sm:$0xff]  }
  0x15   : > { %1053 = vmatprep.subr.bf16.mxu1 %v1175_v9  ;;  %v1191_v25 = vld [vmem:[%s1476_s1 + $0xc8] sm:$0xff]   ;;  %v1195_v29 = vld [vmem:[%s1476_s1 + $0xc0] sm:$0xff]   ;;  %v1205_v38 = vld [vmem:[%s1476_s1 + $0x130] sm:$0xff]  }
  0x16   : > { %v1192_v26 = vld [vmem:[%s1476_s1 + $0x8] sm:$0xff]   ;;  %v1196_v30 = vld [vmem:[%s1476_s1] sm:$0xff]   ;;  %v227_v44 = vld [vmem:[%s1389_s6 + $0x58] sm:$0x33] }
  0x17   : > { %1020 = vmatpush3.bf16.msra.mxu0 %v1176_v10  ;;  %v1193_v27 = vld [vmem:[%s1476_s1 + $0x88] sm:$0xff]   ;;  %v1197_v31 = vld [vmem:[%s1476_s1 + $0x80] sm:$0xff]   ;;  %v226_v45 = vld [vmem:[%s1389_s6 + $0x50] sm:$0x33]  ;;  %v948_v46 = vcombine.high %v227_v44, %v227_v44  ;;  %v947_v51 = vcombine.low %v227_v44, %v227_v44 }
  0x18   : > { %1054 = vmatpush3.bf16.msra.mxu1 %v1177_v11  ;;  %1021 = vmatprep.subr.bf16.mxu0 %v1178_v12  ;;  %v1198_v32 = vld [vmem:[%s1389_s6] ss:$20 sps:$4 sm:$0xff]   ;;  %v1200_v33 = vld [vmem:[%s1389_s6 + $0x4] ss:$20 sps:$4 sm:$0xff]   ;;  %v1201_v35 = vld [vmem:[%s1389_s6 + $0x8] ss:$20 sps:$4 sm:$0xff]   ;;  %v946_v47 = vcombine.high %v226_v45, %v226_v45  ;;  %v945_v49 = vcombine.low %v226_v45, %v226_v45 }
  0x19   : > { %1055 = vmatprep.subr.bf16.mxu1 %v1179_v13  ;;  %v1203_v36 = vld [vmem:[%s1389_s6 + $0xc] ss:$20 sps:$4 sm:$0xff]   ;;  %651 = vmatprep.mubr.bf16.mxu0 %v1200_v33  ;;  %v1208_v40 = vld [vmem:[%s1389_s6 + $0x34] ss:$20 sps:$4 sm:$0xff]   ;;  %v1212_v43 = vld [vmem:[%s1389_s6 + $0x30] ss:$20 sps:$4 sm:$0xff]  }
  0x1a   : > { %707 = vmatprep.mubr.bf16.mxu1 %v1203_v36  ;;  %v1206_v39 = vld [vmem:[%s1389_s6 + $0x2c] ss:$20 sps:$4 sm:$0xff]   ;;  %v1211_v42 = vld [vmem:[%s1389_s6 + $0x28] ss:$20 sps:$4 sm:$0xff]   ;;  %v1218_v52 = vld [vmem:[%s1476_s1 + $0x110] sm:$0xff]  }
  0x1b   : > { %1022 = vmatpush3.bf16.msra.mxu0 %v1180_v14  ;;  %v1210_v41 = vld [vmem:[%s1476_s1 + $0x128] sm:$0xff]   ;;  %v1213_v48 = vld [vmem:[%s1476_s1 + $0x120] sm:$0xff]   ;;  %v1215_v50 = vld [vmem:[%s1476_s1 + $0x118] sm:$0xff]  }
  0x1c   : > { %1056 = vmatpush3.bf16.msra.mxu1 %v1181_v15  ;;  %1023 = vmatprep.subr.bf16.mxu0 %v1182_v16  ;;  %v1220_v53 = vld [vmem:[%s1476_s1 + $0x108] sm:$0xff]   ;;  %v1221_v54 = vld [vmem:[%s1476_s1 + $0x100] sm:$0xff]  }
  0x1d   : > { %1057 = vmatprep.subr.bf16.mxu1 %v1183_v17  ;;  %v1222_v55 = vld [vmem:[%s1389_s6 + $0x10] ss:$20 sps:$4 sm:$0xff]   ;;  %v1223_v56 = vld [vmem:[%s1389_s6 + $0x38] ss:$20 sps:$4 sm:$0xff]  }
  0x1e   : > { %v1224_v57 = vld [vmem:[%s1389_s6 + $0x60] ss:$0 sps:$4 sm:$0x33]  }
  0x1f   : > { %1024 = vmatpush3.bf16.msra.mxu0 %v1184_v18 }
  0x20   : > { %1058 = vmatpush3.bf16.msra.mxu1 %v1185_v19  ;;  %1025 = vmatprep.subr.bf16.mxu0 %v1186_v20 }
  0x21   : > { %1059 = vmatprep.subr.bf16.mxu1 %v1187_v21 }
  0x23   : > { %1026 = vmatpush3.bf16.msra.mxu0 %v1188_v22 }
  0x24   : > { %1060 = vmatpush3.bf16.msra.mxu1 %v1189_v23  ;;  %1027 = vmatprep.subr.bf16.mxu0 %v1190_v24 }
  0x25   : > { %1061 = vmatprep.subr.bf16.mxu1 %v1191_v25 }
  0x27   : > { %1028 = vmatpush3.bf16.msra.mxu0 %v1192_v26 }
  0x28   : > { %1062 = vmatpush3.bf16.msra.mxu1 %v1193_v27  ;;  %1029 = vmatprep.subr.bf16.mxu0 %v1194_v28  ;;  %v990_v28 = vld [vmem:[%s1477_s2] ss:$0 sm:$0xff] }
  0x29   : > { %1063 = vmatprep.subr.bf16.mxu1 %v1195_v29 }
  0x2b   : > { %1030 = vmatpush3.bf16.msra.mxu0 %v1196_v30 }
  0x2c   : > { %1064 = vmatpush3.bf16.msra.mxu1 %v1197_v31  ;;  %1094 = vmatprep.subr.bf16.mxu0 %v1249_v34 }
  0x2d   : > { %1122 = vmatprep.subr.bf16.mxu1 %v1249_v34 }
  0x2e   : > { %652 = vmatmul.mubr.bf16.vlgmr.msra.gmra.mxu0 %v1198_v32 }
  0x2f   : > { %708 = vmatmul.mubr.bf16.vlgmr.msra.gmra.mxu1 %v1201_v35  ;;  %1095 = vmatpush3.bf16.msra.mxu0 %v1204_v37 }
  0x30   : > { %1130 = vmatpush3.bf16.msra.mxu1 %v1204_v37  ;;  %1096 = vmatprep.subr.bf16.mxu0 %v1249_v34 }
  0x31   : > { %1123 = vmatprep.subr.bf16.mxu1 %v1249_v34  ;;  %659 = vmatprep.mubr.bf16.mxu0 %v1206_v39  ;;  %v991_v39 = vld [vmem:[%s1477_s2 + $0x1] ss:$0 sm:$0xff] }
  0x32   : > { %715 = vmatprep.mubr.bf16.mxu1 %v1208_v40 }
  0x33   : > { %1097 = vmatpush3.bf16.msra.mxu0 %v1205_v38 }
  0x34   : > { %1131 = vmatpush3.bf16.msra.mxu1 %v1205_v38  ;;  %1098 = vmatprep.subr.bf16.mxu0 %v1249_v34 }
  0x35   : > { %1124 = vmatprep.subr.bf16.mxu1 %v1249_v34 }
  0x36   : > { %660 = vmatmul.mubr.bf16.gmra.mxu0 %v1211_v42 }
  0x37   : > { %1099 = vmatpush3.bf16.msra.mxu0 %v1210_v41  ;;  %716 = vmatmul.mubr.bf16.gmra.mxu1 %v1212_v43 }
  0x38   : > { %1132 = vmatpush3.bf16.msra.mxu1 %v1210_v41  ;;  %1100 = vmatprep.subr.bf16.mxu0 %v1249_v34 }
  0x39   : > { %1125 = vmatprep.subr.bf16.mxu1 %v1249_v34  ;;  %723 = vmatprep.mubr.bf16.mxu1 %v948_v46 }
  0x3a   : > { %667 = vmatprep.mubr.bf16.mxu0 %v946_v47 }
  0x3b   : > { %1101 = vmatpush3.bf16.msra.mxu0 %v1213_v48 }
  0x3c   : > { %1133 = vmatpush3.bf16.msra.mxu1 %v1213_v48  ;;  %1102 = vmatprep.subr.bf16.mxu0 %v1249_v34 }
  0x3d   : > { %1126 = vmatprep.subr.bf16.mxu1 %v1249_v34 }
  0x3e   : > { %668 = vmatmul.mubr.bf16.gmra.mxu0 %v945_v49 }
  0x3f   : > { %1103 = vmatpush3.bf16.msra.mxu0 %v1215_v50  ;;  %724 = vmatmul.mubr.bf16.gmra.mxu1 %v947_v51 }
  0x40   : > { %1134 = vmatpush3.bf16.msra.mxu1 %v1215_v50  ;;  %1104 = vmatprep.subr.bf16.mxu0 %v1249_v34 }
  0x41   : > { %1127 = vmatprep.subr.bf16.mxu1 %v1249_v34  ;;  %1110 = vmatprep.mubr.msk.bf16.mxu0 %vm1250_vm0, %v1249_v34 }
  0x42   : > { %1114 = vmatprep.mubr.msk.bf16.mxu1 %vm1250_vm0, %v1249_v34 }
  0x43   : > { %1105 = vmatpush3.bf16.msra.mxu0 %v1218_v52 }
  0x44   : > { %1135 = vmatpush3.bf16.msra.mxu1 %v1218_v52  ;;  %1106 = vmatprep.subr.bf16.mxu0 %v1249_v34 }
  0x45   : > { %1128 = vmatprep.subr.bf16.mxu1 %v1249_v34 }
  0x47   : > { %1107 = vmatpush3.bf16.msra.mxu0 %v1220_v53 }
  0x48   : > { %1136 = vmatpush3.bf16.msra.mxu1 %v1220_v53  ;;  %1108 = vmatprep.subr.bf16.mxu0 %v1249_v34 }
  0x49   : > { %1129 = vmatprep.subr.bf16.mxu1 %v1249_v34 }
  0x4b   : > { %1109 = vmatpush3.bf16.msra.mxu0 %v1221_v54 }
  0x4c   : > { %1137 = vmatpush3.bf16.msra.mxu1 %v1221_v54 }
  0x4e   : > { %1111 = vmatmul.mubr.bf16.vlgmr.msra.gmra.mxu0 %v1222_v55 }
  0x4f   : > { %1115 = vmatmul.mubr.bf16.vlgmr.msra.gmra.mxu1 %v1223_v56 }
  0x50   : > { %1118 = vmatprep.mubr.msk.bf16.mxu1 %vm1250_vm0, %v1249_v34 }
  0x57   : > { %1119 = vmatmul.mubr.bf16.gmra.mxu1 %v1224_v57 }
  0xee   : > { %v1031_v58 = vpop.f32.mrf.mxu0 }
  0xef   : > { %v1065_v59 = vpop.f32.mrf.mxu1 }
  0xf0   : > { %v1032_v60 = vpop.f32.mrf.mxu0 }
  0xf1   : > { %v1066_v61 = vpop.f32.mrf.mxu1  ;;  %v1033_v18 = vadd.f32 %v1032_v60, %v1031_v58 }
  0xf2   : > { %v1034_v62 = vpop.f32.mrf.mxu0  ;;  %v1067_v19 = vadd.f32 %v1066_v61, %v1065_v59 }
  0xf3   : > { %v1068_v63 = vpop.f32.mrf.mxu1 }
  0xf4   : > { %v1035_v0 = vpop.f32.mrf.mxu0  ;;  %v710_v24 = vadd.f32 %v1067_v19, %v1033_v18 }
  0xf5   : > { %v1069_v1 = vpop.f32.mrf.mxu1  ;;  %v1036_v22 = vadd.f32 %v1035_v0, %v1034_v62 }
  0xf6   : > { %v1037_v2 = vpop.f32.mrf.mxu0  ;;  %v1070_v23 = vadd.f32 %v1069_v1, %v1068_v63 }
  0xf7   : > { %v1071_v3 = vpop.f32.mrf.mxu1 }
  0xf8   : > { %v1038_v4 = vpop.f32.mrf.mxu0  ;;  %v713_v36 = vadd.f32 %v1070_v23, %v1036_v22 }
  0xf9   : > { %v1072_v5 = vpop.f32.mrf.mxu1  ;;  %v1039_v20 = vadd.f32 %v1038_v4, %v1037_v2 }
  0xfa   : > { %v1040_v6 = vpop.f32.mrf.mxu0  ;;  %v1073_v21 = vadd.f32 %v1072_v5, %v1071_v3 }
  0xfb   : > { %v1074_v7 = vpop.f32.mrf.mxu1 }
  0xfc   : > { %v1041_v8 = vpop.f32.mrf.mxu0  ;;  %v718_v29 = vadd.f32 %v1073_v21, %v1039_v20 }
  0xfd   : > { %v1075_v9 = vpop.f32.mrf.mxu1  ;;  %v1042_v25 = vadd.f32 %v1041_v8, %v1040_v6 }
  0xfe   : > { %v1043_v10 = vpop.f32.mrf.mxu0  ;;  %v1076_v26 = vadd.f32 %v1075_v9, %v1074_v7 }
  0xff   : > { %v1077_v11 = vpop.f32.mrf.mxu1 }
 0x100   : > { %v1044_v12 = vpop.f32.mrf.mxu0  ;;  %v721_v42 = vadd.f32 %v1076_v26, %v1042_v25 }
 0x101   : > { %v1078_v13 = vpop.f32.mrf.mxu1  ;;  %v1045_v38 = vadd.f32 %v1044_v12, %v1043_v10 }
 0x102   : > { %v1046_v14 = vpop.f32.mrf.mxu0  ;;  %v1079_v37 = vadd.f32 %v1078_v13, %v1077_v11 }
 0x103   : > { %v1080_v15 = vpop.f32.mrf.mxu1 }
 0x104   : > { %v1047_v16 = vpop.f32.mrf.mxu0  ;;  %v726_v52 = vadd.f32 %v1079_v37, %v1045_v38 }
 0x105   : > { %v1081_v17 = vpop.f32.mrf.mxu1 }
 0x10e   : > { %v765_v27 = vpop.f32.mrf.mxu0 }
 0x10f   : > { %v766_v30 = vadd.f32 %v765_v27, %v710_v24  ;;  %v773_v31 = vpop.f32.mrf.mxu1 }
 0x110   : > { %v774_v32 = vadd.f32 %v773_v31, %v718_v29  ;;  %v1112_v33 = vpop.f32.mrf.mxu0 }
 0x111   : > { %v792_v34 = vmul.f32 %v990_v28, %v766_v30  ;;  %v1116_v35 = vpop.f32.mrf.mxu1 }
 0x112   : > { %v794_v40 = vmul.f32 %v990_v28, %v774_v32  ;;  %v768_v41 = vpop.f32.mrf.mxu0 }
 0x113   : > { %v769_v43 = vadd.f32 %v768_v41, %v713_v36  ;;  %v776_v44 = vpop.f32.mrf.mxu1  ;;  %v802_v47 = vadd.f32 %v991_v39, %v792_v34 }
 0x114   : > { %v777_v45 = vadd.f32 %v776_v44, %v721_v42  ;;  %v1113_v46 = vpop.f32.mrf.mxu0  ;;  %v804_v50 = vadd.f32 %v991_v39, %v794_v40 }
 0x115   : > { %v793_v48 = vmul.f32 %v990_v28, %v769_v43  ;;  %v1117_v49 = vpop.f32.mrf.mxu1  ;;  %v807_v57 = vmax.f32 %v802_v47, 0.0 }
 0x116   : > { %v795_v51 = vmul.f32 %v990_v28, %v777_v45  ;;  %v809_v60 = vmax.f32 %v804_v50, 0.0 }
 0x117   : > { %v803_v53 = vadd.f32 %v991_v39, %v793_v48  ;;  %v781_v54 = vpop.f32.mrf.mxu1 }
 0x118   : > { %v805_v55 = vadd.f32 %v991_v39, %v795_v51  ;;  %v782_v56 = vadd.f32 %v781_v54, %v726_v52 }
 0x119   : > { %v808_v58 = vmax.f32 %v803_v53, 0.0  ;;  %v1120_v59 = vpop.f32.mrf.mxu1 }
 0x11a   : > { %v810_v61 = vmax.f32 %v805_v55, 0.0  ;;  %v796_v62 = vmul.f32 %v990_v28, %v782_v56 }
 0x11b   : > { %v1007_v63 = vpack.c.bf16 %v808_v58, %v807_v57  ;;  %v784_v0 = vpop.f32.mrf.mxu1 }
 0x11c   : > { %v1012_v1 = vpack.c.bf16 %v810_v61, %v809_v60  ;;  %v806_v2 = vadd.f32 %v991_v39, %v796_v62 }
 0x11d   : > { %1008 = vst [vmem:[%s211_s11] sm:$0xff] %v1007_v63   ;;  %v1121_v3 = vpop.f32.mrf.mxu1 }
 0x11e   : > { %1014 = vst [vmem:[%s211_s11 + $0x8] sm:$0xff] %v1012_v1   ;;  %v811_v4 = vmax.f32 %v806_v2, 0.0 }
 0x120   : > { %v1003_v5 = vpack.c.bf16 %v811_v4, %v811_v4 }
 0x122   : > { %837 = vst [vmem:[%s211_s11 + $0x10] sm:$0x3] %v1003_v5 }
 0x123 PF: > { %s13_s14 = sadd.s32 1, %s1247_s14   ;;  %s1479_s12 = smov %s1243_s13 }
 0x124   : > { %p10_p5 = scmp.ge.s32.totalorder %s13_s14, 4   ;;  %s1480_s13 = smov %s1482_s15 }
 0x126   :  { %12 = sbr.rel (!%p10_p5) target bundleno = 2 (0x2), region = 62 }

// kernel: encoder_cnn_forward.7
= control target key start
LH: loop header
LB: loop body
LE: loop exit
PB: predicated region body
PF: predicated region fallthrough
CT: control target
= control target key end

     0   :  { %s3719_s0 = inlined_call_operand.vmem [shape: bf16[8,1152], index: 0, kind: input, shape index: {}]   ;;  %s3720_s1 = inlined_call_operand.vmem [shape: bf16[1152,256], index: 1, kind: input, shape index: {}]   ;;  %s3721_s2 = inlined_call_operand.vmem [shape: f32[2,256], index: 2, kind: input, shape index: {}]   ;;  %s3722_s3 = inlined_call_operand.vmem [shape: bf16[4,256,128], index: 3, kind: input, shape index: {}]   ;;  %s3723_s4 = inlined_call_operand.vmem [shape: f32[1,128], index: 4, kind: input, shape index: {}]   ;;  %s3724_s5 = inlined_call_operand.vmem [shape: bf16[128,128], index: 5, kind: input, shape index: {}]   ;;  %s3725_s6 = inlined_call_operand.vmem [shape: f32[1,128], index: 6, kind: input, shape index: {}]   ;;  %s3726_s7 = inlined_call_operand.vmem [shape: bf16[128,64], index: 7, kind: input, shape index: {}]   ;;  %s3727_s8 = inlined_call_operand.vmem [shape: f32[1,64], index: 8, kind: input, shape index: {}]   ;;  %s3728_s9 = inlined_call_operand.hbm [shape: f32[2,64], index: 9, kind: output, shape index: {}]  }
   0x1   :  { %v2597_v0 = vld [vmem:[%s3720_s1 + $0x74] ss:$8 sps:$4 sm:$0xff]   ;;  %v2601_v2 = vld [vmem:[%s3720_s1 + $0x70] ss:$8 sps:$4 sm:$0xff]   ;;  %v2603_v4 = vld [vmem:[%s3720_s1 + $0x64] ss:$8 sps:$4 sm:$0xff]  }
   0x2   :  { %v2599_v1 = vld [vmem:[%s3720_s1 + $0x174] ss:$8 sps:$4 sm:$0xff]   ;;  %935 = vmatprep.subr.bf16.mxu0 %v2597_v0  ;;  %v2602_v3 = vld [vmem:[%s3720_s1 + $0x170] ss:$8 sps:$4 sm:$0xff]   ;;  %v2605_v5 = vld [vmem:[%s3720_s1 + $0x164] ss:$8 sps:$4 sm:$0xff]  }
   0x3   :  { %976 = vmatprep.subr.bf16.mxu1 %v2599_v1  ;;  %936 = vmatpush1.bf16.msra.mxu0 %v2601_v2  ;;  %v2607_v6 = vld [vmem:[%s3720_s1 + $0x60] ss:$8 sps:$4 sm:$0xff]   ;;  %v2609_v8 = vld [vmem:[%s3720_s1 + $0x54] ss:$8 sps:$4 sm:$0xff]   ;;  %v2613_v10 = vld [vmem:[%s3720_s1 + $0x50] ss:$8 sps:$4 sm:$0xff]  }
   0x4   :  { %977 = vmatpush1.bf16.msra.mxu1 %v2602_v3  ;;  %937 = vmatprep.subr.bf16.mxu0 %v2603_v4  ;;  %v2608_v7 = vld [vmem:[%s3720_s1 + $0x160] ss:$8 sps:$4 sm:$0xff]   ;;  %v2611_v9 = vld [vmem:[%s3720_s1 + $0x154] ss:$8 sps:$4 sm:$0xff]   ;;  %v2614_v11 = vld [vmem:[%s3720_s1 + $0x150] ss:$8 sps:$4 sm:$0xff]  }
   0x5   :  { %978 = vmatprep.subr.bf16.mxu1 %v2605_v5  ;;  %v2615_v12 = vld [vmem:[%s3720_s1 + $0x44] ss:$8 sps:$4 sm:$0xff]   ;;  %v2619_v14 = vld [vmem:[%s3720_s1 + $0x40] ss:$8 sps:$4 sm:$0xff]   ;;  %v2621_v16 = vld [vmem:[%s3720_s1 + $0x34] ss:$8 sps:$4 sm:$0xff]  }
   0x6   :  { %v2617_v13 = vld [vmem:[%s3720_s1 + $0x144] ss:$8 sps:$4 sm:$0xff]   ;;  %v2620_v15 = vld [vmem:[%s3720_s1 + $0x140] ss:$8 sps:$4 sm:$0xff]   ;;  %v2623_v17 = vld [vmem:[%s3720_s1 + $0x134] ss:$8 sps:$4 sm:$0xff]  }
   0x7   :  { %938 = vmatpush1.bf16.msra.mxu0 %v2607_v6  ;;  %v2625_v18 = vld [vmem:[%s3720_s1 + $0x30] ss:$8 sps:$4 sm:$0xff]   ;;  %v2627_v20 = vld [vmem:[%s3720_s1 + $0x24] ss:$8 sps:$4 sm:$0xff]   ;;  %v2631_v22 = vld [vmem:[%s3720_s1 + $0x20] ss:$8 sps:$4 sm:$0xff]  }
   0x8   :  { %979 = vmatpush1.bf16.msra.mxu1 %v2608_v7  ;;  %939 = vmatprep.subr.bf16.mxu0 %v2609_v8  ;;  %v2626_v19 = vld [vmem:[%s3720_s1 + $0x130] ss:$8 sps:$4 sm:$0xff]   ;;  %v2629_v21 = vld [vmem:[%s3720_s1 + $0x124] ss:$8 sps:$4 sm:$0xff]   ;;  %v2632_v23 = vld [vmem:[%s3720_s1 + $0x120] ss:$8 sps:$4 sm:$0xff]  }
   0x9   :  { %980 = vmatprep.subr.bf16.mxu1 %v2611_v9  ;;  %v2633_v24 = vld [vmem:[%s3720_s1 + $0x14] ss:$8 sps:$4 sm:$0xff]   ;;  %v2637_v26 = vld [vmem:[%s3720_s1 + $0x10] ss:$8 sps:$4 sm:$0xff]   ;;  %v2639_v28 = vld [vmem:[%s3720_s1 + $0x4] ss:$8 sps:$4 sm:$0xff]  }
   0xa   :  { %v2635_v25 = vld [vmem:[%s3720_s1 + $0x114] ss:$8 sps:$4 sm:$0xff]   ;;  %v2638_v27 = vld [vmem:[%s3720_s1 + $0x110] ss:$8 sps:$4 sm:$0xff]   ;;  %v2641_v29 = vld [vmem:[%s3720_s1 + $0x104] ss:$8 sps:$4 sm:$0xff]  }
   0xb   :  { %940 = vmatpush1.bf16.msra.mxu0 %v2613_v10  ;;  %v2643_v30 = vld [vmem:[%s3720_s1] ss:$8 sps:$4 sm:$0xff]   ;;  %v2645_v32 = vld [vmem:[%s3720_s1 + $0xf4] ss:$8 sps:$4 sm:$0xff]   ;;  %v2649_v34 = vld [vmem:[%s3720_s1 + $0xf0] ss:$8 sps:$4 sm:$0xff]  }
   0xc   :  { %981 = vmatpush1.bf16.msra.mxu1 %v2614_v11  ;;  %941 = vmatprep.subr.bf16.mxu0 %v2615_v12  ;;  %v2644_v31 = vld [vmem:[%s3720_s1 + $0x100] ss:$8 sps:$4 sm:$0xff]   ;;  %v2647_v33 = vld [vmem:[%s3720_s1 + $0x1f4] ss:$8 sps:$4 sm:$0xff]   ;;  %v2650_v35 = vld [vmem:[%s3720_s1 + $0x1f0] ss:$8 sps:$4 sm:$0xff]  }
   0xd   :  { %982 = vmatprep.subr.bf16.mxu1 %v2617_v13  ;;  %v2651_v36 = vld [vmem:[%s3720_s1 + $0xe4] ss:$8 sps:$4 sm:$0xff]   ;;  %v2655_v38 = vld [vmem:[%s3720_s1 + $0xe0] ss:$8 sps:$4 sm:$0xff]   ;;  %v2657_v40 = vld [vmem:[%s3720_s1 + $0xd4] ss:$8 sps:$4 sm:$0xff]  }
   0xe   :  { %v2653_v37 = vld [vmem:[%s3720_s1 + $0x1e4] ss:$8 sps:$4 sm:$0xff]   ;;  %v2656_v39 = vld [vmem:[%s3720_s1 + $0x1e0] ss:$8 sps:$4 sm:$0xff]   ;;  %v2659_v41 = vld [vmem:[%s3720_s1 + $0x1d4] ss:$8 sps:$4 sm:$0xff]  }
   0xf   :  { %942 = vmatpush1.bf16.msra.mxu0 %v2619_v14  ;;  %v2661_v42 = vld [vmem:[%s3720_s1 + $0xd0] ss:$8 sps:$4 sm:$0xff]   ;;  %v2663_v44 = vld [vmem:[%s3720_s1 + $0xc4] ss:$8 sps:$4 sm:$0xff]   ;;  %v2667_v49 = vld [vmem:[%s3720_s1 + $0xc0] ss:$8 sps:$4 sm:$0xff]  }
  0x10   :  { %983 = vmatpush1.bf16.msra.mxu1 %v2620_v15  ;;  %943 = vmatprep.subr.bf16.mxu0 %v2621_v16  ;;  %v2662_v43 = vld [vmem:[%s3720_s1 + $0x1d0] ss:$8 sps:$4 sm:$0xff]   ;;  %v2665_v45 = vld [vmem:[%s3720_s1 + $0x1c4] ss:$8 sps:$4 sm:$0xff]   ;;  %v2668_v50 = vld [vmem:[%s3720_s1 + $0x1c0] ss:$8 sps:$4 sm:$0xff]  }
  0x11   :  { %984 = vmatprep.subr.bf16.mxu1 %v2623_v17  ;;  %v34_v46 = vld [vmem:[%s3719_s0] sm:$0xff]  ;;  %v35_v48 = vld [vmem:[%s3719_s0 + $0x8] sm:$0xff]  ;;  %v2669_v52 = vld [vmem:[%s3720_s1 + $0xb4] ss:$8 sps:$4 sm:$0xff]  }
  0x12   :  { %v2115_v47 = vcombine.high %v34_v46, %v34_v46  ;;  %v2117_v51 = vcombine.high %v35_v48, %v35_v48  ;;  %v2671_v53 = vld [vmem:[%s3720_s1 + $0x1b4] ss:$8 sps:$4 sm:$0xff]   ;;  %v2673_v54 = vld [vmem:[%s3720_s1 + $0xb0] ss:$8 sps:$4 sm:$0xff]   ;;  %v2675_v56 = vld [vmem:[%s3720_s1 + $0xa4] ss:$8 sps:$4 sm:$0xff]   ;;  %v2114_v6 = vcombine.low %v34_v46, %v34_v46  ;;  %v2116_v7 = vcombine.low %v35_v48, %v35_v48 }
  0x13   :  { %944 = vmatpush1.bf16.msra.mxu0 %v2625_v18  ;;  %v2674_v55 = vld [vmem:[%s3720_s1 + $0x1b0] ss:$8 sps:$4 sm:$0xff]   ;;  %v2677_v57 = vld [vmem:[%s3720_s1 + $0x1a4] ss:$8 sps:$4 sm:$0xff]   ;;  %v2679_v58 = vld [vmem:[%s3720_s1 + $0xa0] ss:$8 sps:$4 sm:$0xff]  }
  0x14   :  { %985 = vmatpush1.bf16.msra.mxu1 %v2626_v19  ;;  %945 = vmatprep.subr.bf16.mxu0 %v2627_v20  ;;  %v2680_v59 = vld [vmem:[%s3720_s1 + $0x1a0] ss:$8 sps:$4 sm:$0xff]   ;;  %v2681_v60 = vld [vmem:[%s3720_s1 + $0x94] ss:$8 sps:$4 sm:$0xff]   ;;  %v2685_v62 = vld [vmem:[%s3720_s1 + $0x90] ss:$8 sps:$4 sm:$0xff]  }
  0x15   :  { %986 = vmatprep.subr.bf16.mxu1 %v2629_v21  ;;  %967 = vmatprep.mubr.bf16.mxu0 %v2115_v47  ;;  %v2683_v61 = vld [vmem:[%s3720_s1 + $0x194] ss:$8 sps:$4 sm:$0xff]   ;;  %v2686_v63 = vld [vmem:[%s3720_s1 + $0x190] ss:$8 sps:$4 sm:$0xff]   ;;  %v2687_v0 = vld [vmem:[%s3720_s1 + $0x84] ss:$8 sps:$4 sm:$0xff]  }
  0x16   :  { %1008 = vmatprep.mubr.bf16.mxu1 %v2117_v51  ;;  %v2689_v1 = vld [vmem:[%s3720_s1 + $0x184] ss:$8 sps:$4 sm:$0xff]   ;;  %v2691_v2 = vld [vmem:[%s3720_s1 + $0x80] ss:$8 sps:$4 sm:$0xff]   ;;  %v2699_v4 = vld [vmem:[%s3720_s1 + $0x274] ss:$8 sps:$4 sm:$0xff]  }
  0x17   :  { %946 = vmatpush1.bf16.msra.mxu0 %v2631_v22  ;;  %v2692_v3 = vld [vmem:[%s3720_s1 + $0x180] ss:$8 sps:$4 sm:$0xff]   ;;  %v2702_v5 = vld [vmem:[%s3720_s1 + $0x374] ss:$8 sps:$4 sm:$0xff]   ;;  %v2697_v8 = vld [vmem:[%s3720_s1 + $0x270] ss:$8 sps:$4 sm:$0xff]  }
  0x18   :  { %987 = vmatpush1.bf16.msra.mxu1 %v2632_v23  ;;  %947 = vmatprep.subr.bf16.mxu0 %v2633_v24  ;;  %v2700_v9 = vld [vmem:[%s3720_s1 + $0x370] ss:$8 sps:$4 sm:$0xff]   ;;  %v2705_v10 = vld [vmem:[%s3720_s1 + $0x264] ss:$8 sps:$4 sm:$0xff]   ;;  %v2703_v12 = vld [vmem:[%s3720_s1 + $0x260] ss:$8 sps:$4 sm:$0xff]  }
  0x19   :  { %988 = vmatprep.subr.bf16.mxu1 %v2635_v25  ;;  %v2708_v11 = vld [vmem:[%s3720_s1 + $0x364] ss:$8 sps:$4 sm:$0xff]   ;;  %v2706_v13 = vld [vmem:[%s3720_s1 + $0x360] ss:$8 sps:$4 sm:$0xff]   ;;  %v2711_v14 = vld [vmem:[%s3720_s1 + $0x254] ss:$8 sps:$4 sm:$0xff]  }
  0x1a   :  { %v2714_v15 = vld [vmem:[%s3720_s1 + $0x354] ss:$8 sps:$4 sm:$0xff]   ;;  %v2709_v16 = vld [vmem:[%s3720_s1 + $0x250] ss:$8 sps:$4 sm:$0xff]   ;;  %v2717_v18 = vld [vmem:[%s3720_s1 + $0x244] ss:$8 sps:$4 sm:$0xff]  }
  0x1b   :  { %948 = vmatpush1.bf16.msra.mxu0 %v2637_v26  ;;  %v2712_v17 = vld [vmem:[%s3720_s1 + $0x350] ss:$8 sps:$4 sm:$0xff]   ;;  %v2720_v19 = vld [vmem:[%s3720_s1 + $0x344] ss:$8 sps:$4 sm:$0xff]   ;;  %v2715_v20 = vld [vmem:[%s3720_s1 + $0x240] ss:$8 sps:$4 sm:$0xff]  }
  0x1c   :  { %989 = vmatpush1.bf16.msra.mxu1 %v2638_v27  ;;  %949 = vmatprep.subr.bf16.mxu0 %v2639_v28  ;;  %v2718_v21 = vld [vmem:[%s3720_s1 + $0x340] ss:$8 sps:$4 sm:$0xff]   ;;  %v2723_v22 = vld [vmem:[%s3720_s1 + $0x234] ss:$8 sps:$4 sm:$0xff]   ;;  %v2721_v24 = vld [vmem:[%s3720_s1 + $0x230] ss:$8 sps:$4 sm:$0xff]  }
  0x1d   :  { %990 = vmatprep.subr.bf16.mxu1 %v2641_v29  ;;  %v2726_v23 = vld [vmem:[%s3720_s1 + $0x334] ss:$8 sps:$4 sm:$0xff]   ;;  %v2724_v25 = vld [vmem:[%s3720_s1 + $0x330] ss:$8 sps:$4 sm:$0xff]   ;;  %v2729_v26 = vld [vmem:[%s3720_s1 + $0x224] ss:$8 sps:$4 sm:$0xff]  }
  0x1e   :  { %v2732_v27 = vld [vmem:[%s3720_s1 + $0x324] ss:$8 sps:$4 sm:$0xff]   ;;  %v2727_v28 = vld [vmem:[%s3720_s1 + $0x220] ss:$8 sps:$4 sm:$0xff]   ;;  %v2762_v51 = vld [vmem:[%s3720_s1 + $0x3d4] ss:$8 sps:$4 sm:$0xff]  }
  0x1f   :  { %950 = vmatpush1.bf16.msra.mxu0 %v2643_v30  ;;  %v2730_v29 = vld [vmem:[%s3720_s1 + $0x320] ss:$8 sps:$4 sm:$0xff]   ;;  %v2735_v30 = vld [vmem:[%s3720_s1 + $0x214] ss:$8 sps:$4 sm:$0xff]   ;;  %v2753_v46 = vld [vmem:[%s3720_s1 + $0x2e4] ss:$8 sps:$4 sm:$0xff]  }
  0x20   :  { %991 = vmatpush1.bf16.msra.mxu1 %v2644_v31  ;;  %951 = vmatprep.subr.bf16.mxu0 %v2645_v32  ;;  %v2738_v31 = vld [vmem:[%s3720_s1 + $0x314] ss:$8 sps:$4 sm:$0xff]   ;;  %v2756_v47 = vld [vmem:[%s3720_s1 + $0x3e4] ss:$8 sps:$4 sm:$0xff]   ;;  %v2751_v48 = vld [vmem:[%s3720_s1 + $0x2e0] ss:$8 sps:$4 sm:$0xff]  }
  0x21   :  { %992 = vmatprep.subr.bf16.mxu1 %v2647_v33  ;;  %v3257_v32 = vld [vmem:[%s3719_s0 + $0x10] sm:$0xff] }
  0x22   :  { %v2733_v33 = vld [vmem:[%s3720_s1 + $0x210] ss:$8 sps:$4 sm:$0xff]  }
  0x23   :  { %952 = vmatpush2.bf16.msra.mxu0 %v2649_v34  ;;  %v2736_v34 = vld [vmem:[%s3720_s1 + $0x310] ss:$8 sps:$4 sm:$0xff]  }
  0x24   :  { %993 = vmatpush2.bf16.msra.mxu1 %v2650_v35  ;;  %953 = vmatprep.subr.bf16.mxu0 %v2651_v36  ;;  %v2119_v35 = vcombine.high %v3257_v32, %v3257_v32  ;;  %v3270_v36 = vld [vmem:[%s3719_s0 + $0x18] sm:$0xff] }
  0x25   :  { %994 = vmatprep.subr.bf16.mxu1 %v2653_v37  ;;  %v2741_v37 = vld [vmem:[%s3720_s1 + $0x204] ss:$8 sps:$4 sm:$0xff]  }
  0x27   :  { %954 = vmatpush2.bf16.msra.mxu0 %v2655_v38  ;;  %v2121_v38 = vcombine.high %v3270_v36, %v3270_v36 }
  0x28   :  { %995 = vmatpush2.bf16.msra.mxu1 %v2656_v39  ;;  %955 = vmatprep.subr.bf16.mxu0 %v2657_v40  ;;  %v2744_v39 = vld [vmem:[%s3720_s1 + $0x304] ss:$8 sps:$4 sm:$0xff]   ;;  %v2739_v40 = vld [vmem:[%s3720_s1 + $0x200] ss:$8 sps:$4 sm:$0xff]  }
  0x29   :  { %996 = vmatprep.subr.bf16.mxu1 %v2659_v41  ;;  %v2742_v41 = vld [vmem:[%s3720_s1 + $0x300] ss:$8 sps:$4 sm:$0xff]  }
  0x2b   :  { %956 = vmatpush2.bf16.msra.mxu0 %v2661_v42  ;;  %v2747_v42 = vld [vmem:[%s3720_s1 + $0x2f4] ss:$8 sps:$4 sm:$0xff]  }
  0x2c   :  { %997 = vmatpush2.bf16.msra.mxu1 %v2662_v43  ;;  %957 = vmatprep.subr.bf16.mxu0 %v2663_v44  ;;  %v2750_v43 = vld [vmem:[%s3720_s1 + $0x3f4] ss:$8 sps:$4 sm:$0xff]   ;;  %v2745_v44 = vld [vmem:[%s3720_s1 + $0x2f0] ss:$8 sps:$4 sm:$0xff]  }
  0x2d   :  { %998 = vmatprep.subr.bf16.mxu1 %v2665_v45  ;;  %v2748_v45 = vld [vmem:[%s3720_s1 + $0x3f0] ss:$8 sps:$4 sm:$0xff]  }
  0x2f   :  { %958 = vmatpush2.bf16.msra.mxu0 %v2667_v49  ;;  %v2754_v49 = vld [vmem:[%s3720_s1 + $0x3e0] ss:$8 sps:$4 sm:$0xff]  }
  0x30   :  { %999 = vmatpush2.bf16.msra.mxu1 %v2668_v50  ;;  %959 = vmatprep.subr.bf16.mxu0 %v2669_v52  ;;  %v2759_v50 = vld [vmem:[%s3720_s1 + $0x2d4] ss:$8 sps:$4 sm:$0xff]   ;;  %v2757_v52 = vld [vmem:[%s3720_s1 + $0x2d0] ss:$8 sps:$4 sm:$0xff]  }
  0x31   :  { %1000 = vmatprep.subr.bf16.mxu1 %v2671_v53  ;;  %v2760_v53 = vld [vmem:[%s3720_s1 + $0x3d0] ss:$8 sps:$4 sm:$0xff]  }
  0x33   :  { %960 = vmatpush2.bf16.msra.mxu0 %v2673_v54  ;;  %v2765_v54 = vld [vmem:[%s3720_s1 + $0x2c4] ss:$8 sps:$4 sm:$0xff]  }
  0x34   :  { %1001 = vmatpush2.bf16.msra.mxu1 %v2674_v55  ;;  %961 = vmatprep.subr.bf16.mxu0 %v2675_v56  ;;  %v2768_v55 = vld [vmem:[%s3720_s1 + $0x3c4] ss:$8 sps:$4 sm:$0xff]   ;;  %v2763_v56 = vld [vmem:[%s3720_s1 + $0x2c0] ss:$8 sps:$4 sm:$0xff]  }
  0x35   :  { %1002 = vmatprep.subr.bf16.mxu1 %v2677_v57  ;;  %v2766_v57 = vld [vmem:[%s3720_s1 + $0x3c0] ss:$8 sps:$4 sm:$0xff]  }
  0x37   :  { %962 = vmatpush2.bf16.msra.mxu0 %v2679_v58  ;;  %v2771_v58 = vld [vmem:[%s3720_s1 + $0x2b4] ss:$8 sps:$4 sm:$0xff]  }
  0x38   :  { %1003 = vmatpush2.bf16.msra.mxu1 %v2680_v59  ;;  %963 = vmatprep.subr.bf16.mxu0 %v2681_v60  ;;  %v2774_v59 = vld [vmem:[%s3720_s1 + $0x3b4] ss:$8 sps:$4 sm:$0xff]   ;;  %v2769_v60 = vld [vmem:[%s3720_s1 + $0x2b0] ss:$8 sps:$4 sm:$0xff]  }
  0x39   :  { %1004 = vmatprep.subr.bf16.mxu1 %v2683_v61  ;;  %v2772_v61 = vld [vmem:[%s3720_s1 + $0x3b0] ss:$8 sps:$4 sm:$0xff]  }
  0x3b   :  { %964 = vmatpush2.bf16.msra.mxu0 %v2685_v62  ;;  %v2777_v62 = vld [vmem:[%s3720_s1 + $0x2a4] ss:$8 sps:$4 sm:$0xff]  }
  0x3c   :  { %1005 = vmatpush2.bf16.msra.mxu1 %v2686_v63  ;;  %965 = vmatprep.subr.bf16.mxu0 %v2687_v0  ;;  %v2780_v63 = vld [vmem:[%s3720_s1 + $0x3a4] ss:$8 sps:$4 sm:$0xff]   ;;  %v2775_v0 = vld [vmem:[%s3720_s1 + $0x2a0] ss:$8 sps:$4 sm:$0xff]  }
  0x3d   :  { %1006 = vmatprep.subr.bf16.mxu1 %v2689_v1  ;;  %v2778_v1 = vld [vmem:[%s3720_s1 + $0x3a0] ss:$8 sps:$4 sm:$0xff]  }
  0x3f   :  { %966 = vmatpush2.bf16.msra.mxu0 %v2691_v2  ;;  %v2783_v2 = vld [vmem:[%s3720_s1 + $0x294] ss:$8 sps:$4 sm:$0xff]  }
  0x40   :  { %1007 = vmatpush2.bf16.msra.mxu1 %v2692_v3  ;;  %1017 = vmatprep.subr.bf16.mxu0 %v2699_v4  ;;  %v2786_v3 = vld [vmem:[%s3720_s1 + $0x394] ss:$8 sps:$4 sm:$0xff]   ;;  %v2781_v4 = vld [vmem:[%s3720_s1 + $0x290] ss:$8 sps:$4 sm:$0xff]  }
  0x41   :  { %1058 = vmatprep.subr.bf16.mxu1 %v2702_v5  ;;  %v2784_v5 = vld [vmem:[%s3720_s1 + $0x390] ss:$8 sps:$4 sm:$0xff]  }
  0x42   :  { %968 = vmatmul.mubr.bf16.vlgmr.msra.gmra.mxu0 %v2114_v6  ;;  %v2789_v6 = vld [vmem:[%s3720_s1 + $0x284] ss:$8 sps:$4 sm:$0xff]  }
  0x43   :  { %1009 = vmatmul.mubr.bf16.vlgmr.msra.gmra.mxu1 %v2116_v7  ;;  %1018 = vmatpush1.bf16.msra.mxu0 %v2697_v8  ;;  %v2792_v7 = vld [vmem:[%s3720_s1 + $0x384] ss:$8 sps:$4 sm:$0xff]   ;;  %v2787_v8 = vld [vmem:[%s3720_s1 + $0x280] ss:$8 sps:$4 sm:$0xff]  }
  0x44   :  { %1059 = vmatpush1.bf16.msra.mxu1 %v2700_v9  ;;  %1019 = vmatprep.subr.bf16.mxu0 %v2705_v10  ;;  %v2790_v9 = vld [vmem:[%s3720_s1 + $0x380] ss:$8 sps:$4 sm:$0xff]   ;;  %v2797_v10 = vld [vmem:[%s3720_s1 + $0x474] ss:$8 sps:$4 sm:$0xff]  }
  0x45   :  { %1060 = vmatprep.subr.bf16.mxu1 %v2708_v11  ;;  %1049 = vmatprep.mubr.bf16.mxu0 %v2119_v35  ;;  %v2795_v11 = vld [vmem:[%s3720_s1 + $0x470] ss:$8 sps:$4 sm:$0xff]  }
  0x46   :  { %1090 = vmatprep.mubr.bf16.mxu1 %v2121_v38 }
  0x47   :  { %1020 = vmatpush1.bf16.msra.mxu0 %v2703_v12  ;;  %v2118_v12 = vcombine.low %v3257_v32, %v3257_v32 }
  0x48   :  { %1061 = vmatpush1.bf16.msra.mxu1 %v2706_v13  ;;  %1021 = vmatprep.subr.bf16.mxu0 %v2711_v14  ;;  %v2120_v13 = vcombine.low %v3270_v36, %v3270_v36  ;;  %v2802_v14 = vld [vmem:[%s3720_s1 + $0x464] ss:$8 sps:$4 sm:$0xff]  }
  0x49   :  { %1062 = vmatprep.subr.bf16.mxu1 %v2714_v15  ;;  %v2800_v15 = vld [vmem:[%s3720_s1 + $0x460] ss:$8 sps:$4 sm:$0xff]  }
  0x4b   :  { %1022 = vmatpush1.bf16.msra.mxu0 %v2709_v16  ;;  %v2805_v16 = vld [vmem:[%s3720_s1 + $0x454] ss:$8 sps:$4 sm:$0xff]  }
  0x4c   :  { %1063 = vmatpush1.bf16.msra.mxu1 %v2712_v17  ;;  %1023 = vmatprep.subr.bf16.mxu0 %v2717_v18  ;;  %v2924_v17 = vmov 0   ;;  %v2803_v18 = vld [vmem:[%s3720_s1 + $0x450] ss:$8 sps:$4 sm:$0xff]  }
  0x4d   :  { %1064 = vmatprep.subr.bf16.mxu1 %v2720_v19  ;;  %v2808_v19 = vld [vmem:[%s3720_s1 + $0x444] ss:$8 sps:$4 sm:$0xff]  }
  0x4f   :  { %1024 = vmatpush1.bf16.msra.mxu0 %v2715_v20  ;;  %v2806_v20 = vld [vmem:[%s3720_s1 + $0x440] ss:$8 sps:$4 sm:$0xff]  }
  0x50   :  { %1065 = vmatpush1.bf16.msra.mxu1 %v2718_v21  ;;  %1025 = vmatprep.subr.bf16.mxu0 %v2723_v22  ;;  %v2811_v21 = vld [vmem:[%s3720_s1 + $0x434] ss:$8 sps:$4 sm:$0xff]   ;;  %v2809_v22 = vld [vmem:[%s3720_s1 + $0x430] ss:$8 sps:$4 sm:$0xff]  }
  0x51   :  { %1066 = vmatprep.subr.bf16.mxu1 %v2726_v23  ;;  %v2814_v23 = vld [vmem:[%s3720_s1 + $0x424] ss:$8 sps:$4 sm:$0xff]  }
  0x53   :  { %1026 = vmatpush1.bf16.msra.mxu0 %v2721_v24  ;;  %v2812_v24 = vld [vmem:[%s3720_s1 + $0x420] ss:$8 sps:$4 sm:$0xff]  }
  0x54   :  { %1067 = vmatpush1.bf16.msra.mxu1 %v2724_v25  ;;  %1027 = vmatprep.subr.bf16.mxu0 %v2729_v26  ;;  %v2817_v25 = vld [vmem:[%s3720_s1 + $0x414] ss:$8 sps:$4 sm:$0xff]  }
  0x55   :  { %1068 = vmatprep.subr.bf16.mxu1 %v2732_v27 }
  0x57   :  { %1028 = vmatpush1.bf16.msra.mxu0 %v2727_v28 }
  0x58   :  { %1069 = vmatpush1.bf16.msra.mxu1 %v2730_v29  ;;  %1029 = vmatprep.subr.bf16.mxu0 %v2735_v30 }
  0x59   :  { %1070 = vmatprep.subr.bf16.mxu1 %v2738_v31 }
  0x5b   :  { %1030 = vmatpush1.bf16.msra.mxu0 %v2733_v33 }
  0x5c   :  { %1071 = vmatpush1.bf16.msra.mxu1 %v2736_v34  ;;  %1031 = vmatprep.subr.bf16.mxu0 %v2741_v37 }
  0x5d   :  { %1072 = vmatprep.subr.bf16.mxu1 %v2744_v39 }
  0x5f   :  { %1032 = vmatpush1.bf16.msra.mxu0 %v2739_v40 }
  0x60   :  { %1073 = vmatpush1.bf16.msra.mxu1 %v2742_v41  ;;  %1033 = vmatprep.subr.bf16.mxu0 %v2747_v42 }
  0x61   :  { %1074 = vmatprep.subr.bf16.mxu1 %v2750_v43 }
  0x63   :  { %1034 = vmatpush2.bf16.msra.mxu0 %v2745_v44 }
  0x64   :  { %1075 = vmatpush2.bf16.msra.mxu1 %v2748_v45  ;;  %1035 = vmatprep.subr.bf16.mxu0 %v2753_v46 }
  0x65   :  { %1076 = vmatprep.subr.bf16.mxu1 %v2756_v47 }
  0x67   :  { %1036 = vmatpush2.bf16.msra.mxu0 %v2751_v48 }
  0x68   :  { %1077 = vmatpush2.bf16.msra.mxu1 %v2754_v49  ;;  %1037 = vmatprep.subr.bf16.mxu0 %v2759_v50 }
  0x69   :  { %1078 = vmatprep.subr.bf16.mxu1 %v2762_v51 }
  0x6b   :  { %1038 = vmatpush2.bf16.msra.mxu0 %v2757_v52 }
  0x6c   :  { %1079 = vmatpush2.bf16.msra.mxu1 %v2760_v53  ;;  %1039 = vmatprep.subr.bf16.mxu0 %v2765_v54 }
  0x6d   :  { %1080 = vmatprep.subr.bf16.mxu1 %v2768_v55 }
  0x6f   :  { %1040 = vmatpush2.bf16.msra.mxu0 %v2763_v56 }
  0x70   :  { %1081 = vmatpush2.bf16.msra.mxu1 %v2766_v57  ;;  %1041 = vmatprep.subr.bf16.mxu0 %v2771_v58 }
  0x71   :  { %1082 = vmatprep.subr.bf16.mxu1 %v2774_v59 }
  0x73   :  { %1042 = vmatpush2.bf16.msra.mxu0 %v2769_v60 }
  0x74   :  { %1083 = vmatpush2.bf16.msra.mxu1 %v2772_v61  ;;  %1043 = vmatprep.subr.bf16.mxu0 %v2777_v62 }
  0x75   :  { %1084 = vmatprep.subr.bf16.mxu1 %v2780_v63 }
  0x77   :  { %1044 = vmatpush2.bf16.msra.mxu0 %v2775_v0 }
  0x78   :  { %1085 = vmatpush2.bf16.msra.mxu1 %v2778_v1  ;;  %1045 = vmatprep.subr.bf16.mxu0 %v2783_v2 }
  0x79   :  { %1086 = vmatprep.subr.bf16.mxu1 %v2786_v3 }
  0x7b   :  { %1046 = vmatpush2.bf16.msra.mxu0 %v2781_v4 }
  0x7c   :  { %1087 = vmatpush2.bf16.msra.mxu1 %v2784_v5  ;;  %1047 = vmatprep.subr.bf16.mxu0 %v2789_v6 }
  0x7d   :  { %1088 = vmatprep.subr.bf16.mxu1 %v2792_v7 }
  0x7f   :  { %1048 = vmatpush2.bf16.msra.mxu0 %v2787_v8 }
  0x80   :  { %1089 = vmatpush2.bf16.msra.mxu1 %v2790_v9  ;;  %1099 = vmatprep.subr.bf16.mxu0 %v2797_v10 }
  0x82   :  { %1050 = vmatmul.mubr.bf16.vlgmr.msra.gmra.mxu0 %v2118_v12 }
  0x83   :  { %1091 = vmatmul.mubr.bf16.vlgmr.msra.gmra.mxu1 %v2120_v13  ;;  %1100 = vmatpush1.bf16.msra.mxu0 %v2795_v11 }
  0x84   :  { %1131 = vmatprep.mubr.bf16.mxu0 %v2924_v17  ;;  %1101 = vmatprep.subr.bf16.mxu0 %v2802_v14 }
  0x87   :  { %1102 = vmatpush1.bf16.msra.mxu0 %v2800_v15 }
  0x88   :  { %1103 = vmatprep.subr.bf16.mxu0 %v2805_v16 }
  0x8b   :  { %1104 = vmatpush1.bf16.msra.mxu0 %v2803_v18 }
  0x8c   :  { %1105 = vmatprep.subr.bf16.mxu0 %v2808_v19 }
  0x8f   :  { %1106 = vmatpush1.bf16.msra.mxu0 %v2806_v20 }
  0x90   :  { %1107 = vmatprep.subr.bf16.mxu0 %v2811_v21 }
  0x93   :  { %1108 = vmatpush1.bf16.msra.mxu0 %v2809_v22 }
  0x94   :  { %1109 = vmatprep.subr.bf16.mxu0 %v2814_v23 }
  0x95   :  { %14 = vsyncpa [#allocation3], 0  ;;  %v2815_v26 = vld [vmem:[%s3720_s1 + $0x410] ss:$8 sps:$4 sm:$0xff]   ;;  %v2820_v27 = vld [vmem:[%s3720_s1 + $0x404] ss:$8 sps:$4 sm:$0xff]   ;;  %v1142_v18 = vlaneseq }
  0x96   :  { %v2818_v28 = vld [vmem:[%s3720_s1 + $0x400] ss:$8 sps:$4 sm:$0xff]   ;;  %v2822_v30 = vld [vmem:[%s3722_s3 + $0x78] sm:$0xff]   ;;  %v2826_v34 = vld [vmem:[%s3722_s3 + $0x70] sm:$0xff]   ;;  %vm2926_vm0 = vmmov 0   ;;  %s2927_s14 = smov [#allocation2]  }
  0x97   :  { %1110 = vmatpush1.bf16.msra.mxu0 %v2812_v24  ;;  %v2821_v29 = vld [vmem:[%s3719_s0 + $0x20] ss:$0 sps:$4 sm:$0xff]   ;;  %v2823_v31 = vld [vmem:[%s3722_s3 + $0x38] sm:$0xff]   ;;  %v2828_v35 = vld [vmem:[%s3722_s3 + $0xf0] sm:$0xff]   ;;  %v1143_v19 = vshrl.u32 %v1142_v18, 7  ;;  %s2106_s15 = sshll.u32 %s2927_s14, 4  ;;  %s2107_s15 = int_to_ptr.vmem [resolvable:$true] %s2106_s15 }
  0x98   :  { %1111 = vmatprep.subr.bf16.mxu0 %v2817_v25  ;;  %v2824_v32 = vld [vmem:[%s3722_s3 + $0xf8] sm:$0xff]   ;;  %v2827_v36 = vld [vmem:[%s3722_s3 + $0x30] sm:$0xff]   ;;  %v2830_v38 = vld [vmem:[%s3722_s3 + $0x68] sm:$0xff]   ;;  %vm2098_vm1 = vcmask 517120   ;;  %p2907_p1 = scmp.lt.s32.totalorder %s2107_s15, %s2107_s15 }
  0x99   :  { %v2825_v33 = vld [vmem:[%s3722_s3 + $0xb8] sm:$0xff]   ;;  %2447 = vmatprep.subr.bf16.mxu1 %v2824_v32  ;;  %v2829_v37 = vld [vmem:[%s3722_s3 + $0xb0] sm:$0xff]   ;;  %v2832_v39 = vld [vmem:[%s3722_s3 + $0xe8] sm:$0xff]   ;;  %v1144_v21 = vsub.s32 0, %v1143_v19  ;;  %v1148_v24 = vsub.s32 1, %v1143_v19  ;;  %v2925_v19 = vmov 0.0  }
  0x9a   :  { %2448 = vmatpush3.bf16.msra.mxu1 %v2825_v33  ;;  %v2831_v40 = vld [vmem:[%s3722_s3 + $0x28] sm:$0xff]   ;;  %v2834_v42 = vld [vmem:[%s3722_s3 + $0x60] sm:$0xff]   ;;  %v2838_v46 = vld [vmem:[%s3722_s3 + $0x58] sm:$0xff]  }
  0x9b   :  { %1112 = vmatpush1.bf16.msra.mxu0 %v2815_v26  ;;  %2449 = vmatprep.subr.bf16.mxu1 %v2828_v35  ;;  %v2833_v41 = vld [vmem:[%s3722_s3 + $0xa8] sm:$0xff]   ;;  %v2836_v43 = vld [vmem:[%s3722_s3 + $0xe0] sm:$0xff]   ;;  %v2840_v47 = vld [vmem:[%s3722_s3 + $0xd8] sm:$0xff]  }
  0x9c   :  { %1113 = vmatprep.subr.bf16.mxu0 %v2820_v27  ;;  %v2835_v44 = vld [vmem:[%s3722_s3 + $0x20] sm:$0xff]   ;;  %v2839_v48 = vld [vmem:[%s3722_s3 + $0x18] sm:$0xff]   ;;  %v2842_v50 = vld [vmem:[%s3722_s3 + $0x50] sm:$0xff]  }
  0x9d   :  { %v2837_v45 = vld [vmem:[%s3722_s3 + $0xa0] sm:$0xff]   ;;  %v2841_v49 = vld [vmem:[%s3722_s3 + $0x98] sm:$0xff]   ;;  %v2843_v51 = vld [vmem:[%s3722_s3 + $0x10] sm:$0xff]  }
  0x9e   :  { %2450 = vmatpush3.bf16.msra.mxu1 %v2829_v37  ;;  %v2844_v52 = vld [vmem:[%s3722_s3 + $0xd0] sm:$0xff]   ;;  %v2846_v54 = vld [vmem:[%s3722_s3 + $0x48] sm:$0xff]   ;;  %v2850_v58 = vld [vmem:[%s3722_s3 + $0x40] sm:$0xff]  }
  0x9f   :  { %1114 = vmatpush1.bf16.msra.mxu0 %v2818_v28  ;;  %2451 = vmatprep.subr.bf16.mxu1 %v2832_v39  ;;  %v2845_v53 = vld [vmem:[%s3722_s3 + $0x90] sm:$0xff]   ;;  %v2847_v55 = vld [vmem:[%s3722_s3 + $0x8] sm:$0xff]   ;;  %v2851_v59 = vld [vmem:[%s3722_s3] sm:$0xff]  }
  0xa0   :  { %2469 = vmatprep.subr.bf16.mxu0 %v2822_v30  ;;  %v2848_v56 = vld [vmem:[%s3722_s3 + $0xc8] sm:$0xff]   ;;  %v2852_v60 = vld [vmem:[%s3722_s3 + $0xc0] sm:$0xff]   ;;  %v2854_v62 = vld [vmem:[%s3722_s3 + $0x1f8] sm:$0xff]  }
  0xa1   :  { %v2849_v57 = vld [vmem:[%s3722_s3 + $0x88] sm:$0xff]   ;;  %v2853_v61 = vld [vmem:[%s3722_s3 + $0x80] sm:$0xff]   ;;  %v2856_v63 = vld [vmem:[%s3722_s3 + $0x178] sm:$0xff]  }
  0xa2   :  { %1132 = vmatmul.mubr.bf16.vlgmr.msra.gmra.mxu0 %v2821_v29  ;;  %2452 = vmatpush3.bf16.msra.mxu1 %v2833_v41  ;;  %v1140_v22 = vld [vmem:[%s3721_s2] ss:$2 sm:$0x3]  ;;  %v2267_v25 = vld [vmem:[%s3721_s2 + $0x1] ss:$2 sm:$0x3] }
  0xa3   :  { %2470 = vmatpush3.bf16.msra.mxu0 %v2823_v31  ;;  %2453 = vmatprep.subr.bf16.mxu1 %v2836_v43  ;;  %v1145_v27 = vrot.slane %v1140_v22, %v1144_v21  ;;  %v1160_v31 = vrot.slane %v2267_v25, %v1144_v21  ;;  %v1149_v32 = vrot.slane %v1140_v22, %v1148_v24  ;;  %v2886_v18 = vld [vmem:[%s3724_s5 + $0x38] sm:$0xff]   ;;  %v2888_v21 = vld [vmem:[%s3724_s5 + $0x28] sm:$0xff]   ;;  %v2889_v22 = vld [vmem:[%s3724_s5 + $0x20] sm:$0xff]  }
  0xa4   :  { %2471 = vmatprep.subr.bf16.mxu0 %v2826_v34 }
  0xa6   :  { %2454 = vmatpush3.bf16.msra.mxu1 %v2837_v45 }
  0xa7   :  { %2472 = vmatpush3.bf16.msra.mxu0 %v2827_v36  ;;  %2455 = vmatprep.subr.bf16.mxu1 %v2840_v47  ;;  %v1164_v36 = vrot.slane %v2267_v25, %v1148_v24  ;;  %v2891_v24 = vld [vmem:[%s3724_s5 + $0x10] sm:$0xff]   ;;  %v2892_v25 = vld [vmem:[%s3724_s5 + $0x8] sm:$0xff]  }
  0xa8   :  { %2473 = vmatprep.subr.bf16.mxu0 %v2830_v38 }
  0xaa   :  { %2456 = vmatpush3.bf16.msra.mxu1 %v2841_v49  ;;  %v2857_v49 = vld [vmem:[%s3722_s3 + $0x138] sm:$0xff]  }
  0xab   :  { %2474 = vmatpush3.bf16.msra.mxu0 %v2831_v40  ;;  %2457 = vmatprep.subr.bf16.mxu1 %v2844_v52  ;;  %v2860_v52 = vld [vmem:[%s3722_s3 + $0x170] sm:$0xff]  }
  0xac   :  { %2475 = vmatprep.subr.bf16.mxu0 %v2834_v42 }
  0xae   :  { %2458 = vmatpush3.bf16.msra.mxu1 %v2845_v53 }
  0xaf   :  { %2476 = vmatpush3.bf16.msra.mxu0 %v2835_v44  ;;  %2459 = vmatprep.subr.bf16.mxu1 %v2848_v56  ;;  %v2861_v56 = vld [vmem:[%s3722_s3 + $0x130] sm:$0xff]  }
  0xb0   :  { %2477 = vmatprep.subr.bf16.mxu0 %v2838_v46  ;;  %v2855_v46 = vld [vmem:[%s3722_s3 + $0x1b8] sm:$0xff]  }
  0xb2   :  { %2460 = vmatpush3.bf16.msra.mxu1 %v2849_v57  ;;  %v2864_v57 = vld [vmem:[%s3722_s3 + $0x168] sm:$0xff]  }
  0xb3   :  { %2478 = vmatpush3.bf16.msra.mxu0 %v2839_v48  ;;  %2461 = vmatprep.subr.bf16.mxu1 %v2852_v60  ;;  %v2865_v60 = vld [vmem:[%s3722_s3 + $0x128] sm:$0xff]  }
  0xb4   :  { %2479 = vmatprep.subr.bf16.mxu0 %v2842_v50 }
  0xb6   :  { %2462 = vmatpush3.bf16.msra.mxu1 %v2853_v61  ;;  %v2868_v61 = vld [vmem:[%s3722_s3 + $0x160] sm:$0xff]  }
  0xb7   :  { %2480 = vmatpush3.bf16.msra.mxu0 %v2843_v51  ;;  %2491 = vmatprep.subr.bf16.mxu1 %v2856_v63  ;;  %v2858_v51 = vld [vmem:[%s3722_s3 + $0x1f0] sm:$0xff]   ;;  %v2870_v63 = vld [vmem:[%s3722_s3 + $0x1d8] sm:$0xff]  }
  0xb8   :  { %2481 = vmatprep.subr.bf16.mxu0 %v2846_v54  ;;  %v2859_v54 = vld [vmem:[%s3722_s3 + $0x1b0] sm:$0xff]  }
  0xbb   :  { %2482 = vmatpush3.bf16.msra.mxu0 %v2847_v55  ;;  %v2862_v55 = vld [vmem:[%s3722_s3 + $0x1e8] sm:$0xff]  }
  0xbc   :  { %2483 = vmatprep.subr.bf16.mxu0 %v2850_v58  ;;  %v2863_v58 = vld [vmem:[%s3722_s3 + $0x1a8] sm:$0xff]  }
  0xbf   :  { %2484 = vmatpush3.bf16.msra.mxu0 %v2851_v59  ;;  %v2866_v59 = vld [vmem:[%s3722_s3 + $0x1e0] sm:$0xff]  }
  0xc0   :  { %2513 = vmatprep.subr.bf16.mxu0 %v2854_v62  ;;  %v2867_v62 = vld [vmem:[%s3722_s3 + $0x1a0] sm:$0xff]  }
 0x102   :  { %v969_v0 = vpop.f32.mrf.mxu0 }
 0x103   :  { %v1010_v1 = vpop.f32.mrf.mxu1 }
 0x104   :  { %v1011_v2 = vadd.f32 %v1010_v1, %v969_v0  ;;  %v971_v3 = vpop.f32.mrf.mxu0  ;;  %v2869_v0 = vld [vmem:[%s3722_s3 + $0x120] sm:$0xff]   ;;  %v2872_v1 = vld [vmem:[%s3722_s3 + $0x158] sm:$0xff]  }
 0x105   :  { %v1012_v4 = vpop.f32.mrf.mxu1 }
 0x106   :  { %v1013_v5 = vadd.f32 %v1012_v4, %v971_v3  ;;  %v973_v6 = vpop.f32.mrf.mxu0  ;;  %v2874_v3 = vld [vmem:[%s3722_s3 + $0x1d0] sm:$0xff]   ;;  %v2873_v4 = vld [vmem:[%s3722_s3 + $0x118] sm:$0xff]  }
 0x107   :  { %v1014_v7 = vpop.f32.mrf.mxu1  ;;  %v2875_v6 = vld [vmem:[%s3722_s3 + $0x190] sm:$0xff]  }
 0x108   :  { %v974_v8 = vpop.f32.mrf.mxu0  ;;  %v2878_v7 = vld [vmem:[%s3722_s3 + $0x1c8] sm:$0xff]  }
 0x109   :  { %v1015_v9 = vpop.f32.mrf.mxu1  ;;  %v2877_v8 = vld [vmem:[%s3722_s3 + $0x110] sm:$0xff]  }
 0x10a   :  { %v2880_v9 = vld [vmem:[%s3722_s3 + $0x148] sm:$0xff]  }
 0x142   :  { %v1051_v10 = vpop.f32.mrf.mxu0 }
 0x143   :  { %v1092_v11 = vpop.f32.mrf.mxu1  ;;  %v1052_v20 = vadd.f32 %v1051_v10, %v1011_v2  ;;  %v2871_v2 = vld [vmem:[%s3722_s3 + $0x198] sm:$0xff]   ;;  %v2879_v10 = vld [vmem:[%s3722_s3 + $0x188] sm:$0xff]  }
 0x144   :  { %v1053_v12 = vpop.f32.mrf.mxu0 }
 0x145   :  { %v1094_v13 = vpop.f32.mrf.mxu1  ;;  %v1054_v23 = vadd.f32 %v1053_v12, %v1013_v5  ;;  %v1093_v26 = vadd.f32 %v1092_v11, %v1052_v20  ;;  %v2876_v5 = vld [vmem:[%s3722_s3 + $0x150] sm:$0xff]   ;;  %v2882_v11 = vld [vmem:[%s3722_s3 + $0x1c0] sm:$0xff]   ;;  %v2881_v12 = vld [vmem:[%s3722_s3 + $0x108] sm:$0xff]  }
 0x146   :  { %v1055_v14 = vpop.f32.mrf.mxu0  ;;  %v2887_v20 = vld [vmem:[%s3724_s5 + $0x30] sm:$0xff]  }
 0x147   :  { %v1096_v15 = vpop.f32.mrf.mxu1  ;;  %v1095_v29 = vadd.f32 %v1094_v13, %v1054_v23  ;;  %v2884_v13 = vld [vmem:[%s3722_s3 + $0x140] sm:$0xff]   ;;  %v2890_v23 = vld [vmem:[%s3724_s5 + $0x18] sm:$0xff]  }
 0x148   :  { %v1056_v16 = vpop.f32.mrf.mxu0  ;;  %v2883_v14 = vld [vmem:[%s3722_s3 + $0x180] sm:$0xff]  }
 0x149   :  { %v1097_v17 = vpop.f32.mrf.mxu1  ;;  %v2885_v15 = vld [vmem:[%s3722_s3 + $0x100] sm:$0xff]  }
 0x162   :  { %v1133_v28 = vpop.f32.mrf.mxu0 }
 0x163   :  { %v1134_v30 = vadd.f32 %v1133_v28, %v1093_v26  ;;  %v2893_v26 = vld [vmem:[%s3724_s5] sm:$0xff]   ;;  %v2895_v28 = vld [vmem:[%s3726_s7 + $0x30] sm:$0xff]  }
 0x164   :  { %v1135_v33 = vpop.f32.mrf.mxu0 }
 0x165   :  { %v1152_v34 = vmul.f32 %v1145_v27, %v1134_v30  ;;  %v1136_v35 = vadd.f32 %v1135_v33, %v1095_v29  ;;  %v2894_v27 = vld [vmem:[%s3726_s7 + $0x38] sm:$0xff]   ;;  %v2896_v29 = vld [vmem:[%s3726_s7 + $0x28] sm:$0xff]   ;;  %v2897_v30 = vld [vmem:[%s3726_s7 + $0x20] sm:$0xff]  }
 0x166   :  { %v1137_v37 = vpop.f32.mrf.mxu0 }
 0x167   :  { %v1167_v38 = vadd.f32 %v1160_v31, %v1152_v34  ;;  %v1153_v39 = vmul.f32 %v1149_v32, %v1136_v35  ;;  %v2898_v31 = vld [vmem:[%s3726_s7 + $0x18] sm:$0xff]   ;;  %v2899_v32 = vld [vmem:[%s3726_s7 + $0x10] sm:$0xff]  }
 0x168   :  { %v1138_v40 = vpop.f32.mrf.mxu0 }
 0x169   :  { %v1169_v41 = vmax.f32 %v1167_v38, 0.0  ;;  %v1168_v42 = vadd.f32 %v1164_v36, %v1153_v39 }
 0x16b   :  { %v1170_v43 = vmax.f32 %v1168_v42, 0.0  ;;  %v3545_v44 = vpack.c.bf16 %v1169_v41, %v1169_v41 }
 0x16d   :  { %v1172_v45 = vpack.c.bf16 %v1170_v43, %v1170_v43  ;;  %v1240_v50 = vrot.slane %v3545_v44, 1  ;;  %v1723_v16 = vrot.slane %v3545_v44, 3  ;;  %v1549_v17 = vrot.slane %v3545_v44, 2 }
 0x16f   :  { %1508 = vmatprep.mubr.bf16.mxu0 %v1172_v45  ;;  %v1241_v47 = vrot.slane %v1172_v45, 1  ;;  %v1724_v48 = vrot.slane %v1172_v45, 3  ;;  %v1550_v53 = vrot.slane %v1172_v45, 2 }
 0x170   :  { %1509 = vmatmul.mubr.bf16.vlgmr.msra.gmra.mxu0 %v3545_v44 }
 0x171   :  { %2514 = vmatpush3.bf16.msra.mxu0 %v2855_v46  ;;  %1372 = vmatprep.mubr.bf16.mxu1 %v1241_v47 }
 0x172   :  { %1855 = vmatprep.mubr.bf16.mxu0 %v1724_v48  ;;  %1373 = vmatmul.mubr.bf16.vlgmr.msra.gmra.mxu1 %v1240_v50 }
 0x173   :  { %2492 = vmatpush3.bf16.msra.mxu1 %v2857_v49  ;;  %1681 = vmatprep.mubr.bf16.mxu1 %v1550_v53 }
 0x174   :  { %2515 = vmatprep.subr.bf16.mxu0 %v2858_v51  ;;  %2493 = vmatprep.subr.bf16.mxu1 %v2860_v52 }
 0x175   :  { %2516 = vmatpush3.bf16.msra.mxu0 %v2859_v54  ;;  %v2428_v54 = vld [vmem:[%s3723_s4] ss:$0 sm:$0xff] }
 0x176   :  { %2517 = vmatprep.subr.bf16.mxu0 %v2862_v55 }
 0x177   :  { %2494 = vmatpush3.bf16.msra.mxu1 %v2861_v56 }
 0x178   :  { %2495 = vmatprep.subr.bf16.mxu1 %v2864_v57 }
 0x179   :  { %2518 = vmatpush3.bf16.msra.mxu0 %v2863_v58 }
 0x17a   :  { %2519 = vmatprep.subr.bf16.mxu0 %v2866_v59 }
 0x17b   :  { %2496 = vmatpush3.bf16.msra.mxu1 %v2865_v60  ;;  %v2900_v60 = vld [vmem:[%s3726_s7 + $0x8] sm:$0xff]  }
 0x17c   :  { %2497 = vmatprep.subr.bf16.mxu1 %v2868_v61  ;;  %v2901_v61 = vld [vmem:[%s3726_s7] sm:$0xff]  }
 0x17d   :  { %2520 = vmatpush3.bf16.msra.mxu0 %v2867_v62  ;;  %v2429_v62 = vld [vmem:[%s3725_s6] ss:$0 sm:$0xff]  ;;  %s2902_s6 = scalar_lea.vmem %s2107_s15, 32 }
 0x17e   :  { %2521 = vmatprep.subr.bf16.mxu0 %v2870_v63  ;;  %p2903_p0 = scmp.ne.s32.totalorder %s2107_s15, %s2902_s6  ;;  %p2908_p2 = scmp.lt.s32.totalorder %s2902_s6, %s2902_s6 }
 0x17f   :  { %2498 = vmatpush3.bf16.msra.mxu1 %v2869_v0 }
 0x180   :  { %2499 = vmatprep.subr.bf16.mxu1 %v2872_v1  ;;  %p2909_p3 = por %p2908_p2, %p2907_p1 }
 0x181   :  { %2522 = vmatpush3.bf16.msra.mxu0 %v2871_v2 }
 0x182   :  { %2523 = vmatprep.subr.bf16.mxu0 %v2874_v3  ;;  %p2910_p4 = pnand %p2909_p3, %p2903_p0 }
 0x183   :  { %2500 = vmatpush3.bf16.msra.mxu1 %v2873_v4 }
 0x184   :  { %2501 = vmatprep.subr.bf16.mxu1 %v2876_v5 }
 0x185   :  { %2524 = vmatpush3.bf16.msra.mxu0 %v2875_v6  ;;  %v2438_v6 = vld [vmem:[%s3727_s8] ss:$0 sm:$0xff] }
 0x186   :  { %2525 = vmatprep.subr.bf16.mxu0 %v2878_v7 }
 0x187   :  { %2502 = vmatpush3.bf16.msra.mxu1 %v2877_v8 }
 0x188   :  { %2503 = vmatprep.subr.bf16.mxu1 %v2880_v9 }
 0x189   :  { %2526 = vmatpush3.bf16.msra.mxu0 %v2879_v10 }
 0x18a   :  { %2527 = vmatprep.subr.bf16.mxu0 %v2882_v11 }
 0x18b   :  { %2504 = vmatpush3.bf16.msra.mxu1 %v2881_v12 }
 0x18c   :  { %2505 = vmatprep.subr.bf16.mxu1 %v2884_v13 }
 0x18d   :  { %2528 = vmatpush3.bf16.msra.mxu0 %v2883_v14 }
 0x18e   :  { %2573 = vmatprep.subr.bf16.mxu0 %v2925_v19 }
 0x18f   :  { %2506 = vmatpush3.bf16.msra.mxu1 %v2885_v15 }
 0x190   :  { %1856 = vmatmul.mubr.bf16.vlgmr.msra.gmra.mxu0 %v1723_v16  ;;  %2553 = vmatprep.subr.bf16.mxu1 %v2925_v19 }
 0x191   :  { %2589 = vmatprep.mubr.msk.bf16.mxu0 %vm2926_vm0, %v2925_v19  ;;  %2574 = vmatpush3.bf16.msra.mxu0 %v2894_v27 }
 0x192   :  { %1682 = vmatmul.mubr.bf16.vlgmr.msra.gmra.mxu1 %v1549_v17  ;;  %2575 = vmatprep.subr.bf16.mxu0 %v2925_v19 }
 0x193   :  { %2554 = vmatpush3.bf16.msra.mxu1 %v2886_v18  ;;  %2569 = vmatprep.mubr.msk.bf16.mxu1 %vm2926_vm0, %v2925_v19 }
 0x194   :  { %2555 = vmatprep.subr.bf16.mxu1 %v2925_v19 }
 0x195   :  { %2576 = vmatpush3.bf16.msra.mxu0 %v2895_v28 }
 0x196   :  { %2577 = vmatprep.subr.bf16.mxu0 %v2925_v19 }
 0x197   :  { %2556 = vmatpush3.bf16.msra.mxu1 %v2887_v20 }
 0x198   :  { %2557 = vmatprep.subr.bf16.mxu1 %v2925_v19 }
 0x199   :  { %2578 = vmatpush3.bf16.msra.mxu0 %v2896_v29 }
 0x19a   :  { %2579 = vmatprep.subr.bf16.mxu0 %v2925_v19 }
 0x19b   :  { %2558 = vmatpush3.bf16.msra.mxu1 %v2888_v21 }
 0x19c   :  { %2559 = vmatprep.subr.bf16.mxu1 %v2925_v19 }
 0x19d   :  { %2580 = vmatpush3.bf16.msra.mxu0 %v2897_v30 }
 0x19e   :  { %2581 = vmatprep.subr.bf16.mxu0 %v2925_v19 }
 0x19f   :  { %2560 = vmatpush3.bf16.msra.mxu1 %v2889_v22 }
 0x1a0   :  { %2561 = vmatprep.subr.bf16.mxu1 %v2925_v19 }
 0x1a1   :  { %2582 = vmatpush3.bf16.msra.mxu0 %v2898_v31 }
 0x1a2   :  { %2583 = vmatprep.subr.bf16.mxu0 %v2925_v19 }
 0x1a3   :  { %2562 = vmatpush3.bf16.msra.mxu1 %v2890_v23 }
 0x1a4   :  { %2563 = vmatprep.subr.bf16.mxu1 %v2925_v19 }
 0x1a5   :  { %2584 = vmatpush3.bf16.msra.mxu0 %v2899_v32 }
 0x1a6   :  { %2585 = vmatprep.subr.bf16.mxu0 %v2925_v19 }
 0x1a7   :  { %2564 = vmatpush3.bf16.msra.mxu1 %v2891_v24 }
 0x1a8   :  { %2565 = vmatprep.subr.bf16.mxu1 %v2925_v19 }
 0x1a9   :  { %2586 = vmatpush3.bf16.msra.mxu0 %v2900_v60 }
 0x1aa   :  { %2587 = vmatprep.subr.bf16.mxu0 %v2925_v19 }
 0x1ab   :  { %2566 = vmatpush3.bf16.msra.mxu1 %v2892_v25 }
 0x1ac   :  { %2567 = vmatprep.subr.bf16.mxu1 %v2925_v19 }
 0x1ad   :  { %2588 = vmatpush3.bf16.msra.mxu0 %v2901_v61 }
 0x1af   :  { %2568 = vmatpush3.bf16.msra.mxu1 %v2893_v26 }
 0x230   :  { %v2485_v33 = vpop.f32.mrf.mxu0 }
 0x232   :  { %v2463_v34 = vpop.f32.mrf.mxu1  ;;  %v2486_v35 = vpop.f32.mrf.mxu0 }
 0x233   :  { %v2487_v45 = vadd.f32 %v2486_v35, %v2485_v33 }
 0x234   :  { %v2464_v36 = vpop.f32.mrf.mxu1  ;;  %v2488_v37 = vpop.f32.mrf.mxu0 }
 0x235   :  { %v2465_v42 = vadd.f32 %v2464_v36, %v2463_v34 }
 0x236   :  { %v2466_v38 = vpop.f32.mrf.mxu1  ;;  %v2489_v39 = vpop.f32.mrf.mxu0 }
 0x237   :  { %v1511_v48 = vadd.f32 %v2487_v45, %v2465_v42 }
 0x238   :  { %v2467_v40 = vpop.f32.mrf.mxu1 }
 0x250   :  { %v2529_v41 = vpop.f32.mrf.mxu0 }
 0x252   :  { %v2507_v43 = vpop.f32.mrf.mxu1  ;;  %v2530_v44 = vpop.f32.mrf.mxu0 }
 0x253   :  { %v2531_v52 = vadd.f32 %v2530_v44, %v2529_v41 }
 0x254   :  { %v2508_v46 = vpop.f32.mrf.mxu1  ;;  %v2532_v47 = vpop.f32.mrf.mxu0 }
 0x255   :  { %v2509_v49 = vadd.f32 %v2508_v46, %v2507_v43 }
 0x256   :  { %v2510_v50 = vpop.f32.mrf.mxu1  ;;  %v2533_v51 = vpop.f32.mrf.mxu0 }
 0x257   :  { %v1689_v53 = vadd.f32 %v2509_v49, %v1511_v48 }
 0x258   :  { %v2511_v55 = vpop.f32.mrf.mxu1 }
 0x259   :  { %v1863_v56 = vadd.f32 %v2531_v52, %v1689_v53 }
 0x25b   :  { %v1871_v57 = vadd.f32 %v2428_v54, %v1863_v56 }
 0x25d   :  { %v1872_v58 = vmax.f32 %v1871_v57, 0.0 }
 0x25f   :  { %v1873_v59 = vpack.c.bf16 %v1872_v58, %v1872_v58 }
 0x261   :  { %2570 = vmatmul.mubr.bf16.vlgmr.msra.gmra.mxu1 %v1873_v59 }
 0x321   :  { %v1979_v63 = vpop.f32.mrf.mxu1 }
 0x322   :  { %v1980_v0 = vadd.f32 %v2429_v62, %v1979_v63 }
 0x323   :  { %v2571_v1 = vpop.f32.mrf.mxu1 }
 0x324   :  { %v1985_v2 = vmax.f32 %v1980_v0, 0.0 }
 0x325   :  { %v1982_v3 = vpop.f32.mrf.mxu1 }
 0x326   :  { %v1986_v4 = vpack.c.bf16 %v1985_v2, %v1985_v2 }
 0x327   :  { %v2572_v5 = vpop.f32.mrf.mxu1 }
 0x328   :  { %2590 = vmatmul.mubr.bf16.vlgmr.msra.gmra.mxu0 %v1986_v4 }
 0x3e8   :  { %v2092_v7 = vpop.f32.mrf.mxu0 }
 0x3e9   :  { %v2093_v8 = vadd.f32 %v2438_v6, %v2092_v7 }
 0x3ea   :  { %v2591_v9 = vpop.f32.mrf.mxu0 }
 0x3eb   :  { %2099 = vst.msk [vmem:[#allocation2] sm:$0x3] %vm2098_vm1, %v2093_v8 }
 0x3ec   :  { %v2095_v10 = vpop.f32.mrf.mxu0 }
 0x3ed   :  { %2913 = shalt.err (!%p2910_p4)
}
 0x3ee   :  { %2109 = dma.vmem_to_hbm [thread:$0]  %s2107_s15, 32, %s3728_s9, [#allocation3]   ;;  %v2592_v11 = vpop.f32.mrf.mxu0 }
 0x3ef   :  { %2922 = dma.done.wait [#allocation3], 32  }
 0x3f0   :  { %2923 = vsyncadd [#allocation3], 4294967264 }
 0x3f1   :  { %2113 = vsyncpa [#allocation3], 1 }

</bundles_post_ra>
